<compile_context>
chip_gen: v5e
topology: v5e:2x2
jax: 0.10.0
libtpu: 0.0.40
codegen_flags: <defaults>
</compile_context>

<pallas_src>
import functools

import jax
import jax.numpy as jnp
from jax.experimental import pallas as pl
from jax.experimental.pallas import tpu as pltpu


def _round_up(x, m):
    return (x + m - 1) // m * m


def _vmem_budget_bytes():
    """Generation-aware VMEM budget: ~3/4 of physical, capped at 100 MiB.
    128 MiB chips (v5e/v6e) -> 96 MiB, 64 MiB chips (v7x) -> 48 MiB, unknown -> 48 MiB."""
    phys = 64 * 1024 * 1024
    try:
        info = pltpu.get_tpu_info()
        phys = int(getattr(info, "vmem_capacity_bytes", phys)) or phys
    except Exception:
        pass
    return int(min(phys * 3 // 4, 100 * 1024 * 1024))


# --------------------------------------------------------------------------------------
# Kernels
# --------------------------------------------------------------------------------------
def _conv_kernel_reduce(x_ref, w_ref, shift_ref, o_ref, acc_ref, *, k, TH, W):
    """General path (C1p >= 128).  grid = (B, C2T, C1T), reduction axis last.

    x_ref:     (1, TH+k-1, W+k-1, TC1)  bf16 halo'd activation tile
    w_ref:     (k*k, TC1, TC2)          bf16 conv taps (BN scale folded in)
    shift_ref: (1, TC2)                 f32 folded BN shift = beta - mean*scale
    o_ref:     (1, TH, W, TC2)
    acc_ref:   (TH*W, TC2)              f32 accumulator, lives across the C1 grid axis
    """
    c1_idx = pl.program_id(2)

    @pl.when(c1_idx == 0)
    def _init():
        acc_ref[...] = jnp.zeros_like(acc_ref)

    TC1 = x_ref.shape[-1]
    TC2 = o_ref.shape[-1]
    Hh = x_ref.shape[1]                      # TH + k - 1

    # Hoist the k horizontal (dx) shifts: k sublane-offset slices per grid step instead
    # of k*k.  W is padded to a multiple of 8 in the wrapper so the reshape is a cheap
    # sublane merge and the per-(dy) row slices below start at aligned (dy*W) offsets.
    xs = [x_ref[0, :, dx:dx + W, :].reshape(Hh * W, TC1) for dx in range(k)]

    # Pure, uninterrupted acc += dot chain (single acc load/store per grid step; lets
    # v7x keep partial sums in the MRB).
    acc = acc_ref[...]
    for dy in range(k):
        for dx in range(k):
            patch = xs[dx][dy * W:(dy + TH) * W, :]           # static, aligned row slice
            acc += jnp.dot(patch, w_ref[dy * k + dx],
                           preferred_element_type=jnp.float32)
    acc_ref[...] = acc

    @pl.when(c1_idx == pl.num_programs(2) - 1)
    def _finalize():
        y = acc_ref[...] + shift_ref[0]                       # BN (scale folded into w)
        y = y * jax.nn.sigmoid(y)                             # SiLU
        o_ref[0] = y.reshape(TH, W, TC2).astype(o_ref.dtype)


def _conv_kernel_packed(x_ref, w_ref, shift_ref, o_ref, *, k, TH, W):
    """Small-C1 path (C1p < 128).  All k*k taps packed into the contraction dim so each
    grid step is a single MXU dot with K = k*k*C1p (vs. k*k dots at a few % MXU util).

    x_ref:     (1, TH+k-1, W+k-1, C1p)   bf16
    w_ref:     (k*k*C1p, TC2)            bf16, tap-major rows
    shift_ref: (1, TC2)                  f32
    o_ref:     (1, TH, W, TC2)
    """
    C1p = x_ref.shape[-1]
    TC2 = o_ref.shape[-1]
    Hh = x_ref.shape[1]

    xs = [x_ref[0, :, dx:dx + W, :].reshape(Hh * W, C1p) for dx in range(k)]
    patches = [xs[dx][dy * W:(dy + TH) * W, :] for dy in range(k) for dx in range(k)]
    xp = patches[0] if len(patches) == 1 else jnp.concatenate(patches, axis=-1)

    y = jnp.dot(xp, w_ref[...], preferred_element_type=jnp.float32)
    y = y + shift_ref[0]
    y = y * jax.nn.sigmoid(y)
    o_ref[0] = y.reshape(TH, W, TC2).astype(o_ref.dtype)


# --------------------------------------------------------------------------------------
# Wrappers
# --------------------------------------------------------------------------------------
def conv_bn_silu_nhwc(x, weight, gamma, beta, running_mean, running_var,
                      *, k, eps=1e-3, rows_cap=None):
    """Fused Conv(k, s=1, g=1, autopad, no bias) + eval-mode BN(eps) + SiLU.

    x: (N, H, W, C1) NHWC.  weight: (C2, C1, k, k) (PyTorch OIHW).  Returns (N, H, W, C2).
    For multi-layer networks call this NHWC entry point directly and keep activations
    channels-last between layers (the NCHW adapter below only exists for the PyTorch
    boundary).  `rows_cap` optionally caps TH*W (used by the self-test to force H tiling).
    """
    assert k % 2 == 1, "autopad Conv kernel implemented for odd k only"
    # TODO(synk): stride>1 and groups>1 Conv variants are not handled by this kernel.
    N, H, W, C1 = x.shape
    C2 = weight.shape[0]
    p = k // 2                                 # autopad
    out_dtype = x.dtype
    out_itemsize = jnp.dtype(out_dtype).itemsize

    budget = _vmem_budget_bytes()

    # ---- channel tiling ----------------------------------------------------------
    C1p = _round_up(C1, 8)
    if C1p > 512:
        C1p = _round_up(C1, 128)
        TC1 = 512 if C1p % 512 == 0 else (256 if C1p % 256 == 0 else 128)
    else:
        TC1 = C1p                              # single reduction step, K up to 512
    C1T = C1p // TC1

    C2p = _round_up(C2, 128)                   # lane-dense output stores
    if C2p % 512 == 0 and budget >= 80 * 1024 * 1024:
        TC2 = 512                              # big-VMEM chips: halve x re-streams
    elif C2p % 256 == 0:
        TC2 = 256
    else:
        TC2 = 128
    C2T = C2p // TC2

    pack_taps = (C1p < 128) and (k > 1)        # stem / small-C1: one dot per grid step

    # ---- spatial tiling along H (and W padded to a sublane multiple) --------------
    W_k = _round_up(W, 8)                      # sublane-aligned in-kernel width
    Wp_k = W_k + 2 * p

    def vmem_use(th):
        hh = th + 2 * p
        x_t = hh * Wp_k * TC1 * 2                              # bf16
        w_t = k * k * TC1 * TC2 * 2
        o_t = th * W_k * TC2 * out_itemsize
        acc = 0 if pack_taps else th * W_k * TC2 * 4
        return 2 * (x_t + w_t + o_t) + acc + 2 * TC2 * 4 + (2 << 20)   # 2 MiB slack

    cap = rows_cap if rows_cap is not None else 16384
    TH = max(1, min(H, max(1, cap // W_k)))
    while TH > 1 and vmem_use(TH) > budget:
        TH -= 1
    HT = (H + TH - 1) // TH
    H_pad = HT * TH
    Hh = TH + 2 * p
    B = N * HT                                 # fused batch x H-tile grid axis
    vmem_limit = int(max(budget, vmem_use(TH)))

    # ---- BN folding: scale into the conv weights; epilogue is shift + SiLU --------
    scale = (gamma / jnp.sqrt(running_var + eps)).astype(jnp.float32)
    shift = (beta - running_mean * scale).astype(jnp.float32)
    shift_p = jnp.pad(shift, (0, C2p - C2)).reshape(1, C2p)

    w = weight.astype(jnp.float32) * scale[:, None, None, None]          # (C2,C1,kh,kw)
    w = jnp.transpose(w, (2, 3, 1, 0)).reshape(k * k, C1, C2)            # tap-major
    w = jnp.pad(w, ((0, 0), (0, C1p - C1), (0, C2p - C2))).astype(jnp.bfloat16)
    w_packed = w.reshape(k * k * C1p, C2p)

    # ---- activations: pad (autopad + tile padding + channel padding), halo'd tiles -
    xb = x.astype(jnp.bfloat16)
    xb = jnp.pad(xb, ((0, 0), (p, p + H_pad - H), (p, p + W_k - W), (0, C1p - C1)))
    if HT == 1:
        xt = xb                                                          # no extra copy
    else:
        # TODO(synk): overlapping H windows could be fetched with pl.ANY + manual
        # make_async_copy instead of materializing halos; with the large TH chosen above
        # the extra HBM traffic here is only ~(k-1)/TH.
        xt = jnp.stack([xb[:, i * TH:i * TH + Hh] for i in range(HT)], axis=1)
        xt = xt.reshape(B, Hh, Wp_k, C1p)

    out_shape = jax.ShapeDtypeStruct((B, TH, W_k, C2p), out_dtype)

    cost = pl.CostEstimate(
        flops=int(2 * B * TH * W_k * C1p * C2p * k * k),
        transcendentals=int(B * TH * W_k * C2p),
        bytes_accessed=int(B * Hh * Wp_k * C1p * 2 * (1 if C1T == 1 else C2T)
                           + B * k * k * C1p * C2p * 2
                           + B * TH * W_k * C2p * out_itemsize),
    )

    def run_general():
        kern = functools.partial(_conv_kernel_reduce, k=k, TH=TH, W=W_k)
        return pl.pallas_call(
            kern,
            out_shape=out_shape,
            grid_spec=pltpu.PrefetchScalarGridSpec(
                num_scalar_prefetch=0,
                grid=(B, C2T, C1T),                               # reduction axis last
                in_specs=[
                    pl.BlockSpec((1, Hh, Wp_k, TC1), lambda b, j, c: (b, 0, 0, c)),
                    pl.BlockSpec((k * k, TC1, TC2), lambda b, j, c: (0, c, j)),
                    pl.BlockSpec((1, TC2), lambda b, j, c: (0, j)),
                ],
                out_specs=pl.BlockSpec((1, TH, W_k, TC2), lambda b, j, c: (b, 0, 0, j)),
                scratch_shapes=[pltpu.VMEM((TH * W_k, TC2), jnp.float32)],
            ),
            compiler_params=pltpu.CompilerParams(
                dimension_semantics=("parallel", "parallel", "arbitrary"),
                vmem_limit_bytes=vmem_limit,
            ),
            cost_estimate=cost,
        )(xt, w, shift_p)

    def run_packed():
        kern = functools.partial(_conv_kernel_packed, k=k, TH=TH, W=W_k)
        return pl.pallas_call(
            kern,
            out_shape=out_shape,
            grid_spec=pltpu.PrefetchScalarGridSpec(
                num_scalar_prefetch=0,
                grid=(B, C2T),
                in_specs=[
                    pl.BlockSpec((1, Hh, Wp_k, C1p), lambda b, j: (b, 0, 0, 0)),
                    pl.BlockSpec((k * k * C1p, TC2), lambda b, j: (0, j)),
                    pl.BlockSpec((1, TC2), lambda b, j: (0, j)),
                ],
                out_specs=pl.BlockSpec((1, TH, W_k, TC2), lambda b, j: (b, 0, 0, j)),
            ),
            compiler_params=pltpu.CompilerParams(
                dimension_semantics=("parallel", "parallel"),
                vmem_limit_bytes=vmem_limit,
            ),
            cost_estimate=cost,
        )(xt, w_packed, shift_p)

    if pack_taps:
        try:
            out_tiles = run_packed()
        except Exception:
            # Conservative fallback if lane-dim concatenate fails to lower on this
            # toolchain; numerics are identical, only MXU utilization differs.
            out_tiles = run_general()
    else:
        out_tiles = run_general()

    out = out_tiles.reshape(N, H_pad, W_k, C2p)[:, :H, :W, :C2]
    return out


def conv_bn_silu(x_nchw, weight, gamma, beta, running_mean, running_var,
                 *, k, eps=1e-3, rows_cap=None):
    """NCHW adapter matching the PyTorch module.  For chained layers prefer the NHWC
    entry point above (these transposes are per-layer HBM round trips)."""
    x = jnp.transpose(x_nchw, (0, 2, 3, 1))
    y = conv_bn_silu_nhwc(x, weight, gamma, beta, running_mean, running_var,
                          k=k, eps=eps, rows_cap=rows_cap)
    return jnp.transpose(y, (0, 3, 1, 2))


# --------------------------------------------------------------------------------------
# Reference + self-test
# --------------------------------------------------------------------------------------
def _reference(x_nchw, weight, gamma, beta, running_mean, running_var, *, k, eps=1e-3):
    p = k // 2
    y = jax.lax.conv_general_dilated(
        x_nchw, weight, window_strides=(1, 1), padding=((p, p), (p, p)),
        dimension_numbers=("NCHW", "OIHW", "NCHW"))
    scale = gamma / jnp.sqrt(running_var + eps)
    shift = beta - running_mean * scale
    y = y * scale[None, :, None, None] + shift[None, :, None, None]
    return y * jax.nn.sigmoid(y)


if __name__ == "__main__":
    import math

    key = jax.random.PRNGKey(0)

    configs = [
        # (N, C1, C2, H, W, k, rows_cap)
        (2, 4, 8, 16, 16, 3, None),     # stem-like: small C1 -> packed-taps path
        (1, 128, 16, 8, 8, 3, None),    # C1 >= 128 -> general MXU-dot path
        (1, 768, 8, 10, 8, 3, 32),      # forces C1T=3 reduction + HT=3 halo'd H tiles
    ]
    for idx, (N, C1, C2, H, W, k, cap) in enumerate(configs):
        keys = jax.random.split(jax.random.fold_in(key, idx), 6)
        x = jax.random.normal(keys[0], (N, C1, H, W), jnp.float32)
        wstd = 0.5 / math.sqrt(C1 * k * k)
        weight = jax.random.normal(keys[1], (C2, C1, k, k), jnp.float32) * wstd
        gamma = 1.0 + 0.1 * jax.random.normal(keys[2], (C2,), jnp.float32)
        beta = 0.1 * jax.random.normal(keys[3], (C2,), jnp.float32)
        running_mean = 0.1 * jax.random.normal(keys[4], (C2,), jnp.float32)
        running_var = jax.random.uniform(keys[5], (C2,), jnp.float32,
                                         minval=0.5, maxval=1.5)

        out = conv_bn_silu(x, weight, gamma, beta, running_mean, running_var,
                           k=k, rows_cap=cap)
        out = jax.block_until_ready(out)

        ref = _reference(x, weight, gamma, beta, running_mean, running_var, k=k)
        assert out.shape == (N, C2, H, W), (out.shape, (N, C2, H, W))
        # bf16 MXU inputs with f32 accumulation -> loosened tolerance vs f32 reference.
        assert jnp.allclose(out, ref, atol=2e-2, rtol=2e-2), (
            f"config {idx}: max abs err {float(jnp.max(jnp.abs(out - ref)))}")

    print("KERNEL_OK")
</pallas_src>

<mosaic_0001>
module attributes {stable_mosaic.version = 11 : i64} {
  func.func @_conv_kernel_packed(%arg0: i32, %arg1: i32, %arg2: memref<1x18x18x8xbf16, #tpu.memory_space<vmem>>, %arg3: memref<72x128xbf16, #tpu.memory_space<vmem>>, %arg4: memref<1x128xf32, #tpu.memory_space<vmem>>, %arg5: memref<1x16x16x128xf32, #tpu.memory_space<vmem>>) attributes {dimension_semantics = [#tpu.dimension_semantics<parallel>, #tpu.dimension_semantics<parallel>], iteration_bounds = array<i64: 2, 1>, scalar_prefetch = 0 : i64, scratch_operands = 0 : i64, tpu.core_type = #tpu.core_type<tc>, window_params = [{transform_indices = @transform_0, window_bounds = array<i64: 1, 18, 18, 8>}, {transform_indices = @transform_1, window_bounds = array<i64: 72, 128>}, {transform_indices = @transform_2, window_bounds = array<i64: 1, 128>}, {transform_indices = @transform_3, window_bounds = array<i64: 1, 16, 16, 128>}]} {
    %c0 = arith.constant 0 : index
    %c0_0 = arith.constant 0 : index
    %c0_1 = arith.constant 0 : index
    %c0_2 = arith.constant 0 : index
    %0 = vector.load %arg2[%c0, %c0_0, %c0_1, %c0_2] : memref<1x18x18x8xbf16, #tpu.memory_space<vmem>>, vector<1x18x16x8xbf16>
    %1 = vector.shape_cast %0 : vector<1x18x16x8xbf16> to vector<18x16x8xbf16>
    %2 = vector.shape_cast %1 : vector<18x16x8xbf16> to vector<288x8xbf16>
    %c0_3 = arith.constant 0 : index
    %c0_4 = arith.constant 0 : index
    %c1 = arith.constant 1 : index
    %c0_5 = arith.constant 0 : index
    %3 = vector.load %arg2[%c0_3, %c0_4, %c1, %c0_5] : memref<1x18x18x8xbf16, #tpu.memory_space<vmem>>, vector<1x18x16x8xbf16>
    %4 = vector.shape_cast %3 : vector<1x18x16x8xbf16> to vector<18x16x8xbf16>
    %5 = vector.shape_cast %4 : vector<18x16x8xbf16> to vector<288x8xbf16>
    %c0_6 = arith.constant 0 : index
    %c0_7 = arith.constant 0 : index
    %c2 = arith.constant 2 : index
    %c0_8 = arith.constant 0 : index
    %6 = vector.load %arg2[%c0_6, %c0_7, %c2, %c0_8] : memref<1x18x18x8xbf16, #tpu.memory_space<vmem>>, vector<1x18x16x8xbf16>
    %7 = vector.shape_cast %6 : vector<1x18x16x8xbf16> to vector<18x16x8xbf16>
    %8 = vector.shape_cast %7 : vector<18x16x8xbf16> to vector<288x8xbf16>
    %9 = vector.extract_strided_slice %2 {offsets = [0, 0], sizes = [256, 8], strides = [1, 1]} : vector<288x8xbf16> to vector<256x8xbf16>
    %10 = vector.extract_strided_slice %5 {offsets = [0, 0], sizes = [256, 8], strides = [1, 1]} : vector<288x8xbf16> to vector<256x8xbf16>
    %11 = vector.extract_strided_slice %8 {offsets = [0, 0], sizes = [256, 8], strides = [1, 1]} : vector<288x8xbf16> to vector<256x8xbf16>
    %12 = vector.extract_strided_slice %2 {offsets = [16, 0], sizes = [256, 8], strides = [1, 1]} : vector<288x8xbf16> to vector<256x8xbf16>
    %13 = vector.extract_strided_slice %5 {offsets = [16, 0], sizes = [256, 8], strides = [1, 1]} : vector<288x8xbf16> to vector<256x8xbf16>
    %14 = vector.extract_strided_slice %8 {offsets = [16, 0], sizes = [256, 8], strides = [1, 1]} : vector<288x8xbf16> to vector<256x8xbf16>
    %15 = vector.extract_strided_slice %2 {offsets = [32, 0], sizes = [256, 8], strides = [1, 1]} : vector<288x8xbf16> to vector<256x8xbf16>
    %16 = vector.extract_strided_slice %5 {offsets = [32, 0], sizes = [256, 8], strides = [1, 1]} : vector<288x8xbf16> to vector<256x8xbf16>
    %17 = vector.extract_strided_slice %8 {offsets = [32, 0], sizes = [256, 8], strides = [1, 1]} : vector<288x8xbf16> to vector<256x8xbf16>
    %18 = tpu.concatenate %9, %10, %11, %12, %13, %14, %15, %16, %17 in 1 : vector<256x8xbf16>, vector<256x8xbf16>, vector<256x8xbf16>, vector<256x8xbf16>, vector<256x8xbf16>, vector<256x8xbf16>, vector<256x8xbf16>, vector<256x8xbf16>, vector<256x8xbf16> -> vector<256x72xbf16>
    %c0_9 = arith.constant 0 : index
    %c0_10 = arith.constant 0 : index
    %19 = vector.load %arg3[%c0_9, %c0_10] : memref<72x128xbf16, #tpu.memory_space<vmem>>, vector<72x128xbf16>
    %cst = arith.constant dense<0.000000e+00> : vector<256x128xf32>
    %20 = tpu.matmul %18, %19, %cst {dimension_numbers = #tpu.dot_dimension_numbers<[1], [0], [0], [1], [0, 0, 1, 1], [], []>} : vector<256x72xbf16>, vector<72x128xbf16>, vector<256x128xf32> -> vector<256x128xf32>
    %c0_11 = arith.constant 0 : index
    %c0_12 = arith.constant 0 : index
    %21 = vector.load %arg4[%c0_11, %c0_12] : memref<1x128xf32, #tpu.memory_space<vmem>>, vector<1x128xf32>
    %22 = vector.shape_cast %21 : vector<1x128xf32> to vector<128xf32>
    %23 = vector.shape_cast %22 : vector<128xf32> to vector<1x128xf32>
    %24 = vector.broadcast %23 : vector<1x128xf32> to vector<256x128xf32>
    %25 = arith.addf %20, %24 : vector<256x128xf32>
    %26 = arith.negf %25 : vector<256x128xf32>
    %27 = math.exp %26 : vector<256x128xf32>
    %cst_13 = arith.constant 1.000000e+00 : f32
    %28 = vector.broadcast %cst_13 : f32 to vector<256x128xf32>
    %29 = arith.addf %28, %27 : vector<256x128xf32>
    %30 = arith.divf %28, %29 : vector<256x128xf32>
    %31 = arith.mulf %25, %30 : vector<256x128xf32>
    %32 = vector.shape_cast %31 : vector<256x128xf32> to vector<16x16x128xf32>
    %c0_14 = arith.constant 0 : index
    %c0_15 = arith.constant 0 : index
    %c0_16 = arith.constant 0 : index
    %c0_17 = arith.constant 0 : index
    %33 = vector.load %arg5[%c0_14, %c0_15, %c0_16, %c0_17] : memref<1x16x16x128xf32, #tpu.memory_space<vmem>>, vector<1x16x16x128xf32>
    %34 = vector.shape_cast %33 : vector<1x16x16x128xf32> to vector<16x16x128xf32>
    %35 = vector.shape_cast %32 : vector<16x16x128xf32> to vector<1x16x16x128xf32>
    tpu.vector_store %arg5[%c0_14, %c0_15, %c0_16, %c0_17], %35 {strides = array<i32>} : memref<1x16x16x128xf32, #tpu.memory_space<vmem>>, vector<1x16x16x128xf32>,
    return
  }
  func.func @transform_0(%arg0: i32, %arg1: i32) -> (i32, i32, i32, i32) {
    %c0_i32 = arith.constant 0 : i32
    %c0_i32_0 = arith.constant 0 : i32
    %c0_i32_1 = arith.constant 0 : i32
    %c0_i32_2 = arith.constant 0 : i32
    return %arg0, %c0_i32, %c0_i32_0, %c0_i32_1 : i32, i32, i32, i32
  }
  func.func @transform_1(%arg0: i32, %arg1: i32) -> (i32, i32) {
    %c0_i32 = arith.constant 0 : i32
    %c0_i32_0 = arith.constant 0 : i32
    return %c0_i32, %arg1 : i32, i32
  }
  func.func @transform_2(%arg0: i32, %arg1: i32) -> (i32, i32) {
    %c0_i32 = arith.constant 0 : i32
    %c0_i32_0 = arith.constant 0 : i32
    return %c0_i32, %arg1 : i32, i32
  }
  func.func @transform_3(%arg0: i32, %arg1: i32) -> (i32, i32, i32, i32) {
    %c0_i32 = arith.constant 0 : i32
    %c0_i32_0 = arith.constant 0 : i32
    %c0_i32_1 = arith.constant 0 : i32
    return %arg0, %c0_i32, %c0_i32_0, %arg1 : i32, i32, i32, i32
  }
}

module attributes {stable_mosaic.version = 11 : i64} {
  func.func @_conv_kernel_reduce(%arg0: i32, %arg1: i32, %arg2: i32, %arg3: memref<1x18x18x8xbf16, #tpu.memory_space<vmem>>, %arg4: memref<9x8x128xbf16, #tpu.memory_space<vmem>>, %arg5: memref<1x128xf32, #tpu.memory_space<vmem>>, %arg6: memref<1x16x16x128xf32, #tpu.memory_space<vmem>>, %arg7: memref<256x128xf32, #tpu.memory_space<vmem>>) attributes {dimension_semantics = [#tpu.dimension_semantics<parallel>, #tpu.dimension_semantics<parallel>, #tpu.dimension_semantics<arbitrary>], iteration_bounds = array<i64: 2, 1, 1>, scalar_prefetch = 0 : i64, scratch_operands = 1 : i64, tpu.core_type = #tpu.core_type<tc>, window_params = [{transform_indices = @transform_0, window_bounds = array<i64: 1, 18, 18, 8>}, {transform_indices = @transform_1, window_bounds = array<i64: 9, 8, 128>}, {transform_indices = @transform_2, window_bounds = array<i64: 1, 128>}, {transform_indices = @transform_3, window_bounds = array<i64: 1, 16, 16, 128>}]} {
    %c0_i32 = arith.constant 0 : i32
    %0 = arith.cmpi eq, %arg2, %c0_i32 : i32
    %1 = arith.extui %0 : i1 to i32
    %c0_i32_0 = arith.constant 0 : i32
    %2 = arith.cmpi ne, %1, %c0_i32_0 : i32
    scf.if %2 {
      %cst_45 = arith.constant 0.000000e+00 : f32
      %62 = vector.broadcast %cst_45 : f32 to vector<256x128xf32>
      %c0_46 = arith.constant 0 : index
      %c0_47 = arith.constant 0 : index
      %63 = vector.load %arg7[%c0_46, %c0_47] : memref<256x128xf32, #tpu.memory_space<vmem>>, vector<256x128xf32>
      tpu.vector_store %arg7[%c0_46, %c0_47], %62 {strides = array<i32>} : memref<256x128xf32, #tpu.memory_space<vmem>>, vector<256x128xf32>,
    } else {
    }
    %c0 = arith.constant 0 : index
    %c0_1 = arith.constant 0 : index
    %c0_2 = arith.constant 0 : index
    %c0_3 = arith.constant 0 : index
    %3 = vector.load %arg3[%c0, %c0_1, %c0_2, %c0_3] : memref<1x18x18x8xbf16, #tpu.memory_space<vmem>>, vector<1x18x16x8xbf16>
    %4 = vector.shape_cast %3 : vector<1x18x16x8xbf16> to vector<18x16x8xbf16>
    %5 = vector.shape_cast %4 : vector<18x16x8xbf16> to vector<288x8xbf16>
    %c0_4 = arith.constant 0 : index
    %c0_5 = arith.constant 0 : index
    %c1 = arith.constant 1 : index
    %c0_6 = arith.constant 0 : index
    %6 = vector.load %arg3[%c0_4, %c0_5, %c1, %c0_6] : memref<1x18x18x8xbf16, #tpu.memory_space<vmem>>, vector<1x18x16x8xbf16>
    %7 = vector.shape_cast %6 : vector<1x18x16x8xbf16> to vector<18x16x8xbf16>
    %8 = vector.shape_cast %7 : vector<18x16x8xbf16> to vector<288x8xbf16>
    %c0_7 = arith.constant 0 : index
    %c0_8 = arith.constant 0 : index
    %c2 = arith.constant 2 : index
    %c0_9 = arith.constant 0 : index
    %9 = vector.load %arg3[%c0_7, %c0_8, %c2, %c0_9] : memref<1x18x18x8xbf16, #tpu.memory_space<vmem>>, vector<1x18x16x8xbf16>
    %10 = vector.shape_cast %9 : vector<1x18x16x8xbf16> to vector<18x16x8xbf16>
    %11 = vector.shape_cast %10 : vector<18x16x8xbf16> to vector<288x8xbf16>
    %c0_10 = arith.constant 0 : index
    %c0_11 = arith.constant 0 : index
    %12 = vector.load %arg7[%c0_10, %c0_11] : memref<256x128xf32, #tpu.memory_space<vmem>>, vector<256x128xf32>
    %13 = vector.extract_strided_slice %5 {offsets = [0, 0], sizes = [256, 8], strides = [1, 1]} : vector<288x8xbf16> to vector<256x8xbf16>
    %c0_12 = arith.constant 0 : index
    %c0_13 = arith.constant 0 : index
    %c0_14 = arith.constant 0 : index
    %14 = vector.load %arg4[%c0_12, %c0_13, %c0_14] : memref<9x8x128xbf16, #tpu.memory_space<vmem>>, vector<1x8x128xbf16>
    %15 = vector.shape_cast %14 : vector<1x8x128xbf16> to vector<8x128xbf16>
    %cst = arith.constant dense<0.000000e+00> : vector<256x128xf32>
    %16 = tpu.matmul %13, %15, %cst {dimension_numbers = #tpu.dot_dimension_numbers<[1], [0], [0], [1], [0, 0, 1, 1], [], []>} : vector<256x8xbf16>, vector<8x128xbf16>, vector<256x128xf32> -> vector<256x128xf32>
    %17 = arith.addf %12, %16 : vector<256x128xf32>
    %18 = vector.extract_strided_slice %8 {offsets = [0, 0], sizes = [256, 8], strides = [1, 1]} : vector<288x8xbf16> to vector<256x8xbf16>
    %c1_15 = arith.constant 1 : index
    %c0_16 = arith.constant 0 : index
    %c0_17 = arith.constant 0 : index
    %19 = vector.load %arg4[%c1_15, %c0_16, %c0_17] : memref<9x8x128xbf16, #tpu.memory_space<vmem>>, vector<1x8x128xbf16>
    %20 = vector.shape_cast %19 : vector<1x8x128xbf16> to vector<8x128xbf16>
    %cst_18 = arith.constant dense<0.000000e+00> : vector<256x128xf32>
    %21 = tpu.matmul %18, %20, %cst_18 {dimension_numbers = #tpu.dot_dimension_numbers<[1], [0], [0], [1], [0, 0, 1, 1], [], []>} : vector<256x8xbf16>, vector<8x128xbf16>, vector<256x128xf32> -> vector<256x128xf32>
    %22 = arith.addf %17, %21 : vector<256x128xf32>
    %23 = vector.extract_strided_slice %11 {offsets = [0, 0], sizes = [256, 8], strides = [1, 1]} : vector<288x8xbf16> to vector<256x8xbf16>
    %c2_19 = arith.constant 2 : index
    %c0_20 = arith.constant 0 : index
    %c0_21 = arith.constant 0 : index
    %24 = vector.load %arg4[%c2_19, %c0_20, %c0_21] : memref<9x8x128xbf16, #tpu.memory_space<vmem>>, vector<1x8x128xbf16>
    %25 = vector.shape_cast %24 : vector<1x8x128xbf16> to vector<8x128xbf16>
    %cst_22 = arith.constant dense<0.000000e+00> : vector<256x128xf32>
    %26 = tpu.matmul %23, %25, %cst_22 {dimension_numbers = #tpu.dot_dimension_numbers<[1], [0], [0], [1], [0, 0, 1, 1], [], []>} : vector<256x8xbf16>, vector<8x128xbf16>, vector<256x128xf32> -> vector<256x128xf32>
    %27 = arith.addf %22, %26 : vector<256x128xf32>
    %28 = vector.extract_strided_slice %5 {offsets = [16, 0], sizes = [256, 8], strides = [1, 1]} : vector<288x8xbf16> to vector<256x8xbf16>
    %c3 = arith.constant 3 : index
    %c0_23 = arith.constant 0 : index
    %c0_24 = arith.constant 0 : index
    %29 = vector.load %arg4[%c3, %c0_23, %c0_24] : memref<9x8x128xbf16, #tpu.memory_space<vmem>>, vector<1x8x128xbf16>
    %30 = vector.shape_cast %29 : vector<1x8x128xbf16> to vector<8x128xbf16>
    %cst_25 = arith.constant dense<0.000000e+00> : vector<256x128xf32>
    %31 = tpu.matmul %28, %30, %cst_25 {dimension_numbers = #tpu.dot_dimension_numbers<[1], [0], [0], [1], [0, 0, 1, 1], [], []>} : vector<256x8xbf16>, vector<8x128xbf16>, vector<256x128xf32> -> vector<256x128xf32>
    %32 = arith.addf %27, %31 : vector<256x128xf32>
    %33 = vector.extract_strided_slice %8 {offsets = [16, 0], sizes = [256, 8], strides = [1, 1]} : vector<288x8xbf16> to vector<256x8xbf16>
    %c4 = arith.constant 4 : index
    %c0_26 = arith.constant 0 : index
    %c0_27 = arith.constant 0 : index
    %34 = vector.load %arg4[%c4, %c0_26, %c0_27] : memref<9x8x128xbf16, #tpu.memory_space<vmem>>, vector<1x8x128xbf16>
    %35 = vector.shape_cast %34 : vector<1x8x128xbf16> to vector<8x128xbf16>
    %cst_28 = arith.constant dense<0.000000e+00> : vector<256x128xf32>
    %36 = tpu.matmul %33, %35, %cst_28 {dimension_numbers = #tpu.dot_dimension_numbers<[1], [0], [0], [1], [0, 0, 1, 1], [], []>} : vector<256x8xbf16>, vector<8x128xbf16>, vector<256x128xf32> -> vector<256x128xf32>
    %37 = arith.addf %32, %36 : vector<256x128xf32>
    %38 = vector.extract_strided_slice %11 {offsets = [16, 0], sizes = [256, 8], strides = [1, 1]} : vector<288x8xbf16> to vector<256x8xbf16>
    %c5 = arith.constant 5 : index
    %c0_29 = arith.constant 0 : index
    %c0_30 = arith.constant 0 : index
    %39 = vector.load %arg4[%c5, %c0_29, %c0_30] : memref<9x8x128xbf16, #tpu.memory_space<vmem>>, vector<1x8x128xbf16>
    %40 = vector.shape_cast %39 : vector<1x8x128xbf16> to vector<8x128xbf16>
    %cst_31 = arith.constant dense<0.000000e+00> : vector<256x128xf32>
    %41 = tpu.matmul %38, %40, %cst_31 {dimension_numbers = #tpu.dot_dimension_numbers<[1], [0], [0], [1], [0, 0, 1, 1], [], []>} : vector<256x8xbf16>, vector<8x128xbf16>, vector<256x128xf32> -> vector<256x128xf32>
    %42 = arith.addf %37, %41 : vector<256x128xf32>
    %43 = vector.extract_strided_slice %5 {offsets = [32, 0], sizes = [256, 8], strides = [1, 1]} : vector<288x8xbf16> to vector<256x8xbf16>
    %c6 = arith.constant 6 : index
    %c0_32 = arith.constant 0 : index
    %c0_33 = arith.constant 0 : index
    %44 = vector.load %arg4[%c6, %c0_32, %c0_33] : memref<9x8x128xbf16, #tpu.memory_space<vmem>>, vector<1x8x128xbf16>
    %45 = vector.shape_cast %44 : vector<1x8x128xbf16> to vector<8x128xbf16>
    %cst_34 = arith.constant dense<0.000000e+00> : vector<256x128xf32>
    %46 = tpu.matmul %43, %45, %cst_34 {dimension_numbers = #tpu.dot_dimension_numbers<[1], [0], [0], [1], [0, 0, 1, 1], [], []>} : vector<256x8xbf16>, vector<8x128xbf16>, vector<256x128xf32> -> vector<256x128xf32>
    %47 = arith.addf %42, %46 : vector<256x128xf32>
    %48 = vector.extract_strided_slice %8 {offsets = [32, 0], sizes = [256, 8], strides = [1, 1]} : vector<288x8xbf16> to vector<256x8xbf16>
    %c7 = arith.constant 7 : index
    %c0_35 = arith.constant 0 : index
    %c0_36 = arith.constant 0 : index
    %49 = vector.load %arg4[%c7, %c0_35, %c0_36] : memref<9x8x128xbf16, #tpu.memory_space<vmem>>, vector<1x8x128xbf16>
    %50 = vector.shape_cast %49 : vector<1x8x128xbf16> to vector<8x128xbf16>
    %cst_37 = arith.constant dense<0.000000e+00> : vector<256x128xf32>
    %51 = tpu.matmul %48, %50, %cst_37 {dimension_numbers = #tpu.dot_dimension_numbers<[1], [0], [0], [1], [0, 0, 1, 1], [], []>} : vector<256x8xbf16>, vector<8x128xbf16>, vector<256x128xf32> -> vector<256x128xf32>
    %52 = arith.addf %47, %51 : vector<256x128xf32>
    %53 = vector.extract_strided_slice %11 {offsets = [32, 0], sizes = [256, 8], strides = [1, 1]} : vector<288x8xbf16> to vector<256x8xbf16>
    %c8 = arith.constant 8 : index
    %c0_38 = arith.constant 0 : index
    %c0_39 = arith.constant 0 : index
    %54 = vector.load %arg4[%c8, %c0_38, %c0_39] : memref<9x8x128xbf16, #tpu.memory_space<vmem>>, vector<1x8x128xbf16>
    %55 = vector.shape_cast %54 : vector<1x8x128xbf16> to vector<8x128xbf16>
    %cst_40 = arith.constant dense<0.000000e+00> : vector<256x128xf32>
    %56 = tpu.matmul %53, %55, %cst_40 {dimension_numbers = #tpu.dot_dimension_numbers<[1], [0], [0], [1], [0, 0, 1, 1], [], []>} : vector<256x8xbf16>, vector<8x128xbf16>, vector<256x128xf32> -> vector<256x128xf32>
    %57 = arith.addf %52, %56 : vector<256x128xf32>
    %c0_41 = arith.constant 0 : index
    %c0_42 = arith.constant 0 : index
    %58 = vector.load %arg7[%c0_41, %c0_42] : memref<256x128xf32, #tpu.memory_space<vmem>>, vector<256x128xf32>
    tpu.vector_store %arg7[%c0_41, %c0_42], %57 {strides = array<i32>} : memref<256x128xf32, #tpu.memory_space<vmem>>, vector<256x128xf32>,
    %c0_i32_43 = arith.constant 0 : i32
    %59 = arith.cmpi eq, %arg2, %c0_i32_43 : i32
    %60 = arith.extui %59 : i1 to i32
    %c0_i32_44 = arith.constant 0 : i32
    %61 = arith.cmpi ne, %60, %c0_i32_44 : i32
    scf.if %61 {
      %c0_45 = arith.constant 0 : index
      %c0_46 = arith.constant 0 : index
      %62 = vector.load %arg7[%c0_45, %c0_46] : memref<256x128xf32, #tpu.memory_space<vmem>>, vector<256x128xf32>
      %c0_47 = arith.constant 0 : index
      %c0_48 = arith.constant 0 : index
      %63 = vector.load %arg5[%c0_47, %c0_48] : memref<1x128xf32, #tpu.memory_space<vmem>>, vector<1x128xf32>
      %64 = vector.shape_cast %63 : vector<1x128xf32> to vector<128xf32>
      %65 = vector.shape_cast %64 : vector<128xf32> to vector<1x128xf32>
      %66 = vector.broadcast %65 : vector<1x128xf32> to vector<256x128xf32>
      %67 = arith.addf %62, %66 : vector<256x128xf32>
      %68 = arith.negf %67 : vector<256x128xf32>
      %69 = math.exp %68 : vector<256x128xf32>
      %cst_49 = arith.constant 1.000000e+00 : f32
      %70 = vector.broadcast %cst_49 : f32 to vector<256x128xf32>
      %71 = arith.addf %70, %69 : vector<256x128xf32>
      %72 = arith.divf %70, %71 : vector<256x128xf32>
      %73 = arith.mulf %67, %72 : vector<256x128xf32>
      %74 = vector.shape_cast %73 : vector<256x128xf32> to vector<16x16x128xf32>
      %c0_50 = arith.constant 0 : index
      %c0_51 = arith.constant 0 : index
      %c0_52 = arith.constant 0 : index
      %c0_53 = arith.constant 0 : index
      %75 = vector.load %arg6[%c0_50, %c0_51, %c0_52, %c0_53] : memref<1x16x16x128xf32, #tpu.memory_space<vmem>>, vector<1x16x16x128xf32>
      %76 = vector.shape_cast %75 : vector<1x16x16x128xf32> to vector<16x16x128xf32>
      %77 = vector.shape_cast %74 : vector<16x16x128xf32> to vector<1x16x16x128xf32>
      tpu.vector_store %arg6[%c0_50, %c0_51, %c0_52, %c0_53], %77 {strides = array<i32>} : memref<1x16x16x128xf32, #tpu.memory_space<vmem>>, vector<1x16x16x128xf32>,
    } else {
    }
    return
  }
  func.func @transform_0(%arg0: i32, %arg1: i32, %arg2: i32) -> (i32, i32, i32, i32) {
    %c0_i32 = arith.constant 0 : i32
    %c0_i32_0 = arith.constant 0 : i32
    %c0_i32_1 = arith.constant 0 : i32
    return %arg0, %c0_i32, %c0_i32_0, %arg2 : i32, i32, i32, i32
  }
  func.func @transform_1(%arg0: i32, %arg1: i32, %arg2: i32) -> (i32, i32, i32) {
    %c0_i32 = arith.constant 0 : i32
    %c0_i32_0 = arith.constant 0 : i32
    return %c0_i32, %arg2, %arg1 : i32, i32, i32
  }
  func.func @transform_2(%arg0: i32, %arg1: i32, %arg2: i32) -> (i32, i32) {
    %c0_i32 = arith.constant 0 : i32
    %c0_i32_0 = arith.constant 0 : i32
    return %c0_i32, %arg1 : i32, i32
  }
  func.func @transform_3(%arg0: i32, %arg1: i32, %arg2: i32) -> (i32, i32, i32, i32) {
    %c0_i32 = arith.constant 0 : i32
    %c0_i32_0 = arith.constant 0 : i32
    %c0_i32_1 = arith.constant 0 : i32
    return %arg0, %c0_i32, %c0_i32_0, %arg1 : i32, i32, i32, i32
  }
}

</mosaic_0001>

<bundles_post_ra>
// kernel: tpu_custom_call.1
= control target key start
LH: loop header
LB: loop body
LE: loop exit
PB: predicated region body
PF: predicated region fallthrough
CT: control target
= control target key end

     0   :  { %8 = vsyncpa [#allocation3], 0  ;;  %s4563_s0 = inlined_call_operand.vmem [shape: bf16[2,18,18,8], index: 0, kind: input, shape index: {}]   ;;  %s4564_s1 = inlined_call_operand.vmem [shape: bf16[72,128], index: 1, kind: input, shape index: {}]   ;;  %s4565_s2 = inlined_call_operand.vmem [shape: f32[1,128], index: 2, kind: input, shape index: {}]   ;;  %s4566_s3 = inlined_call_operand.hbm [shape: f32[2,16,16,128], index: 3, kind: output, shape index: {}]  }
   0x1   :  { %10 = vsyncpa [#allocation3 + $0x1], 0  ;;  %s3085_s12 = smov 0   ;;  %s3087_s13 = smov 0  }
   0x2   :  { %s3089_s14 = smov 0   ;;  %s3091_s15 = smov 0  }
   0x3   :  { %s3093_s16 = smov 0   ;;  %s3095_s17 = smov 0  }
   0x4 LB: > { %s2575_s18 = sadd.s32 4294967295, %s3054_s17   ;;  %s2576_s19 = sadd.s32 4294967294, %s3054_s17   ;;  %s3054_s17 = sphi %s3095_s17, %s16_s17   ;;  %s3050_s16 = sphi %s3093_s16, %s4603_s16   ;;  %s3046_s15 = sphi %s3091_s15, %s4602_s15   ;;  %s3042_s14 = sphi %s3089_s14, %s4601_s14   ;;  %s3038_s13 = sphi %s3087_s13, %s4600_s13   ;;  %s3034_s12 = sphi %s3085_s12, %s4599_s12  }
   0x5   : > { %s28_s20 = sadd.s32 1, %s3050_s16  ;;  %s115_s21 = sadd.s32 1, %s3042_s14 }
   0x6   : > { %p30_p0 = scmp.ge.s32.totalorder %s28_s20, 2  ;;  %p125_p1 = scmp.ne.s32.totalorder %s3042_s14, %s3038_s13 }
   0x7   : > { %p126_p2 = scmp.eq.s32.totalorder %s2575_s18, 1  ;;  %p131_p3 = scmp.ne.s32.totalorder %s3038_s13, %s3034_s12 }
   0x8   : > { %s4605_s20 = smov (%p30_p0, %s28_s20), 0  ;;  %p132_p5 = scmp.eq.s32.totalorder %s2576_s19, 1 }
   0x9   : > { %p3125_p4 = por %p126_p2, %p125_p1  ;;  %s110_s23 = ssub.s32 %s3050_s16, %s4605_s20 }
   0xa   : > { %p2581_p6 = scmp.ge.s32.totalorder %s3054_s17, 1  ;;  %p113_p7 = scmp.eq.s32.totalorder %s110_s23, 0 }
   0xb   : > { %p3132_p8 = por %p132_p5, %p131_p3  ;;  %p171_p9 = scmp.lt.s32.totalorder %s3054_s17, 3 }
   0xc   : > { %s3138_s25 = scalar_select %p113_p7, %s3042_s14, %s115_s21  }
   0xd   : > { %p172_p10 = pnand %p2581_p6, %p171_p9 }
   0xf   : > { %175 = sbr.rel (%p172_p10) target bundleno = 699 (0x2bb), region = 32 }
  0x14   : > { %p202_p11 = scmp.lt.s32.totalorder %s3046_s15, 1  ;;  %vm269_vm0 = vsmask.f32 3328  ;;  %vm270_vm1 = vsmask.f32 7440  ;;  %s3056_s4 = smov 8  }
  0x15   : > { %vm3173_vm2 = vmor %vm269_vm0, %vm270_vm1  ;;  %vm776_vm3 = vcmask 1042432   ;;  %vm777_vm4 = vcmask 1046532   ;;  %s3057_s5 = smov 16   ;;  %s3058_s6 = smov 24   ;;  %vm1341_vm6 = vcmask 64512   ;;  %vm1390_vm7 = vcmask 130048  }
  0x16   : > { %s203_s26 = scalar_select %p202_p11, %s3046_s15, 1  ;;  %vm3411_vm5 = vmor %vm776_vm3, %vm777_vm4  ;;  %vm1423_vm8 = vcmask 195584   ;;  %vm1694_vm9 = vcmask 1043456   ;;  %vm1456_vm10 = vcmask 261120   ;;  %vm1489_vm11 = vcmask 326656  }
  0x17   : > { %s3059_s7 = smov 40   ;;  %s3060_s8 = smov 32   ;;  %vm1522_vm12 = vcmask 392192   ;;  %vm1555_vm13 = vcmask 457728   ;;  %vm1588_vm14 = vcmask 523264   ;;  %vm1661_vm15 = vcmask 588800  }
  0x18   : > { %s2781_s27 = smul.u32 216, %s203_s26  ;;  %s3061_s9 = smov 48  }
  0x19   : > { %s3062_s10 = smov 64   ;;  %s3063_s11 = smov 56  }
  0x1a   : > { %s3145_s30 = scalar_lea.vmem %s4563_s0, %s2781_s27  ;;  %s2765_s19 = sshll.u32 %s3046_s15, 8 }
  0x1b   : > { %v223_v0 = vld [vmem:[%s3145_s30 + $0x30] sm:$0xf]  ;;  %v3149_v1 = vld [vmem:[%s3145_s30 + $0x34] sm:$0xf]  ;;  %v3152_v2 = vld [vmem:[%s3145_s30 + $0x38] sm:$0x1]  ;;  %s2472_s15 = scalar_lea.hbm %s4566_s3, %s2765_s19 }
  0x1c   : > { %v369_v3 = vshrl.u32 %v223_v0, 16  ;;  %v372_v4 = vshll.u32 %v223_v0, 16  ;;  %v378_v5 = vshll.u32 %v3149_v1, 16  ;;  %v382_v6 = vshrl.u32 %v3149_v1, 16  ;;  %v219_v7 = vld [vmem:[%s3145_s30 + $0x18] sm:$0xf] }
  0x1d   : > { %v388_v8 = vshll.u32 %v3152_v2, 16  ;;  %v3159_v9 = vld [vmem:[%s3145_s30 + $0x1c] sm:$0xf]  ;;  %v3162_v10 = vld [vmem:[%s3145_s30 + $0x20] sm:$0x1]  ;;  %v321_v11 = vshrl.u32 %v219_v7, 16 }
  0x1e   : > { %v371_v12 = vrot.slane %v369_v3, 4  ;;  %v374_v13 = vrot.slane %v372_v4, 5  ;;  %v380_v14 = vrot.slane %v378_v5, 5  ;;  %v384_v15 = vrot.slane %v382_v6, 4  ;;  %v215_v16 = vld [vmem:[%s3145_s30] sm:$0xf] }
  0x1f   : > { %v390_v17 = vrot.slane %v388_v8, 5  ;;  %v323_v18 = vrot.slane %v321_v11, 4  ;;  %v324_v19 = vshll.u32 %v219_v7, 16  ;;  %v330_v20 = vshll.u32 %v3159_v9, 16  ;;  %v3169_v25 = vld [vmem:[%s3145_s30 + $0x4] sm:$0xf] }
  0x20   : > { %v375_v21 = vor.u32 %v374_v13, %v371_v12  ;;  %v385_v22 = vor.u32 %v384_v15, %v380_v14  ;;  %v334_v23 = vshrl.u32 %v3159_v9, 16  ;;  %v340_v24 = vshll.u32 %v3162_v10, 16  ;;  %v3178_v36 = vld [vmem:[%s3145_s30 + $0x8] sm:$0x1]  ;;  %v225_v44 = vld [vmem:[%s3145_s30 + $0x3c] sm:$0xf] }
  0x21   : > { %v326_v27 = vrot.slane %v324_v19, 5  ;;  %v332_v28 = vrot.slane %v330_v20, 5  ;;  %v273_v29 = vshrl.u32 %v215_v16, 16  ;;  %v276_v30 = vshll.u32 %v215_v16, 16  ;;  %v3193_v56 = vld [vmem:[%s3145_s30 + $0x40] sm:$0xf] }
  0x22   : > { %v376_v31 = vrot.slane %v375_v21, 4  ;;  %v386_v32 = vrot.slane %v385_v22, 4  ;;  %v336_v33 = vrot.slane %v334_v23, 4  ;;  %v342_v34 = vrot.slane %v340_v24, 5  ;;  %v3198_v62 = vld [vmem:[%s3145_s30 + $0x44] sm:$0x1] }
  0x23   : > { %v327_v35 = vor.u32 %v326_v27, %v323_v18  ;;  %v275_v37 = vrot.slane %v273_v29, 4  ;;  %v278_v38 = vrot.slane %v276_v30, 5  ;;  %v282_v39 = vshll.u32 %v3169_v25, 16  ;;  %v221_v63 = vld [vmem:[%s3145_s30 + $0x24] sm:$0xf]  ;;  %s2475_s27 = sshll.u32 %s2472_s15, 4  ;;  %s2476_s27 = int_to_ptr.hbm [resolvable:$true] %s2475_s27 }
  0x24   : > { %v381_v40 = vsel %vm3173_vm2, %v376_v31, %v380_v14  ;;  %v391_v41 = vsel %vm3173_vm2, %v386_v32, %v390_v17  ;;  %v337_v42 = vor.u32 %v336_v33, %v332_v28  ;;  %v286_v43 = vshrl.u32 %v3169_v25, 16  ;;  %v3208_v12 = vld [vmem:[%s3145_s30 + $0x28] sm:$0xf]  ;;  %v3214_v16 = vld [vmem:[%s3145_s30 + $0x2c] sm:$0x1]  ;;  %s2990_s29 = sshra.s32 %s2476_s27, 4  ;;  %s2991_s29 = int_to_ptr.hbm [resolvable:$true] %s2990_s29 }
  0x25   : > { %v977_v45 = vunpack.c.l.b16 %v381_v40  ;;  %v978_v46 = vunpack.c.l.b16 %v391_v41  ;;  %v328_v47 = vrot.slane %v327_v35, 4  ;;  %v279_v48 = vor.u32 %v278_v38, %v275_v37  ;;  %v217_v22 = vld [vmem:[%s3145_s30 + $0xc] sm:$0xf]  ;;  %v3225_v37 = vld [vmem:[%s3145_s30 + $0x10] sm:$0xf]  ;;  %p2997_p1 = scmp.lt.s32.totalorder %s2991_s29, %s4566_s3 }
  0x26   : > { %v338_v49 = vrot.slane %v337_v42, 4  ;;  %v284_v50 = vrot.slane %v282_v39, 5  ;;  %v288_v51 = vrot.slane %v286_v43, 4  ;;  %v292_v52 = vshll.u32 %v3178_v36, 16  ;;  %v3228_v43 = vld [vmem:[%s3145_s30 + $0x14] sm:$0x1] }
  0x27   : > { %v3188_v53 = vpack.c.b16 %v978_v46, %v977_v45  ;;  %v333_v54 = vsel %vm3173_vm2, %v328_v47, %v332_v28  ;;  %v280_v55 = vrot.slane %v279_v48, 4  ;;  %v393_v57 = vshrl.u32 %v225_v44, 16  ;;  %v231_v48 = vld [vmem:[%s3145_s30 + $0x60] sm:$0xf] }
  0x28   : > { %v343_v58 = vsel %vm3173_vm2, %v338_v49, %v342_v34  ;;  %v973_v59 = vunpack.c.l.b16 %v333_v54  ;;  %v289_v60 = vor.u32 %v288_v51, %v284_v50  ;;  %v294_v61 = vrot.slane %v292_v52, 5 }
  0x29   : > { %4575 = vst [vmem:[#allocation5_spill] sm:$0xff] %v3188_v53  ;;  %1025 = vrot.lane.b32.xlu2 %v3188_v53, %s3056_s4  ;;  %v974_v0 = vunpack.c.l.b16 %v343_v58  ;;  %v285_v3 = vsel %vm3173_vm2, %v280_v55, %v284_v50  ;;  %v395_v4 = vrot.slane %v393_v57, 4  ;;  %v396_v5 = vshll.u32 %v225_v44, 16 }
  0x2a   : > { %v290_v6 = vrot.slane %v289_v60, 4  ;;  %v969_v7 = vunpack.c.l.b16 %v285_v3  ;;  %v402_v8 = vshll.u32 %v3193_v56, 16  ;;  %v406_v11 = vshrl.u32 %v3193_v56, 16 }
  0x2b   : > { %v3210_v13 = vpack.c.b16 %v974_v0, %v973_v59  ;;  %v398_v14 = vrot.slane %v396_v5, 5  ;;  %v412_v15 = vshll.u32 %v3198_v62, 16  ;;  %v345_v17 = vshrl.u32 %v221_v63, 16 }
  0x2c   : > { %v295_v18 = vsel %vm3173_vm2, %v290_v6, %v294_v61  ;;  %v404_v19 = vrot.slane %v402_v8, 5  ;;  %v408_v20 = vrot.slane %v406_v11, 4  ;;  %v348_v21 = vshll.u32 %v221_v63, 16  ;;  %v3242_v63 = vld [vmem:[%s3145_s30 + $0x64] sm:$0xf] }
  0x2d   : > { %1021 = vrot.lane.b32.xlu1 %v3210_v13, %s3056_s4  ;;  %v970_v23 = vunpack.c.l.b16 %v295_v18  ;;  %v399_v24 = vor.u32 %v398_v14, %v395_v4  ;;  %v414_v27 = vrot.slane %v412_v15, 5  ;;  %v347_v28 = vrot.slane %v345_v17, 4  ;;  %v229_v8 = vld [vmem:[%s3145_s30 + $0x54] sm:$0xf] }
  0x2e   : > { %v409_v29 = vor.u32 %v408_v20, %v404_v19  ;;  %v350_v30 = vrot.slane %v348_v21, 5  ;;  %v354_v31 = vshll.u32 %v3208_v12, 16  ;;  %v358_v32 = vshrl.u32 %v3208_v12, 16 }
  0x2f   : > { %v1001_v33 = vpack.c.b16 %v970_v23, %v969_v7  ;;  %v400_v34 = vrot.slane %v399_v24, 4  ;;  %v364_v35 = vshll.u32 %v3214_v16, 16  ;;  %v297_v38 = vshrl.u32 %v217_v22, 16  ;;  %v3247_v7 = vld [vmem:[%s3145_s30 + $0x68] sm:$0x1] }
  0x30   : > { %v410_v39 = vrot.slane %v409_v29, 4  ;;  %v351_v40 = vor.u32 %v350_v30, %v347_v28  ;;  %v356_v41 = vrot.slane %v354_v31, 5  ;;  %v360_v42 = vrot.slane %v358_v32, 4 }
  0x31   : > { %1017 = vrot.lane.b32.xlu0 %v1001_v33, %s3056_s4  ;;  %v405_v44 = vsel %vm3173_vm2, %v400_v34, %v404_v19  ;;  %v366_v45 = vrot.slane %v364_v35, 5  ;;  %v299_v46 = vrot.slane %v297_v38, 4  ;;  %v300_v47 = vshll.u32 %v217_v22, 16  ;;  %v3265_v33 = vld [vmem:[%s3145_s30 + $0x5c] sm:$0x1] }
  0x32   : > { %v415_v49 = vsel %vm3173_vm2, %v410_v39, %v414_v27  ;;  %v979_v50 = vunpack.c.l.b16 %v405_v44  ;;  %v352_v51 = vrot.slane %v351_v40, 4  ;;  %v361_v52 = vor.u32 %v360_v42, %v356_v41  ;;  %v3258_v27 = vld [vmem:[%s3145_s30 + $0x58] sm:$0xf] }
  0x33   : > { %v980_v54 = vunpack.c.l.b16 %v415_v49  ;;  %v302_v55 = vrot.slane %v300_v47, 5  ;;  %v306_v57 = vshll.u32 %v3225_v37, 16  ;;  %v310_v58 = vshrl.u32 %v3225_v37, 16 }
  0x34   : > { %v357_v59 = vsel %vm3173_vm2, %v352_v51, %v356_v41  ;;  %v362_v60 = vrot.slane %v361_v52, 4  ;;  %v316_v61 = vshll.u32 %v3228_v43, 16  ;;  %v465_v0 = vshrl.u32 %v231_v48, 16 }
  0x35   : > { %v3244_v3 = vpack.c.b16 %v980_v54, %v979_v50  ;;  %v975_v4 = vunpack.c.l.b16 %v357_v59  ;;  %v303_v5 = vor.u32 %v302_v55, %v299_v46  ;;  %v308_v6 = vrot.slane %v306_v57, 5  ;;  %v3276_v59 = vld [vmem:[%s3145_s30 + $0x4c] sm:$0xf] }
  0x36   : > { %v367_v11 = vsel %vm3173_vm2, %v362_v60, %v366_v45  ;;  %v312_v14 = vrot.slane %v310_v58, 4  ;;  %v318_v15 = vrot.slane %v316_v61, 5  ;;  %v467_v17 = vrot.slane %v465_v0, 4  ;;  %v227_v45 = vld [vmem:[%s3145_s30 + $0x48] sm:$0xf] }
  0x37   : > { %1027 = vrot.lane.b32.xlu2 %v3244_v3, %s3056_s4  ;;  %v976_v18 = vunpack.c.l.b16 %v367_v11  ;;  %v304_v19 = vrot.slane %v303_v5, 4  ;;  %v468_v20 = vshll.u32 %v231_v48, 16  ;;  %v474_v21 = vshll.u32 %v3242_v63, 16  ;;  %v3283_v5 = vld [vmem:[%s3145_s30 + $0x50] sm:$0x1] }
  0x38   : > { %v313_v22 = vor.u32 %v312_v14, %v308_v6  ;;  %v478_v23 = vshrl.u32 %v3242_v63, 16  ;;  %v484_v24 = vshll.u32 %v3247_v7, 16  ;;  %v441_v28 = vshrl.u32 %v229_v8, 16 }
  0x39   : > { %v3260_v29 = vpack.c.b16 %v976_v18, %v975_v4  ;;  %v309_v30 = vsel %vm3173_vm2, %v304_v19, %v308_v6  ;;  %v470_v31 = vrot.slane %v468_v20, 5  ;;  %v476_v32 = vrot.slane %v474_v21, 5 }
  0x3a   : > { %v314_v34 = vrot.slane %v313_v22, 4  ;;  %v971_v35 = vunpack.c.l.b16 %v309_v30  ;;  %v480_v38 = vrot.slane %v478_v23, 4  ;;  %v486_v39 = vrot.slane %v484_v24, 5 }
  0x3b   : > { %1023 = vrot.lane.b32.xlu1 %v3260_v29, %s3056_s4  ;;  %v471_v40 = vor.u32 %v470_v31, %v467_v17  ;;  %v443_v41 = vrot.slane %v441_v28, 4  ;;  %v444_v42 = vshll.u32 %v229_v8, 16  ;;  %v450_v44 = vshll.u32 %v3258_v27, 16  ;;  %v237_v8 = vld [vmem:[%s3145_s30 + $0x84] sm:$0xf] }
  0x3c   : > { %v319_v46 = vsel %vm3173_vm2, %v314_v34, %v318_v15  ;;  %v481_v47 = vor.u32 %v480_v38, %v476_v32  ;;  %v454_v48 = vshrl.u32 %v3258_v27, 16  ;;  %v460_v49 = vshll.u32 %v3265_v33, 16  ;;  %v3301_v38 = vld [vmem:[%s3145_s30 + $0x8c] sm:$0x1] }
  0x3d   : > { %v972_v50 = vunpack.c.l.b16 %v319_v46  ;;  %v472_v51 = vrot.slane %v471_v40, 4  ;;  %v446_v52 = vrot.slane %v444_v42, 5  ;;  %v452_v54 = vrot.slane %v450_v44, 5  ;;  %v235_v44 = vld [vmem:[%s3145_s30 + $0x78] sm:$0xf] }
  0x3e   : > { %v482_v55 = vrot.slane %v481_v47, 4  ;;  %v456_v57 = vrot.slane %v454_v48, 4  ;;  %v462_v58 = vrot.slane %v460_v49, 5  ;;  %v417_v60 = vshrl.u32 %v227_v45, 16 }
  0x3f   : > { %v3278_v61 = vpack.c.b16 %v972_v50, %v971_v35  ;;  %v477_v0 = vsel %vm3173_vm2, %v472_v51, %v476_v32  ;;  %v447_v4 = vor.u32 %v446_v52, %v443_v41  ;;  %v420_v6 = vshll.u32 %v227_v45, 16  ;;  %v3298_v35 = vld [vmem:[%s3145_s30 + $0x88] sm:$0xf] }
  0x40   : > { %v487_v11 = vsel %vm3173_vm2, %v482_v55, %v486_v39  ;;  %v985_v14 = vunpack.c.l.b16 %v477_v0  ;;  %v457_v15 = vor.u32 %v456_v57, %v452_v54  ;;  %v419_v17 = vrot.slane %v417_v60, 4 }
  0x41   : > { %1019 = vrot.lane.b32.xlu0 %v3278_v61, %s3056_s4  ;;  %v986_v18 = vunpack.c.l.b16 %v487_v11  ;;  %v448_v19 = vrot.slane %v447_v4, 4  ;;  %v422_v20 = vrot.slane %v420_v6, 5  ;;  %v426_v21 = vshll.u32 %v3276_v59, 16  ;;  %v3319_v11 = vld [vmem:[%s3145_s30 + $0x80] sm:$0x1] }
  0x42   : > { %v458_v22 = vrot.slane %v457_v15, 4  ;;  %v430_v23 = vshrl.u32 %v3276_v59, 16  ;;  %v436_v24 = vshll.u32 %v3283_v5, 16  ;;  %v537_v28 = vshrl.u32 %v237_v8, 16 }
  0x43   : > { %v3293_v30 = vpack.c.b16 %v986_v18, %v985_v14  ;;  %v453_v31 = vsel %vm3173_vm2, %v448_v19, %v452_v54  ;;  %v423_v32 = vor.u32 %v422_v20, %v419_v17  ;;  %v428_v34 = vrot.slane %v426_v21, 5  ;;  %v233_v19 = vld [vmem:[%s3145_s30 + $0x6c] sm:$0xf] }
  0x44   : > { %v463_v39 = vsel %vm3173_vm2, %v458_v22, %v462_v58  ;;  %v983_v40 = vunpack.c.l.b16 %v453_v31  ;;  %v432_v41 = vrot.slane %v430_v23, 4  ;;  %v438_v42 = vrot.slane %v436_v24, 5  ;;  %v3316_v58 = vld [vmem:[%s3145_s30 + $0x7c] sm:$0xf] }
  0x45   : > { %4576 = vst [vmem:[#allocation6_spill] sm:$0xff] %v3293_v30  ;;  %1033 = vrot.lane.b32.xlu2 %v3293_v30, %s3056_s4  ;;  %v984_v45 = vunpack.c.l.b16 %v463_v39  ;;  %v424_v46 = vrot.slane %v423_v32, 4  ;;  %v539_v47 = vrot.slane %v537_v28, 4  ;;  %v540_v48 = vshll.u32 %v237_v8, 16 }
  0x46   : > { %v433_v49 = vor.u32 %v432_v41, %v428_v34  ;;  %v546_v50 = vshll.u32 %v3298_v35, 16  ;;  %v550_v51 = vshrl.u32 %v3298_v35, 16  ;;  %v556_v52 = vshll.u32 %v3301_v38, 16  ;;  %v3330_v41 = vld [vmem:[%s3145_s30 + $0x70] sm:$0xf] }
  0x47   : > { %v3311_v54 = vpack.c.b16 %v984_v45, %v983_v40  ;;  %v429_v55 = vsel %vm3173_vm2, %v424_v46, %v428_v34  ;;  %v542_v57 = vrot.slane %v540_v48, 5  ;;  %v513_v60 = vshrl.u32 %v235_v44, 16  ;;  %v3337_v48 = vld [vmem:[%s3145_s30 + $0x74] sm:$0x1] }
  0x48   : > { %v434_v0 = vrot.slane %v433_v49, 4  ;;  %v981_v4 = vunpack.c.l.b16 %v429_v55  ;;  %v548_v6 = vrot.slane %v546_v50, 5  ;;  %v552_v8 = vrot.slane %v550_v51, 4  ;;  %v243_v49 = vld [vmem:[%s3145_s30 + $0xa8] sm:$0xf] }
  0x49   : > { %1031 = vrot.lane.b32.xlu1 %v3311_v54, %s3056_s4  ;;  %v543_v14 = vor.u32 %v542_v57, %v539_v47  ;;  %v558_v15 = vrot.slane %v556_v52, 5  ;;  %v515_v17 = vrot.slane %v513_v60, 4  ;;  %v516_v18 = vshll.u32 %v235_v44, 16 }
  0x4a   : > { %v439_v20 = vsel %vm3173_vm2, %v434_v0, %v438_v42  ;;  %v553_v21 = vor.u32 %v552_v8, %v548_v6  ;;  %v522_v22 = vshll.u32 %v3316_v58, 16  ;;  %v526_v23 = vshrl.u32 %v3316_v58, 16 }
  0x4b   : > { %v982_v24 = vunpack.c.l.b16 %v439_v20  ;;  %v544_v28 = vrot.slane %v543_v14, 4  ;;  %v518_v31 = vrot.slane %v516_v18, 5  ;;  %v532_v32 = vshll.u32 %v3319_v11, 16 }
  0x4c   : > { %v554_v34 = vrot.slane %v553_v21, 4  ;;  %v524_v39 = vrot.slane %v522_v22, 5  ;;  %v528_v40 = vrot.slane %v526_v23, 4  ;;  %v489_v44 = vshrl.u32 %v233_v19, 16  ;;  %v3352_v22 = vld [vmem:[%s3145_s30 + $0xac] sm:$0xf] }
  0x4d   : > { %v3332_v45 = vpack.c.b16 %v982_v24, %v981_v4  ;;  %v549_v42 = vsel %vm3173_vm2, %v544_v28, %v548_v6  ;;  %v519_v46 = vor.u32 %v518_v31, %v515_v17  ;;  %v534_v47 = vrot.slane %v532_v32, 5  ;;  %v3355_v23 = vld [vmem:[%s3145_s30 + $0xb0] sm:$0x1]  ;;  %v241_v32 = vld [vmem:[%s3145_s30 + $0x9c] sm:$0xf] }
  0x4e   : > { %v559_v50 = vsel %vm3173_vm2, %v554_v34, %v558_v15  ;;  %v991_v51 = vunpack.c.l.b16 %v549_v42  ;;  %v529_v52 = vor.u32 %v528_v40, %v524_v39  ;;  %v491_v55 = vrot.slane %v489_v44, 4 }
  0x4f   : > { %1029 = vrot.lane.b32.xlu0 %v3332_v45, %s3056_s4  ;;  %v992_v57 = vunpack.c.l.b16 %v559_v50  ;;  %v520_v60 = vrot.slane %v519_v46, 4  ;;  %v492_v0 = vshll.u32 %v233_v19, 16  ;;  %v498_v4 = vshll.u32 %v3330_v41, 16 }
  0x50   : > { %v530_v6 = vrot.slane %v529_v52, 4  ;;  %v502_v8 = vshrl.u32 %v3330_v41, 16  ;;  %v508_v14 = vshll.u32 %v3337_v48, 16  ;;  %v609_v15 = vshrl.u32 %v243_v49, 16 }
  0x51   : > { %v3347_v17 = vpack.c.b16 %v992_v57, %v991_v51  ;;  %v525_v18 = vsel %vm3173_vm2, %v520_v60, %v524_v39  ;;  %v494_v20 = vrot.slane %v492_v0, 5  ;;  %v500_v21 = vrot.slane %v498_v4, 5  ;;  %v3368_v60 = vld [vmem:[%s3145_s30 + $0xa0] sm:$0xf] }
  0x52   : > { %v535_v19 = vsel %vm3173_vm2, %v530_v6, %v534_v47  ;;  %v989_v24 = vunpack.c.l.b16 %v525_v18  ;;  %v504_v28 = vrot.slane %v502_v8, 4  ;;  %v510_v31 = vrot.slane %v508_v14, 5 }
  0x53   : > { %1039 = vrot.lane.b32.xlu2 %v3347_v17, %s3056_s4  ;;  %v990_v34 = vunpack.c.l.b16 %v535_v19  ;;  %v495_v40 = vor.u32 %v494_v20, %v491_v55  ;;  %v611_v39 = vrot.slane %v609_v15, 4  ;;  %v612_v44 = vshll.u32 %v243_v49, 16  ;;  %v3375_v15 = vld [vmem:[%s3145_s30 + $0xa4] sm:$0x1]  ;;  %v239_v19 = vld [vmem:[%s3145_s30 + $0x90] sm:$0xf] }
  0x54   : > { %v505_v42 = vor.u32 %v504_v28, %v500_v21  ;;  %v618_v46 = vshll.u32 %v3352_v22, 16  ;;  %v622_v50 = vshrl.u32 %v3352_v22, 16  ;;  %v628_v47 = vshll.u32 %v3355_v23, 16 }
  0x55   : > { %v3365_v51 = vpack.c.b16 %v990_v34, %v989_v24  ;;  %v496_v52 = vrot.slane %v495_v40, 4  ;;  %v614_v57 = vrot.slane %v612_v44, 5  ;;  %v585_v0 = vshrl.u32 %v241_v32, 16 }
  0x56   : > { %v506_v4 = vrot.slane %v505_v42, 4  ;;  %v620_v55 = vrot.slane %v618_v46, 5  ;;  %v624_v6 = vrot.slane %v622_v50, 4  ;;  %v630_v49 = vrot.slane %v628_v47, 5 }
  0x57   : > { %1037 = vrot.lane.b32.xlu1 %v3365_v51, %s3056_s4  ;;  %v501_v8 = vsel %vm3173_vm2, %v496_v52, %v500_v21  ;;  %v615_v14 = vor.u32 %v614_v57, %v611_v39  ;;  %v587_v18 = vrot.slane %v585_v0, 4  ;;  %v588_v20 = vshll.u32 %v241_v32, 16 }
  0x58   : > { %v511_v24 = vsel %vm3173_vm2, %v506_v4, %v510_v31  ;;  %v987_v28 = vunpack.c.l.b16 %v501_v8  ;;  %v625_v34 = vor.u32 %v624_v6, %v620_v55  ;;  %v594_v40 = vshll.u32 %v3368_v60, 16  ;;  %v3388_v4 = vld [vmem:[%s3145_s30 + $0x94] sm:$0xf]  ;;  %v3391_v6 = vld [vmem:[%s3145_s30 + $0x98] sm:$0x1] }
  0x59   : > { %v988_v44 = vunpack.c.l.b16 %v511_v24  ;;  %v616_v42 = vrot.slane %v615_v14, 4  ;;  %v590_v46 = vrot.slane %v588_v20, 5  ;;  %v598_v21 = vshrl.u32 %v3368_v60, 16 }
  0x5a   : > { %v626_v39 = vrot.slane %v625_v34, 4  ;;  %v596_v50 = vrot.slane %v594_v40, 5  ;;  %v604_v47 = vshll.u32 %v3375_v15, 16  ;;  %v561_v32 = vshrl.u32 %v239_v19, 16 }
  0x5b   : > { %v3383_v52 = vpack.c.b16 %v988_v44, %v987_v28  ;;  %v621_v31 = vsel %vm3173_vm2, %v616_v42, %v620_v55  ;;  %v591_v57 = vor.u32 %v590_v46, %v587_v18  ;;  %v600_v0 = vrot.slane %v598_v21, 4  ;;  %v705_v46 = vld [vmem:[%s3145_s30 + $0xc] sm:$0xe] }
  0x5c   : > { %v631_v8 = vsel %vm3173_vm2, %v626_v39, %v630_v49  ;;  %v997_v14 = vunpack.c.l.b16 %v621_v31  ;;  %v606_v20 = vrot.slane %v604_v47, 5  ;;  %v563_v24 = vrot.slane %v561_v32, 4 }
  0x5d   : > { %1035 = vrot.lane.b32.xlu0 %v3383_v52, %s3056_s4  ;;  %v998_v28 = vunpack.c.l.b16 %v631_v8  ;;  %v592_v34 = vrot.slane %v591_v57, 4  ;;  %v601_v55 = vor.u32 %v600_v0, %v596_v50  ;;  %v564_v18 = vshll.u32 %v239_v19, 16  ;;  %v704_v19 = vld [vmem:[%s3145_s30] sm:$0xe] }
  0x5e   : > { %v570_v40 = vshll.u32 %v3388_v4, 16  ;;  %v574_v44 = vshrl.u32 %v3388_v4, 16  ;;  %v580_v42 = vshll.u32 %v3391_v6, 16 }
  0x5f   : > { %v3401_v49 = vpack.c.b16 %v998_v28, %v997_v14  ;;  %v597_v21 = vsel %vm3173_vm2, %v592_v34, %v596_v50  ;;  %v602_v39 = vrot.slane %v601_v55, 4  ;;  %v566_v47 = vrot.slane %v564_v18, 5 }
  0x60   : > { %v995_v32 = vunpack.c.l.b16 %v597_v21  ;;  %v572_v31 = vrot.slane %v570_v40, 5  ;;  %v576_v57 = vrot.slane %v574_v44, 4  ;;  %v582_v0 = vrot.slane %v580_v42, 5 }
  0x61   : > { %1045 = vrot.lane.b32.xlu2 %v3401_v49, %s3056_s4  ;;  %v607_v8 = vsel %vm3173_vm2, %v602_v39, %v606_v20  ;;  %v567_v53 = vor.u32 %v566_v47, %v563_v24  ;;  %v2585_v14 = vrot.slane %v705_v46, 9  ;;  %v788_v34 = vrot.slane %v3225_v37, 5  ;;  %v245_v39 = vld [vmem:[%s3145_s30 + $0xb4] sm:$0xf] }
  0x62   : > { %v996_v28 = vunpack.c.l.b16 %v607_v8  ;;  %v577_v30 = vor.u32 %v576_v57, %v572_v31  ;;  %v791_v55 = vrot.slane %v3228_v43, 5  ;;  %v2584_v40 = vrot.slane %v704_v19, 9  ;;  %v3438_v57 = vld [vmem:[%s3145_s30 + $0xbc] sm:$0x1] }
  0x63   : > { %v568_v18 = vrot.slane %v567_v53, 4  ;;  %v781_v20 = vrot.slane %v3169_v25, 5  ;;  %v784_v24 = vrot.slane %v3178_v36, 5  ;;  %v789_v46 = vsel %vm3411_vm5, %v2585_v14, %v788_v34  ;;  %v3429_v25 = vld [vmem:[%s3145_s30 + $0xb8] sm:$0xf] }
  0x64   : > { %v3419_v44 = vpack.c.b16 %v996_v28, %v995_v32  ;;  %v578_v42 = vrot.slane %v577_v30, 4  ;;  %v790_v21 = vrot.slane %v788_v34, 4  ;;  %v1051_v47 = vunpack.c.l.b16 %v789_v46 }
  0x65   : > { %v573_v37 = vsel %vm3173_vm2, %v568_v18, %v572_v31  ;;  %v782_v53 = vsel %vm3411_vm5, %v2584_v40, %v781_v20  ;;  %v783_v43 = vrot.slane %v781_v20, 4  ;;  %v633_v28 = vshrl.u32 %v245_v39, 16  ;;  %v708_v20 = vld [vmem:[%s3145_s30 + $0x30] sm:$0xe] }
  0x66   : > { %1043 = vrot.lane.b32.xlu1 %v3419_v44, %s3056_s4  ;;  %v583_v36 = vsel %vm3173_vm2, %v578_v42, %v582_v0  ;;  %v993_v30 = vunpack.c.l.b16 %v573_v37  ;;  %v792_v32 = vsel %vm3411_vm5, %v790_v21, %v791_v55  ;;  %v1049_v31 = vunpack.c.l.b16 %v782_v53  ;;  %v707_v37 = vld [vmem:[%s3145_s30 + $0x24] sm:$0xe] }
  0x67   : > { %v994_v19 = vunpack.c.l.b16 %v583_v36  ;;  %v1052_v8 = vunpack.c.l.b16 %v792_v32  ;;  %v785_v14 = vsel %vm3411_vm5, %v783_v43, %v784_v24  ;;  %v636_v18 = vshll.u32 %v245_v39, 16  ;;  %v706_v32 = vld [vmem:[%s3145_s30 + $0x18] sm:$0xe] }
  0x68   : > { %v1050_v34 = vunpack.c.l.b16 %v785_v14  ;;  %v642_v40 = vshll.u32 %v3429_v25, 16  ;;  %v646_v0 = vshrl.u32 %v3429_v25, 16  ;;  %v635_v46 = vrot.slane %v633_v28, 4 }
  0x69   : > { %v3445_v42 = vpack.c.b16 %v994_v19, %v993_v30  ;;  %v3447_v55 = vpack.c.b16 %v1052_v8, %v1051_v47  ;;  %v652_v21 = vshll.u32 %v3438_v57, 16  ;;  %v638_v36 = vrot.slane %v636_v18, 5 }
  0x6a   : > { %v1081_v53 = vpack.c.b16 %v1050_v34, %v1049_v31  ;;  %v644_v24 = vrot.slane %v642_v40, 5  ;;  %v648_v43 = vrot.slane %v646_v0, 4  ;;  %v2588_v30 = vrot.slane %v708_v20, 9 }
  0x6b   : > { %1041 = vrot.lane.b32.xlu0 %v3445_v42, %s3056_s4  ;;  %1099 = vrot.lane.b32.xlu2 %v3447_v55, %s3057_s5  ;;  %v654_v39 = vrot.slane %v652_v21, 5  ;;  %v809_v47 = vrot.slane %v3149_v1, 5  ;;  %v812_v19 = vrot.slane %v3152_v2, 5  ;;  %v639_v8 = vor.u32 %v638_v36, %v635_v46 }
  0x6c   : > { %v649_v14 = vor.u32 %v648_v43, %v644_v24  ;;  %v2587_v31 = vrot.slane %v707_v37, 9  ;;  %v802_v28 = vrot.slane %v3208_v12, 5  ;;  %v805_v40 = vrot.slane %v3214_v16, 5 }
  0x6d   : > { %v810_v34 = vsel %vm3411_vm5, %v2588_v30, %v809_v47  ;;  %v811_v18 = vrot.slane %v809_v47, 4  ;;  %v2586_v0 = vrot.slane %v706_v32, 9  ;;  %v640_v20 = vrot.slane %v639_v8, 4  ;;  %v711_v30 = vld [vmem:[%s3145_s30 + $0x54] sm:$0xe] }
  0x6e   : > { %1097 = vrot.lane.b32.xlu1 %v1081_v53, %s3057_s5  ;;  %v650_v21 = vrot.slane %v649_v14, 4  ;;  %v1057_v1 = vunpack.c.l.b16 %v810_v34  ;;  %v803_v2 = vsel %vm3411_vm5, %v2587_v31, %v802_v28  ;;  %v804_v46 = vrot.slane %v802_v28, 4 }
  0x6f   : > { %v813_v12 = vsel %vm3411_vm5, %v811_v18, %v812_v19  ;;  %v1055_v37 = vunpack.c.l.b16 %v803_v2  ;;  %v795_v36 = vrot.slane %v3159_v9, 5  ;;  %v645_v16 = vsel %vm3173_vm2, %v640_v20, %v644_v24  ;;  %v710_v9 = vld [vmem:[%s3145_s30 + $0x48] sm:$0xe] }
  0x70   : > { %v655_v53 = vsel %vm3173_vm2, %v650_v21, %v654_v39  ;;  %v1058_v43 = vunpack.c.l.b16 %v813_v12  ;;  %v798_v32 = vrot.slane %v3162_v10, 5  ;;  %v999_v47 = vunpack.c.l.b16 %v645_v16  ;;  %v709_v21 = vld [vmem:[%s3145_s30 + $0x3c] sm:$0xe] }
  0x71   : > { %v1000_v8 = vunpack.c.l.b16 %v655_v53  ;;  %v806_v19 = vsel %vm3411_vm5, %v804_v46, %v805_v40  ;;  %v796_v14 = vsel %vm3411_vm5, %v2586_v0, %v795_v36  ;;  %v797_v28 = vrot.slane %v795_v36, 4  ;;  %v714_v36 = vld [vmem:[%s3145_s30 + $0x78] sm:$0xe] }
  0x72   : > { %v3479_v31 = vpack.c.b16 %v1058_v43, %v1057_v1  ;;  %v1056_v24 = vunpack.c.l.b16 %v806_v19  ;;  %v1053_v34 = vunpack.c.l.b16 %v796_v14  ;;  %v2591_v18 = vrot.slane %v711_v30, 9 }
  0x73   : > { %v3481_v39 = vpack.c.b16 %v1000_v8, %v999_v47  ;;  %v830_v10 = vrot.slane %v3258_v27, 5  ;;  %v833_v20 = vrot.slane %v3265_v33, 5  ;;  %v799_v0 = vsel %vm3411_vm5, %v797_v28, %v798_v32 }
  0x74   : > { %1105 = vrot.lane.b32.xlu2 %v3479_v31, %s3057_s5  ;;  %v3488_v40 = vpack.c.b16 %v1056_v24, %v1055_v37  ;;  %v2590_v1 = vrot.slane %v710_v9, 9  ;;  %v823_v2 = vrot.slane %v3276_v59, 5  ;;  %v1054_v12 = vunpack.c.l.b16 %v799_v0 }
  0x75   : > { %1047 = vrot.lane.b32.xlu0 %v3481_v39, %s3056_s4  ;;  %v831_v27 = vsel %vm3411_vm5, %v2591_v18, %v830_v10  ;;  %v832_v33 = vrot.slane %v830_v10, 4  ;;  %v826_v46 = vrot.slane %v3283_v5, 5  ;;  %v2589_v53 = vrot.slane %v709_v21, 9  ;;  %v713_v5 = vld [vmem:[%s3145_s30 + $0x6c] sm:$0xe] }
  0x76   : > { %1103 = vrot.lane.b32.xlu1 %v3488_v40, %s3057_s5  ;;  %v1063_v37 = vunpack.c.l.b16 %v831_v27  ;;  %v824_v16 = vsel %vm3411_vm5, %v2590_v1, %v823_v2  ;;  %v825_v59 = vrot.slane %v823_v2, 4  ;;  %v3503_v43 = vpack.c.b16 %v1054_v12, %v1053_v34  ;;  %v712_v21 = vld [vmem:[%s3145_s30 + $0x60] sm:$0xe] }
  0x77   : > { %v834_v32 = vsel %vm3411_vm5, %v832_v33, %v833_v20  ;;  %v1061_v30 = vunpack.c.l.b16 %v824_v16  ;;  %v816_v47 = vrot.slane %v3193_v56, 5  ;;  %v819_v14 = vrot.slane %v3198_v62, 5  ;;  %v717_v33 = vld [vmem:[%s3145_s30 + $0x9c] sm:$0xe] }
  0x78   : > { %v1064_v8 = vunpack.c.l.b16 %v834_v32  ;;  %v827_v19 = vsel %vm3411_vm5, %v825_v59, %v826_v46  ;;  %v2594_v9 = vrot.slane %v714_v36, 9  ;;  %v851_v18 = vrot.slane %v3316_v58, 5  ;;  %v716_v32 = vld [vmem:[%s3145_s30 + $0x90] sm:$0xe] }
  0x79   : > { %v1062_v24 = vunpack.c.l.b16 %v827_v19  ;;  %v817_v28 = vsel %vm3411_vm5, %v2589_v53, %v816_v47  ;;  %v818_v34 = vrot.slane %v816_v47, 4  ;;  %v854_v56 = vrot.slane %v3319_v11, 5 }
  0x7a   : > { %v3515_v10 = vpack.c.b16 %v1064_v8, %v1063_v37  ;;  %v2593_v20 = vrot.slane %v713_v5, 9  ;;  %v852_v1 = vsel %vm3411_vm5, %v2594_v9, %v851_v18  ;;  %v853_v2 = vrot.slane %v851_v18, 4  ;;  %v715_v9 = vld [vmem:[%s3145_s30 + $0x84] sm:$0xe] }
  0x7b   : > { %v3519_v0 = vpack.c.b16 %v1062_v24, %v1061_v30  ;;  %v820_v62 = vsel %vm3411_vm5, %v818_v34, %v819_v14  ;;  %v1059_v58 = vunpack.c.l.b16 %v817_v28  ;;  %v1069_v12 = vunpack.c.l.b16 %v852_v1 }
  0x7c   : > { %1111 = vrot.lane.b32.xlu2 %v3515_v10, %s3057_s5  ;;  %v844_v27 = vrot.slane %v3330_v41, 5  ;;  %v847_v11 = vrot.slane %v3337_v48, 5  ;;  %v1060_v46 = vunpack.c.l.b16 %v820_v62  ;;  %v855_v36 = vsel %vm3411_vm5, %v853_v2, %v854_v56 }
  0x7d   : > { %1101 = vrot.lane.b32.xlu0 %v3503_v43, %s3057_s5  ;;  %v2592_v37 = vrot.slane %v712_v21, 9  ;;  %v837_v16 = vrot.slane %v3242_v63, 5  ;;  %v1070_v59 = vunpack.c.l.b16 %v855_v36  ;;  %v840_v53 = vrot.slane %v3247_v7, 5 }
  0x7e   : > { %1109 = vrot.lane.b32.xlu1 %v3519_v0, %s3057_s5  ;;  %v845_v41 = vsel %vm3411_vm5, %v2593_v20, %v844_v27  ;;  %v846_v48 = vrot.slane %v844_v27, 4  ;;  %v2597_v5 = vrot.slane %v717_v33, 9  ;;  %v872_v14 = vrot.slane %v3368_v60, 5 }
  0x7f   : > { %v1067_v30 = vunpack.c.l.b16 %v845_v41  ;;  %v839_v47 = vrot.slane %v837_v16, 4  ;;  %v3541_v8 = vpack.c.b16 %v1070_v59, %v1069_v12  ;;  %v838_v63 = vsel %vm3411_vm5, %v2592_v37, %v837_v16 }
  0x80   : > { %v848_v19 = vsel %vm3411_vm5, %v846_v48, %v847_v11  ;;  %v3549_v24 = vpack.c.b16 %v1060_v46, %v1059_v58  ;;  %v875_v7 = vrot.slane %v3375_v15, 5  ;;  %v2596_v34 = vrot.slane %v716_v32, 9  ;;  %v719_v58 = vld [vmem:[%s3145_s30 + $0xb4] sm:$0xe] }
  0x81   : > { %v1068_v28 = vunpack.c.l.b16 %v848_v19  ;;  %v841_v18 = vsel %vm3411_vm5, %v839_v47, %v840_v53  ;;  %v873_v56 = vsel %vm3411_vm5, %v2597_v5, %v872_v14  ;;  %v874_v20 = vrot.slane %v872_v14, 4 }
  0x82   : > { %v865_v21 = vrot.slane %v3388_v4, 5  ;;  %v1065_v1 = vunpack.c.l.b16 %v838_v63  ;;  %v868_v60 = vrot.slane %v3391_v6, 5  ;;  %v2595_v2 = vrot.slane %v715_v9, 9  ;;  %v718_v63 = vld [vmem:[%s3145_s30 + $0xa8] sm:$0xe] }
  0x83   : > { %v3557_v62 = vpack.c.b16 %v1068_v28, %v1067_v30  ;;  %v876_v15 = vsel %vm3411_vm5, %v874_v20, %v875_v7  ;;  %v1075_v12 = vunpack.c.l.b16 %v873_v56  ;;  %v1066_v4 = vunpack.c.l.b16 %v841_v18  ;;  %v2744_v20 = vld [vmem:[%s3145_s30 + $0xc] sm:$0xff] }
  0x84   : > { %1117 = vrot.lane.b32.xlu2 %v3541_v8, %s3057_s5  ;;  %v866_v27 = vsel %vm3411_vm5, %v2596_v34, %v865_v21  ;;  %v867_v11 = vrot.slane %v865_v21, 4  ;;  %v1076_v33 = vunpack.c.l.b16 %v876_v15  ;;  %v858_v6 = vrot.slane %v3298_v35, 5  ;;  %v3617_v15 = vld [vmem:[%s3145_s30 + $0x30] sm:$0xff] }
  0x85   : > { %1107 = vrot.lane.b32.xlu0 %v3549_v24, %s3057_s5  ;;  %v861_v46 = vrot.slane %v3301_v38, 5  ;;  %v1073_v37 = vunpack.c.l.b16 %v866_v27  ;;  %v2599_v16 = vrot.slane %v719_v58, 9  ;;  %v886_v59 = vrot.slane %v3429_v25, 5  ;;  %v3622_v27 = vld [vmem:[%s3145_s30 + $0x24] sm:$0xff] }
  0x86   : > { %1115 = vrot.lane.b32.xlu1 %v3557_v62, %s3057_s5  ;;  %v869_v36 = vsel %vm3411_vm5, %v867_v11, %v868_v60  ;;  %v859_v48 = vsel %vm3411_vm5, %v2595_v2, %v858_v6  ;;  %v860_v53 = vrot.slane %v858_v6, 4  ;;  %v889_v35 = vrot.slane %v3438_v57, 5  ;;  %v3609_v2 = vpop.permute.xlu2 %1025  ;;  %v3634_v6 = vld [vmem:[%s3145_s30 + $0x54] sm:$0xff] }
  0x87   : > { %v1074_v41 = vunpack.c.l.b16 %v869_v36  ;;  %v3579_v32 = vpack.c.b16 %v1076_v33, %v1075_v12  ;;  %v1071_v38 = vunpack.c.l.b16 %v859_v48  ;;  %v888_v30 = vrot.slane %v886_v59, 4  ;;  %v3640_v36 = vld [vmem:[%s3145_s30 + $0x48] sm:$0xff] }
  0x88   : > { %v3581_v47 = vpack.c.b16 %v1066_v4, %v1065_v1  ;;  %v862_v5 = vsel %vm3411_vm5, %v860_v53, %v861_v46  ;;  %v879_v14 = vrot.slane %v3352_v22, 5  ;;  %v887_v9 = vsel %vm3411_vm5, %v2599_v16, %v886_v59  ;;  %v2745_v4 = vld [vmem:[%s3145_s30 + $0x18] sm:$0xff]  ;;  %v3656_v48 = vld [vmem:[%s3145_s30 + $0x6c] sm:$0xff]  ;;  %v3665_v53 = vld [vmem:[%s3145_s30 + $0x60] sm:$0xff] }
  0x89   : > { %v3585_v19 = vpack.c.b16 %v1074_v41, %v1073_v37  ;;  %v1072_v25 = vunpack.c.l.b16 %v862_v5  ;;  %v890_v57 = vsel %vm3411_vm5, %v888_v30, %v889_v35  ;;  %v2598_v7 = vrot.slane %v718_v63, 9  ;;  %v3650_v16 = vld [vmem:[%s3145_s30 + $0x9c] sm:$0xff] }
  0x8a   : > { %v1079_v22 = vunpack.c.l.b16 %v887_v9  ;;  %v1080_v34 = vunpack.c.l.b16 %v890_v57  ;;  %v881_v18 = vrot.slane %v879_v14, 4  ;;  %v882_v56 = vrot.slane %v3355_v23, 5  ;;  %v3653_v59 = vld [vmem:[%s3145_s30 + $0x3c] sm:$0xff] }
  0x8b   : > { %v3595_v28 = vpack.c.b16 %v1072_v25, %v1071_v38  ;;  %v880_v1 = vsel %vm3411_vm5, %v2598_v7, %v879_v14  ;;  %v3677_v25 = vld [vmem:[%s3145_s30 + $0xa8] sm:$0xff]  ;;  %v2753_v63 = vld [vmem:[%s3145_s30 + $0x78] sm:$0xff] }
  0x8c   : > { %1123 = vrot.lane.b32.xlu2 %v3579_v32, %s3057_s5  ;;  %v3603_v21 = vpack.c.b16 %v1080_v34, %v1079_v22  ;;  %v883_v60 = vsel %vm3411_vm5, %v881_v18, %v882_v56  ;;  %v1077_v23 = vunpack.c.l.b16 %v880_v1  ;;  %v1356_v1 = vsel %vm1341_vm6, %v3617_v15, %v3609_v2 }
  0x8d   : > { %1113 = vrot.lane.b32.xlu0 %v3581_v47, %s3057_s5  ;;  %v1078_v58 = vunpack.c.l.b16 %v883_v60 }
  0x8e   : > { %1121 = vrot.lane.b32.xlu1 %v3585_v19, %s3057_s5 }
  0x8f   : > { %v3619_v12 = vpack.c.b16 %v1078_v58, %v1077_v23 }
  0x91   : > { %v3628_v11 = vpop.permute.xlu2 %1027 }
  0x94   : > { %1133 = vrot.lane.b32.xlu2 %v2744_v20, %s3058_s6 }
  0x95   : > { %1119 = vrot.lane.b32.xlu0 %v3595_v28, %s3057_s5 }
  0x96   : > { %1127 = vrot.lane.b32.xlu1 %v3603_v21, %s3057_s5 }
  0x9c   : > { %1139 = vrot.lane.b32.xlu2 %v3617_v15, %s3058_s6 }
  0x9d   : > { %1125 = vrot.lane.b32.xlu0 %v3619_v12, %s3057_s5  ;;  %s2992_s5 = scalar_lea.hbm %s2991_s29, 256 }
  0x9e   : > { %1137 = vrot.lane.b32.xlu1 %v3622_v27, %s3058_s6  ;;  %p2993_p12 = scmp.ne.s32.totalorder %s2991_s29, %s2992_s5 }
  0x9f   : > { %v1022_v33 = vpop.permute.xlu1 %1021  ;;  %v3647_v37 = vpop.permute.xlu2 %1033 }
  0xa0   : > { %v3637_v46 = vsel %vm1341_vm6, %v2745_v4, %v1022_v33  ;;  %p2994_p13 = pnand %p2993_p12, %p3125_p4 }
  0xa2   : > { %p2995_p0 = pneg %p2994_p13 }
  0xa3   : > { %v1018_v41 = vpop.permute.xlu0 %1017 }
  0xa4   : > { %1145 = vrot.lane.b32.xlu2 %v3634_v6, %s3058_s6 }
  0xa5   : > { %1135 = vrot.lane.b32.xlu0 %v2745_v4, %s3058_s6 }
  0xa6   : > { %1143 = vrot.lane.b32.xlu1 %v3640_v36, %s3058_s6 }
  0xac   : > { %1157 = vrot.lane.b32.xlu2 %v3650_v16, %s3058_s6 }
  0xad   : > { %1141 = vrot.lane.b32.xlu0 %v3653_v59, %s3058_s6  ;;  %v3667_v35 = vpop.permute.xlu2 %1039  ;;  %v1024_v5 = vpop.permute.xlu1 %1023 }
  0xae   : > { %1149 = vrot.lane.b32.xlu1 %v3656_v48, %s3058_s6 }
  0xb3   : > { %v1020_v38 = vpop.permute.xlu0 %1019 }
  0xb4   : > { %1219 = vrot.lane.b32.xlu2 %v3557_v62, %s3059_s7  ;;  %v1347_v30 = vsel %vm1341_vm6, %v2744_v20, %v1020_v38 }
  0xb5   : > { %1147 = vrot.lane.b32.xlu0 %v3665_v53, %s3058_s6 }
  0xb6   : > { %1192 = vrot.lane.b32.xlu1 %v3419_v44, %s3060_s8 }
  0xbb   : > { %v1046_v14 = vpop.permute.xlu2 %1045  ;;  %v1032_v57 = vpop.permute.xlu1 %1031 }
  0xbc   : > { %1263 = vrot.lane.b32.xlu2 %v3677_v25, %s3061_s9  ;;  %v3684_v9 = vsel %vm1341_vm6, %v3677_v25, %v1046_v14  ;;  %v1365_v33 = vsel %vm1341_vm6, %v3634_v6, %v1032_v57 }
  0xbd   : > { %1184 = vrot.lane.b32.xlu0 %v3383_v52, %s3060_s8 }
  0xbe   : > { %1255 = vrot.lane.b32.xlu1 %v2753_v63, %s3061_s9 }
  0xc1   : > { %v1030_v7 = vpop.permute.xlu0 %1029 }
  0xc2   : > { %v1362_v22 = vsel %vm1341_vm6, %v3640_v36, %v1030_v7 }
  0xc4   : > { %1325 = vrot.lane.b32.xlu2 %v3541_v8, %s3062_s10 }
  0xc5   : > { %1227 = vrot.lane.b32.xlu0 %v3579_v32, %s3059_s7  ;;  %v1100_v34 = vpop.permute.xlu2 %1099 }
  0xc6   : > { %1298 = vrot.lane.b32.xlu1 %v3401_v49, %s3063_s11  ;;  %v3698_v18 = vsel %vm1390_vm7, %v1347_v30, %v1100_v34  ;;  %v2743_v30 = vld [vmem:[%s3145_s30] sm:$0xff] }
  0xc7   : > { %v1344_v7 = vsel %vm1341_vm6, %v2743_v30, %v1018_v41 }
  0xc9   : > { %v1038_v56 = vpop.permute.xlu1 %1037 }
  0xca   : > { %v1374_v20 = vsel %vm1341_vm6, %v2753_v63, %v1038_v56 }
  0xcc   : > { %1176 = vrot.lane.b32.xlu2 %v3244_v3, %s3060_s8 }
  0xcd   : > { %1290 = vrot.lane.b32.xlu0 %v3365_v51, %s3063_s11 }
  0xce   : > { %1168 = vrot.lane.b32.xlu1 %v3278_v61, %s3060_s8  ;;  %v1106_v60 = vpop.permute.xlu2 %1105 }
  0xcf   : > { %v3711_v23 = vsel %vm1390_vm7, %v1356_v1, %v1106_v60  ;;  %v1036_v58 = vpop.permute.xlu0 %1035  ;;  %v3736_v1 = vld [vmem:[%s3145_s30 + $0xb4] sm:$0xff] }
  0xd4   : > { %1239 = vrot.lane.b32.xlu2 %v2745_v4, %s3061_s9 }
  0xd5   : > { %1333 = vrot.lane.b32.xlu0 %v3619_v12, %s3062_s10 }
  0xd6   : > { %1211 = vrot.lane.b32.xlu1 %v3549_v24, %s3059_s7  ;;  %v1112_v2 = vpop.permute.xlu2 %1111 }
  0xd7   : > { %v3721_v61 = vsel %vm1390_vm7, %v1365_v33, %v1112_v2  ;;  %v1353_v33 = vsel %vm1341_vm6, %v3622_v27, %v1024_v5 }
  0xd8   : > { %v1044_v38 = vpop.permute.xlu1 %1043 }
  0xdc   : > { %1282 = vrot.lane.b32.xlu2 %v3332_v45, %s3063_s11 }
  0xdd   : > { %1203 = vrot.lane.b32.xlu0 %v3447_v55, %s3059_s7  ;;  %v1042_v4 = vpop.permute.xlu0 %1041  ;;  %v1383_v55 = vsel %vm1341_vm6, %v3650_v16, %v1044_v38 }
  0xde   : > { %1274 = vrot.lane.b32.xlu1 %v3210_v13, %s3063_s11  ;;  %v1118_v14 = vpop.permute.xlu2 %1117 }
  0xdf   : > { %v3731_v57 = vsel %vm1390_vm7, %v1374_v20, %v1118_v14 }
  0xe0   : > { %v1098_v34 = vpop.permute.xlu1 %1097 }
  0xe1   : > { %v1392_v56 = vsel %vm1390_vm7, %v1344_v7, %v1098_v34 }
  0xe4   : > { %1151 = vrot.lane.b32.xlu2 %v2753_v63, %s3058_s6 }
  0xe5   : > { %1247 = vrot.lane.b32.xlu0 %v3640_v36, %s3061_s9 }
  0xe6   : > { %1317 = vrot.lane.b32.xlu1 %v3519_v0, %s3062_s10  ;;  %v1124_v20 = vpop.permute.xlu2 %1123 }
  0xe7   : > { %v1048_v60 = vpop.permute.xlu0 %1047  ;;  %v3746_v41 = vsel %vm1390_vm7, %v1383_v55, %v1124_v20 }
  0xe8   : > { %v1389_v63 = vsel %vm1341_vm6, %v3736_v1, %v1048_v60  ;;  %v1104_v2 = vpop.permute.xlu1 %1103 }
  0xe9   : > { %v1398_v36 = vsel %vm1390_vm7, %v1353_v33, %v1104_v2  ;;  %v3787_v33 = vld [vmem:[%s3145_s30 + $0x90] sm:$0xff] }
  0xea   : > { %v1380_v2 = vsel %vm1341_vm6, %v3787_v33, %v1042_v4 }
  0xec   : > { %1194 = vrot.lane.b32.xlu2 %v3401_v49, %s3060_s8  ;;  %v3766_v49 = vld [vmem:[%s3145_s30 + $0x84] sm:$0xff] }
  0xed   : > { %1309 = vrot.lane.b32.xlu0 %v3503_v43, %s3062_s10 }
  0xee   : > { %1186 = vrot.lane.b32.xlu1 %v3365_v51, %s3060_s8  ;;  %v1134_v38 = vpop.permute.xlu2 %1133 }
  0xef   : > { %v1102_v30 = vpop.permute.xlu0 %1101  ;;  %v3760_v5 = vsel %vm1423_vm8, %v1392_v56, %v1134_v38  ;;  %v1359_v56 = vsel %vm1341_vm6, %v3653_v59, %v3628_v11 }
  0xf0   : > { %v1396_v14 = vsel %vm1390_vm7, %v3637_v46, %v1102_v30  ;;  %v1110_v7 = vpop.permute.xlu1 %1109  ;;  %v1377_v30 = vsel %vm1341_vm6, %v3766_v49, %v3667_v35 }
  0xf1   : > { %v1404_v34 = vsel %vm1390_vm7, %v1362_v22, %v1110_v7  ;;  %v1371_v22 = vsel %vm1341_vm6, %v3656_v48, %v1036_v58 }
  0xf4   : > { %1257 = vrot.lane.b32.xlu2 %v3766_v49, %s3061_s9 }
  0xf5   : > { %1159 = vrot.lane.b32.xlu0 %v3677_v25, %s3058_s6 }
  0xf6   : > { %1229 = vrot.lane.b32.xlu1 %v3619_v12, %s3059_s7  ;;  %v1140_v51 = vpop.permute.xlu2 %1139 }
  0xf7   : > { %v1108_v46 = vpop.permute.xlu0 %1107  ;;  %v3778_v55 = vsel %vm1423_vm8, %v1398_v36, %v1140_v51 }
  0xf8   : > { %4579 = vst [vmem:[#allocation7_spill] sm:$0xff] %v3778_v55  ;;  %v1402_v20 = vsel %vm1390_vm7, %v1359_v56, %v1108_v46  ;;  %v1116_v60 = vpop.permute.xlu1 %1115 }
  0xf9   : > { %v3784_v25 = vsel %vm1390_vm7, %v1371_v22, %v1116_v60 }
  0xfc   : > { %1300 = vrot.lane.b32.xlu2 %v3481_v39, %s3063_s11 }
  0xfd   : > { %1221 = vrot.lane.b32.xlu0 %v3541_v8, %s3059_s7 }
  0xfe   : > { %1292 = vrot.lane.b32.xlu1 %v3347_v17, %s3063_s11  ;;  %v1146_v12 = vpop.permute.xlu2 %1145 }
  0xff   : > { %v3795_v11 = vpop.permute.xlu0 %1113  ;;  %v3798_v58 = vsel %vm1423_vm8, %v1404_v34, %v1146_v12 }
 0x100   : > { %4580 = vst [vmem:[#allocation8_spill] sm:$0xff] %v3798_v58  ;;  %v1122_v36 = vpop.permute.xlu1 %1121 }
 0x101   : > { %v3803_v38 = vsel %vm1390_vm7, %v1380_v2, %v1122_v36 }
 0x104   : > { %1170 = vrot.lane.b32.xlu2 %v3210_v13, %s3060_s8  ;;  %v1629_v13 = vld [vmem:[%s4564_s1 + $0x20] sm:$0xf] }
 0x105   : > { %1265 = vrot.lane.b32.xlu0 %v3736_v1, %s3061_s9  ;;  %v1651_v56 = vunpack.c.l.b16 %v1629_v13 }
 0x106   : > { %1335 = vrot.lane.b32.xlu1 %v3603_v21, %s3062_s10  ;;  %v3811_v8 = vpop.permute.xlu2 %1157 }
 0x107   : > { %v1120_v4 = vpop.permute.xlu0 %1119  ;;  %v1656_v46 = vpack.c.b16 %v1651_v56, %v1651_v56  ;;  %v248_v56 = vld [vmem:[%s3145_s30 + $0xc4] sm:$0xf] }
 0x108   : > { %v3817_v7 = vsel %vm1390_vm7, %v1377_v30, %v1120_v4  ;;  %v1128_v34 = vpop.permute.xlu1 %1127 }
 0x109   : > { %4581 = vst [vmem:[#allocation9_spill] sm:$0xff] %v3817_v7  ;;  %v3820_v51 = vsel %vm1390_vm7, %v1389_v63, %v1128_v34  ;;  %v1696_v63 = vsel %vm1694_vm9, %v1656_v46, 0  ;;  %v247_v46 = vld [vmem:[%s3145_s30 + $0xc0] sm:$0xf] }
 0x10a   : > { %4582 = vst [vmem:[#allocation10_spill] sm:$0xff] %v3820_v51  ;;  %2767 = vmatpush.bf16.msra.mxu2 %v1696_v63  ;;  %2768 = vmatpush.bf16.msra.mxu3 %v1696_v63 }
 0x10b   : > { %1701 = vmatpush.bf16.msra.mxu0 %v1696_v63  ;;  %2766 = vmatpush.bf16.msra.mxu1 %v1696_v63 }
 0x10c   : > { %1213 = vrot.lane.b32.xlu2 %v3519_v0, %s3059_s7  ;;  %v2764_v0 = vld [vmem:[%s4564_s1 + $0x18] sm:$0xff] }
 0x10d   : > { %1327 = vrot.lane.b32.xlu0 %v3595_v28, %s3062_s10 }
 0x10e   : > { %1205 = vrot.lane.b32.xlu1 %v3503_v43, %s3059_s7  ;;  %v3831_v35 = vpop.permute.xlu2 %1219  ;;  %2770 = vmatpush.bf16.msra.mxu2 %v2764_v0  ;;  %v2763_v43 = vld [vmem:[%s4564_s1 + $0x10] sm:$0xff] }
 0x10f   : > { %v1126_v22 = vpop.permute.xlu0 %1125  ;;  %2771 = vmatpush.bf16.msra.mxu3 %v2764_v0  ;;  %1702 = vmatpush.bf16.msra.mxu0 %v2764_v0 }
 0x110   : > { %v3835_v60 = vsel %vm1390_vm7, %v3684_v9, %v1126_v22  ;;  %v1138_v12 = vpop.permute.xlu1 %1137  ;;  %2769 = vmatpush.bf16.msra.mxu1 %v2764_v0  ;;  %v657_v0 = vshrl.u32 %v247_v46, 16 }
 0x111   : > { %4583 = vst [vmem:[#allocation11_spill] sm:$0xff] %v3835_v60  ;;  %v3841_v2 = vsel %vm1423_vm8, %v1396_v14, %v1138_v12  ;;  %v893_v12 = vrot.slane %v248_v56, 5 }
 0x112   : > { %4584 = vst [vmem:[#allocation12_spill] sm:$0xff] %v3841_v2  ;;  %2773 = vmatpush.bf16.msra.mxu2 %v2763_v43  ;;  %v659_v55 = vrot.slane %v657_v0, 4 }
 0x113   : > { %2774 = vmatpush.bf16.msra.mxu3 %v2763_v43  ;;  %1703 = vmatpush.bf16.msra.mxu0 %v2763_v43 }
 0x114   : > { %1276 = vrot.lane.b32.xlu2 %v3260_v29, %s3063_s11  ;;  %2772 = vmatpush.bf16.msra.mxu1 %v2763_v43  ;;  %v660_v43 = vshll.u32 %v247_v46, 16 }
 0x115   : > { %1178 = vrot.lane.b32.xlu0 %v3332_v45, %s3060_s8  ;;  %v2762_v45 = vld [vmem:[%s4564_s1 + $0x8] sm:$0xff] }
 0x116   : > { %1249 = vrot.lane.b32.xlu1 %v3634_v6, %s3061_s9  ;;  %v3852_v9 = vpop.permute.xlu2 %1263  ;;  %2776 = vmatpush.bf16.msra.mxu2 %v2762_v45  ;;  %v2761_v6 = vld [vmem:[%s4564_s1] sm:$0xff]  ;;  %v662_v46 = vrot.slane %v660_v43, 5 }
 0x117   : > { %v1136_v14 = vpop.permute.xlu0 %1135  ;;  %2777 = vmatpush.bf16.msra.mxu3 %v2762_v45  ;;  %1704 = vmatpush.bf16.msra.mxu0 %v2762_v45 }
 0x118   : > { %v3856_v36 = vsel %vm1423_vm8, %v3698_v18, %v1136_v14  ;;  %v1144_v30 = vpop.permute.xlu1 %1143  ;;  %2775 = vmatpush.bf16.msra.mxu1 %v2762_v45  ;;  %v666_v14 = vshll.u32 %v248_v56, 16  ;;  %v663_v58 = vor.u32 %v662_v46, %v659_v55  ;;  %v1368_v55 = vsel %vm1341_vm6, %v3665_v53, %v3647_v37 }
 0x119   : > { %v3862_v4 = vsel %vm1423_vm8, %v1402_v20, %v1144_v30  ;;  %v670_v30 = vshrl.u32 %v248_v56, 16 }
 0x11a   : > { %2779 = vmatpush.bf16.msra.mxu2 %v2761_v6  ;;  %v664_v43 = vrot.slane %v663_v58, 4 }
 0x11b   : > { %2780 = vmatpush.bf16.msra.mxu3 %v2761_v6  ;;  %1705 = vmatpush.bf16.msra.mxu0 %v2761_v6  ;;  %v672_v56 = vrot.slane %v670_v30, 4 }
 0x11c   : > { %1319 = vrot.lane.b32.xlu2 %v3515_v10, %s3062_s10  ;;  %2778 = vmatpush.bf16.msra.mxu1 %v2761_v6  ;;  %v895_v6 = vrot.slane %v893_v12, 4 }
 0x11d   : > { %1241 = vrot.lane.b32.xlu0 %v3622_v27, %s3061_s9 }
 0x11e   : > { %1311 = vrot.lane.b32.xlu1 %v3488_v40, %s3062_s10  ;;  %v3873_v18 = vpop.permute.xlu2 %1325 }
 0x11f   : > { %v3875_v20 = vpop.permute.xlu0 %1141 }
 0x120   : > { %v1150_v34 = vpop.permute.xlu1 %1149 }
 0x124   : > { %1188 = vrot.lane.b32.xlu2 %v3347_v17, %s3060_s8  ;;  %v720_v17 = vld [vmem:[%s3145_s30 + $0xc0] sm:$0xe] }
 0x125   : > { %1284 = vrot.lane.b32.xlu0 %v3311_v54, %s3063_s11  ;;  %v2600_v45 = vrot.slane %v720_v17, 9  ;;  %v3908_v17 = vld [vmem:[%s3145_s30 + $0xc0] sm:$0xff] }
 0x126   : > { %1161 = vrot.lane.b32.xlu1 %v3736_v1, %s3058_s6  ;;  %v3883_v27 = vpop.permute.xlu2 %1176  ;;  %v267_v1 = vld [vmem:[%s3145_s30 + $0xc8] sm:$0x1] }
 0x127   : > { %v1148_v13 = vpop.permute.xlu0 %1147  ;;  %v676_v60 = vshll.u32 %v267_v1, 16 }
 0x128   : > { %v3889_v63 = vsel %vm1423_vm8, %v3721_v61, %v1148_v13  ;;  %v3891_v22 = vpop.permute.xlu1 %1192  ;;  %v896_v61 = vrot.slane %v267_v1, 5 }
 0x129   : > { %4585 = vst [vmem:[#allocation13_spill] sm:$0xff] %v3889_v63  ;;  %v668_v63 = vrot.slane %v666_v14, 5  ;;  %v678_v30 = vrot.slane %v676_v60, 5 }
 0x12b   : > { %v673_v2 = vor.u32 %v672_v56, %v668_v63  ;;  %v669_v46 = vsel %vm3173_vm2, %v664_v43, %v668_v63 }
 0x12c   : > { %1231 = vrot.lane.b32.xlu2 %v3603_v21, %s3059_s7  ;;  %v894_v21 = vsel %vm3411_vm5, %v2600_v45, %v893_v12  ;;  %v1165_v37 = vunpack.c.l.b16 %v669_v46  ;;  %v3989_v46 = vld [vmem:[%s3145_s30 + $0xd0] sm:$0xf] }
 0x12d   : > { %1153 = vrot.lane.b32.xlu0 %v3766_v49, %s3058_s6  ;;  %v897_v49 = vsel %vm3411_vm5, %v895_v6, %v896_v61  ;;  %v674_v14 = vrot.slane %v673_v2, 4 }
 0x12e   : > { %1223 = vrot.lane.b32.xlu1 %v3595_v28, %s3059_s7  ;;  %v3901_v13 = vpop.permute.xlu2 %1239  ;;  %v1200_v28 = vunpack.c.l.b16 %v894_v21  ;;  %v1201_v0 = vunpack.c.l.b16 %v897_v49  ;;  %v1449_v49 = vsel %vm1423_vm8, %v3803_v38, %v3811_v8 }
 0x12f   : > { %v1185_v51 = vpop.permute.xlu0 %1184  ;;  %v679_v58 = vsel %vm3173_vm2, %v674_v14, %v678_v30  ;;  %v1433_v30 = vsel %vm1423_vm8, %v3711_v23, %v3875_v20 }
 0x130   : > { %v1256_v7 = vpop.permute.xlu1 %1255  ;;  %v3921_v6 = vpack.c.b16 %v1201_v0, %v1200_v28  ;;  %v1482_v0 = vsel %vm1456_vm10, %v1449_v49, %v3891_v22 }
 0x134   : > { %1294 = vrot.lane.b32.xlu2 %v3445_v42, %s3063_s11 }
 0x135   : > { %1196 = vrot.lane.b32.xlu0 %v3481_v39, %s3060_s8  ;;  %v1408_v39 = vsel %vm1390_vm7, %v1368_v55, %v3795_v11  ;;  %v1166_v11 = vunpack.c.l.b16 %v679_v58 }
 0x136   : > { %1267 = vrot.lane.b32.xlu1 %v3908_v17, %s3061_s9  ;;  %v3916_v12 = vpop.permute.xlu2 %1282  ;;  %v1441_v61 = vsel %vm1423_vm8, %v1408_v39, %v1150_v34 }
 0x137   : > { %v1228_v45 = vpop.permute.xlu0 %1227  ;;  %v1474_v60 = vsel %vm1456_vm10, %v1441_v61, %v1185_v51  ;;  %v1167_v28 = vpack.c.b16 %v1166_v11, %v1165_v37  ;;  %v249_v61 = vld [vmem:[%s3145_s30 + $0xcc] sm:$0xf]  ;;  %v690_v37 = vshll.u32 %v3989_v46, 16  ;;  %v694_v11 = vshrl.u32 %v3989_v46, 16 }
 0x138   : > { %v1299_v1 = vpop.permute.xlu1 %1298  ;;  %v1507_v2 = vsel %vm1489_vm11, %v1474_v60, %v3831_v35  ;;  %v681_v58 = vshrl.u32 %v249_v61, 16  ;;  %v684_v60 = vshll.u32 %v249_v61, 16 }
 0x139   : > { %v1540_v51 = vsel %vm1522_vm12, %v1507_v2, %v1256_v7  ;;  %v1515_v7 = vsel %vm1489_vm11, %v1482_v0, %v1228_v45  ;;  %v692_v49 = vrot.slane %v690_v37, 5 }
 0x13a   : > { %v1548_v43 = vsel %vm1522_vm12, %v1515_v7, %v3852_v9 }
 0x13b   : > { %v1581_v8 = vsel %vm1555_vm13, %v1548_v43, %v1299_v1 }
 0x13c   : > { %1337 = vrot.lane.b32.xlu2 %v3921_v6, %s3062_s10 }
 0x13d   : > { %1259 = vrot.lane.b32.xlu0 %v3787_v33, %s3061_s9 }
 0x13e   : > { %1329 = vrot.lane.b32.xlu1 %v3585_v19, %s3062_s10  ;;  %v3939_v34 = vpop.permute.xlu2 %1151 }
 0x13f   : > { %v1291_v63 = vpop.permute.xlu0 %1290 }
 0x140   : > { %v1573_v56 = vsel %vm1555_vm13, %v1540_v51, %v1291_v63  ;;  %v1169_v21 = vpop.permute.xlu1 %1168 }
 0x141   : > { %v1606_v35 = vsel %vm1588_vm14, %v1573_v56, %v3873_v18  ;;  %v683_v56 = vrot.slane %v681_v58, 4 }
 0x142   : > { %2698 = vmatmul.msk.bf16.vlgmr.msra.gmra.mxu2 %vm1661_vm15, %v1606_v35  ;;  %v696_v35 = vrot.slane %v694_v11, 4 }
 0x144   : > { %1207 = vrot.lane.b32.xlu2 %v3488_v40, %s3059_s7  ;;  %v697_v43 = vor.u32 %v696_v35, %v692_v49 }
 0x145   : > { %1302 = vrot.lane.b32.xlu0 %v1167_v28, %s3063_s11 }
 0x146   : > { %1180 = vrot.lane.b32.xlu1 %v3311_v54, %s3060_s8  ;;  %v3959_v38 = vpop.permute.xlu2 %1194 }
 0x147   : > { %v1334_v18 = vpop.permute.xlu0 %1333 }
 0x148   : > { %v1614_v22 = vsel %vm1588_vm14, %v1581_v8, %v1334_v18  ;;  %v1212_v14 = vpop.permute.xlu1 %1211 }
 0x149   : > { %2702 = vmatmul.msk.bf16.vlgmr.msra.gmra.mxu3 %vm1661_vm15, %v1614_v22 }
 0x14c   : > { %1251 = vrot.lane.b32.xlu2 %v3665_v53, %s3061_s9  ;;  %v4586_v53 = vld [vmem:[#allocation6_spill] sm:$0xff] }
 0x14d   : > { %1172 = vrot.lane.b32.xlu0 %v3260_v29, %s3060_s8  ;;  %v1466_v29 = vsel %vm1456_vm10, %v1433_v30, %v3883_v27  ;;  %v2760_v30 = vld [vmem:[%s3145_s30 + $0xcc] sm:$0xff] }
 0x14e   : > { %1243 = vrot.lane.b32.xlu1 %v3617_v15, %s3061_s9  ;;  %v3970_v54 = vpop.permute.xlu2 %1257  ;;  %v1499_v45 = vsel %vm1489_vm11, %v1466_v29, %v1212_v14  ;;  %v698_v14 = vrot.slane %v697_v43, 4 }
 0x14f   : > { %v1204_v40 = vpop.permute.xlu0 %1203 }
 0x150   : > { %v1275_v9 = vpop.permute.xlu1 %1274 }
 0x154   : > { %1313 = vrot.lane.b32.xlu2 %v3479_v31, %s3062_s10 }
 0x155   : > { %1215 = vrot.lane.b32.xlu0 %v3515_v10, %s3059_s7  ;;  %v1458_v10 = vsel %vm1456_vm10, %v3760_v5, %v1169_v21  ;;  %v686_v21 = vrot.slane %v684_v60, 5 }
 0x156   : > { %1286 = vrot.lane.b32.xlu1 %v4586_v53, %s3063_s11  ;;  %v3983_v15 = vpop.permute.xlu2 %1300  ;;  %v1491_v20 = vsel %vm1489_vm11, %v1458_v10, %v1204_v40  ;;  %v900_v10 = vrot.slane %v3989_v46, 5 }
 0x157   : > { %v1248_v55 = vpop.permute.xlu0 %1247  ;;  %v1524_v5 = vsel %vm1522_vm12, %v1491_v20, %v3901_v13  ;;  %v268_v13 = vld [vmem:[%s3145_s30 + $0xd4] sm:$0x1]  ;;  %v687_v7 = vor.u32 %v686_v21, %v683_v56 }
 0x158   : > { %v1532_v1 = vsel %vm1522_vm12, %v1499_v45, %v1248_v55  ;;  %v1318_v39 = vpop.permute.xlu1 %1317  ;;  %v1557_v2 = vsel %vm1555_vm13, %v1524_v5, %v1275_v9  ;;  %v700_v8 = vshll.u32 %v268_v13, 16  ;;  %v902_v20 = vrot.slane %v900_v10, 4 }
 0x159   : > { %v1565_v23 = vsel %vm1555_vm13, %v1532_v1, %v3916_v12  ;;  %v4587_v12 = vld [vmem:[#allocation5_spill] sm:$0xff]  ;;  %v688_v22 = vrot.slane %v687_v7, 4 }
 0x15a   : > { %v1598_v27 = vsel %vm1588_vm14, %v1565_v23, %v1318_v39  ;;  %v702_v40 = vrot.slane %v700_v8, 5  ;;  %v721_v23 = vld [vmem:[%s3145_s30 + $0xcc] sm:$0xe] }
 0x15b   : > { %2694 = vmatmul.msk.bf16.vlgmr.msra.gmra.mxu1 %vm1661_vm15, %v1598_v27  ;;  %v693_v29 = vsel %vm3173_vm2, %v688_v22, %v692_v49  ;;  %v903_v27 = vrot.slane %v268_v13, 5 }
 0x15c   : > { %1163 = vrot.lane.b32.xlu2 %v3908_v17, %s3058_s6 }
 0x15d   : > { %1278 = vrot.lane.b32.xlu0 %v4587_v12, %s3063_s11  ;;  %v904_v5 = vsel %vm3411_vm5, %v902_v20, %v903_v27 }
 0x15e   : > { %1155 = vrot.lane.b32.xlu1 %v3787_v33, %s3058_s6  ;;  %v4009_v51 = vpop.permute.xlu2 %1170  ;;  %s2996_s6 = scalar_lea.hbm %s4566_s3, 512 }
 0x15f   : > { %v1310_v63 = vpop.permute.xlu0 %1309  ;;  %v1460_v35 = vsel %vm1456_vm10, %v3856_v36, %v4009_v51  ;;  %p2998_p2 = scmp.lt.s32.totalorder %s2996_s6, %s2992_s5 }
 0x160   : > { %v1590_v17 = vsel %vm1588_vm14, %v1557_v2, %v1310_v63  ;;  %v1187_v0 = vpop.permute.xlu1 %1186 }
 0x161   : > { %2690 = vmatmul.msk.bf16.vlgmr.msra.gmra.mxu0 %vm1661_vm15, %v1590_v17  ;;  %p2999_p3 = por %p2998_p2, %p2997_p1 }
 0x163   : > { %p3000_p5 = pnand %p2999_p3, %p2995_p0 }
 0x164   : > { %1225 = vrot.lane.b32.xlu2 %v3585_v19, %s3059_s7  ;;  %v703_v19 = vsel %vm3173_vm2, %v698_v14, %v702_v40 }
 0x165   : > { %1321 = vrot.lane.b32.xlu0 %v3581_v47, %s3062_s10  ;;  %v1272_v45 = vunpack.c.l.b16 %v703_v19 }
 0x166   : > { %1198 = vrot.lane.b32.xlu1 %v1167_v28, %s3060_s8  ;;  %v4019_v18 = vpop.permute.xlu2 %1213  ;;  %v1271_v28 = vunpack.c.l.b16 %v693_v29 }
 0x167   : > { %v1160_v33 = vpop.permute.xlu0 %1159 }
 0x168   : > { %v1230_v9 = vpop.permute.xlu1 %1229  ;;  %v1273_v61 = vpack.c.b16 %v1272_v45, %v1271_v28  ;;  %v1451_v26 = vsel %vm1423_vm8, %v3746_v41, %v1160_v33 }
 0x16c   : > { %1269 = vrot.lane.b32.xlu2 %v2760_v30, %s3061_s9 }
 0x16d   : > { %1190 = vrot.lane.b32.xlu0 %v3445_v42, %s3060_s8  ;;  %v1484_v42 = vsel %vm1456_vm10, %v1451_v26, %v3959_v38 }
 0x16e   : > { %1261 = vrot.lane.b32.xlu1 %v3650_v16, %s3061_s9  ;;  %v1277_v39 = vpop.permute.xlu2 %1276  ;;  %v2601_v16 = vrot.slane %v721_v23, 9  ;;  %v1517_v46 = vsel %vm1489_vm11, %v1484_v42, %v1230_v9 }
 0x16f   : > { %v1222_v55 = vpop.permute.xlu0 %1221 }
 0x170   : > { %v1293_v1 = vpop.permute.xlu1 %1292  ;;  %v901_v11 = vsel %vm3411_vm5, %v2601_v16, %v900_v10 }
 0x174   : > { %1331 = vrot.lane.b32.xlu2 %v3579_v32, %s3062_s10  ;;  %v1443_v32 = vsel %vm1423_vm8, %v3784_v25, %v3939_v34  ;;  %v1306_v25 = vunpack.c.l.b16 %v901_v11  ;;  %v1307_v34 = vunpack.c.l.b16 %v904_v5  ;;  %v4589_v5 = vld [vmem:[#allocation12_spill] sm:$0xff] }
 0x175   : > { %1233 = vrot.lane.b32.xlu0 %v3921_v6, %s3059_s7  ;;  %v1476_v38 = vsel %vm1456_vm10, %v1443_v32, %v1187_v0 }
 0x176   : > { %1304 = vrot.lane.b32.xlu1 %v1273_v61, %s3063_s11  ;;  %v1509_v2 = vsel %vm1489_vm11, %v1476_v38, %v1222_v55  ;;  %v1320_v63 = vpop.permute.xlu2 %1319 }
 0x177   : > { %v1266_v58 = vpop.permute.xlu0 %1265 }
 0x178   : > { %v1550_v41 = vsel %vm1522_vm12, %v1517_v46, %v1266_v58  ;;  %v1336_v60 = vpop.permute.xlu1 %1335 }
 0x179   : > { %v1583_v6 = vsel %vm1555_vm13, %v1550_v41, %v3983_v15  ;;  %v1542_v15 = vsel %vm1522_vm12, %v1509_v2, %v3970_v54  ;;  %v4120_v41 = vld [vmem:[%s4565_s2] ss:$0 sm:$0xff] }
 0x17a   : > { %v1616_v37 = vsel %vm1588_vm14, %v1583_v6, %v1336_v60  ;;  %v1575_v50 = vsel %vm1555_vm13, %v1542_v15, %v1293_v1 }
 0x17b   : > { %2703 = vmatmul.msk.bf16.gmra.mxu3 %vm1661_vm15, %v1616_v37 }
 0x17c   : > { %1182 = vrot.lane.b32.xlu2 %v4586_v53, %s3060_s8  ;;  %v1308_v53 = vpack.c.b16 %v1307_v34, %v1306_v25 }
 0x17d   : > { %1296 = vrot.lane.b32.xlu0 %v3419_v44, %s3063_s11 }
 0x17e   : > { %1174 = vrot.lane.b32.xlu1 %v4587_v12, %s3060_s8  ;;  %v1189_v44 = vpop.permute.xlu2 %1188 }
 0x17f   : > { %v1328_v56 = vpop.permute.xlu0 %1327 }
 0x180   : > { %v1608_v21 = vsel %vm1588_vm14, %v1575_v50, %v1328_v56  ;;  %v1206_v49 = vpop.permute.xlu1 %1205 }
 0x181   : > { %2699 = vmatmul.msk.bf16.gmra.mxu2 %vm1661_vm15, %v1608_v21 }
 0x184   : > { %1245 = vrot.lane.b32.xlu2 %v3653_v59, %s3061_s9  ;;  %v1493_v59 = vsel %vm1489_vm11, %v1460_v35, %v1206_v49 }
 0x185   : > { %1339 = vrot.lane.b32.xlu0 %v1308_v53, %s3062_s10 }
 0x186   : > { %1217 = vrot.lane.b32.xlu1 %v3581_v47, %s3059_s7  ;;  %v1232_v17 = vpop.permute.xlu2 %1231 }
 0x187   : > { %v1179_v54 = vpop.permute.xlu0 %1178 }
 0x188   : > { %v1250_v12 = vpop.permute.xlu1 %1249 }
 0x18c   : > { %1288 = vrot.lane.b32.xlu2 %v3383_v52, %s3063_s11 }
 0x18d   : > { %1209 = vrot.lane.b32.xlu0 %v3479_v31, %s3059_s7  ;;  %v1468_v31 = vsel %vm1456_vm10, %v3862_v4, %v1179_v54  ;;  %s199_s7 = sand.u32 1, %s3038_s13  }
 0x18e   : > { %1280 = vrot.lane.b32.xlu1 %v3244_v3, %s3063_s11  ;;  %v1501_v3 = vsel %vm1489_vm11, %v1468_v31, %v4019_v18  ;;  %v1295_v33 = vpop.permute.xlu2 %1294  ;;  %s2582_s8 = sshll.u32 %s199_s7, 8  ;;  %s2460_s28 = scalar_lea.sflag [#allocation3], %s199_s7 }
 0x18f   : > { %v1242_v0 = vpop.permute.xlu0 %1241  ;;  %v1534_v36 = vsel %vm1522_vm12, %v1501_v3, %v1250_v12 }
 0x190   : > { %v1526_v47 = vsel %vm1522_vm12, %v1493_v59, %v1242_v0  ;;  %v1312_v13 = vpop.permute.xlu1 %1311 }
 0x191   : > { %v1559_v7 = vsel %vm1555_vm13, %v1526_v47, %v1277_v39 }
 0x192   : > { %v1592_v52 = vsel %vm1588_vm14, %v1559_v7, %v1312_v13 }
 0x193   : > { %2691 = vmatmul.msk.bf16.gmra.mxu0 %vm1661_vm15, %v1592_v52 }
 0x195   : > { %1253 = vrot.lane.b32.xlu0 %v3656_v48, %s3061_s9  ;;  %s4198_s9 = scalar_lea.vmem [#allocation2], %s2582_s8 }
 0x196   : > { %1323 = vrot.lane.b32.xlu1 %v3557_v62, %s3062_s10  ;;  %v1338_v18 = vpop.permute.xlu2 %1337  ;;  %s2473_s26 = sshll.u32 %s4198_s9, 4  ;;  %s2474_s26 = int_to_ptr.vmem [resolvable:$true] %s2473_s26 }
 0x197   : > { %v1285_v51 = vpop.permute.xlu0 %1284 }
 0x198   : > { %v1567_v43 = vsel %vm1555_vm13, %v1534_v36, %v1285_v51  ;;  %v1162_v8 = vpop.permute.xlu1 %1161 }
 0x199   : > { %v1600_v4 = vsel %vm1588_vm14, %v1567_v43, %v1320_v63 }
 0x19a   : > { %2695 = vmatmul.msk.bf16.gmra.mxu1 %vm1661_vm15, %v1600_v4 }
 0x19d   : > { %1315 = vrot.lane.b32.xlu0 %v3549_v24, %s3062_s10  ;;  %v4588_v24 = vld [vmem:[#allocation11_spill] sm:$0xff] }
 0x19e   : > { %v1208_v9 = vpop.permute.xlu2 %1207  ;;  %v1453_v1 = vsel %vm1423_vm8, %v4588_v24, %v1162_v8 }
 0x19f   : > { %v1154_v48 = vpop.permute.xlu0 %1153 }
 0x1a0   : > { %v1224_v22 = vpop.permute.xlu1 %1223  ;;  %v1445_v62 = vsel %vm1423_vm8, %v3731_v57, %v1154_v48 }
 0x1a1   : > { %v1478_v30 = vsel %vm1456_vm10, %v1445_v62, %v1189_v44 }
 0x1a2   : > { %v1511_v29 = vsel %vm1489_vm11, %v1478_v30, %v1224_v22 }
 0x1a6   : > { %v1252_v10 = vpop.permute.xlu2 %1251 }
 0x1a7   : > { %v1197_v14 = vpop.permute.xlu0 %1196 }
 0x1a8   : > { %v1268_v40 = vpop.permute.xlu1 %1267  ;;  %v1486_v61 = vsel %vm1456_vm10, %v1453_v1, %v1197_v14 }
 0x1a9   : > { %v1519_v57 = vsel %vm1489_vm11, %v1486_v61, %v1232_v17  ;;  %v4590_v17 = vld [vmem:[#allocation8_spill] sm:$0xff] }
 0x1aa   : > { %v1552_v26 = vsel %vm1522_vm12, %v1519_v57, %v1268_v40 }
 0x1ae   : > { %v1314_v58 = vpop.permute.xlu2 %1313 }
 0x1af   : > { %v1260_v19 = vpop.permute.xlu0 %1259 }
 0x1b0   : > { %v1544_v28 = vsel %vm1522_vm12, %v1511_v29, %v1260_v19  ;;  %v1330_v45 = vpop.permute.xlu1 %1329 }
 0x1b1   : > { %v1577_v55 = vsel %vm1555_vm13, %v1544_v28, %v1295_v33 }
 0x1b2   : > { %v1610_v39 = vsel %vm1588_vm14, %v1577_v55, %v1330_v45 }
 0x1b3   : > { %2700 = vmatmul.msk.bf16.gmra.mxu2 %vm1661_vm15, %v1610_v39 }
 0x1b6   : > { %v4126_v11 = vpop.permute.xlu2 %1163 }
 0x1b7   : > { %v1303_v23 = vpop.permute.xlu0 %1302 }
 0x1b8   : > { %v1585_v42 = vsel %vm1555_vm13, %v1552_v26, %v1303_v23  ;;  %v1181_v16 = vpop.permute.xlu1 %1180 }
 0x1b9   : > { %v1618_v20 = vsel %vm1588_vm14, %v1585_v42, %v1338_v18  ;;  %v1470_v0 = vsel %vm1456_vm10, %v4590_v17, %v1181_v16 }
 0x1ba   : > { %2704 = vmatmul.msk.bf16.gmra.mxu3 %vm1661_vm15, %v1618_v20 }
 0x1be   : > { %v4148_v7 = vpop.permute.xlu2 %1225 }
 0x1bf   : > { %v1173_v27 = vpop.permute.xlu0 %1172 }
 0x1c0   : > { %v1244_v46 = vpop.permute.xlu1 %1243  ;;  %v1462_v2 = vsel %vm1456_vm10, %v4589_v5, %v1173_v27 }
 0x1c1   : > { %v1495_v15 = vsel %vm1489_vm11, %v1462_v2, %v1208_v9 }
 0x1c2   : > { %v1528_v56 = vsel %vm1522_vm12, %v1495_v15, %v1244_v46 }
 0x1c5   : > { %v1747_v60 = vpop.f32.mrf.mxu2 }
 0x1c6   : > { %v4123_v32 = vadd.f32 %v4120_v41, %v1747_v60  ;;  %v4171_v24 = vpop.permute.xlu2 %1269 }
 0x1c7   : > { %v1216_v6 = vpop.permute.xlu0 %1215 }
 0x1c8   : > { %v2722_v38 = vmul.f32 -1.442695, %v4123_v32  ;;  %v1287_v37 = vpop.permute.xlu1 %1286  ;;  %v1503_v47 = vsel %vm1489_vm11, %v1470_v0, %v1216_v6 }
 0x1c9   : > { %v1536_v31 = vsel %vm1522_vm12, %v1503_v47, %v1252_v10 }
 0x1ca   : > { %2847 = vpow2.f32 %v2722_v38  ;;  %v1569_v36 = vsel %vm1555_vm13, %v1536_v31, %v1287_v37 }
 0x1cc   : > { %v1767_v63 = vpop.f32.mrf.mxu3 }
 0x1cd   : > { %v4131_v25 = vadd.f32 %v4120_v41, %v1767_v63  ;;  %v1749_v34 = vpop.f32.mrf.mxu2 }
 0x1ce   : > { %v4135_v50 = vadd.f32 %v4120_v41, %v1749_v34 }
 0x1cf   : > { %v2730_v21 = vmul.f32 -1.442695, %v4131_v25  ;;  %v1279_v49 = vpop.permute.xlu0 %1278 }
 0x1d0   : > { %v2848_v53 = vpop.eup %2847  ;;  %v2723_v44 = vmul.f32 -1.442695, %v4135_v50  ;;  %v1561_v54 = vsel %vm1555_vm13, %v1528_v56, %v1279_v49  ;;  %v4141_v12 = vpop.permute.xlu1 %1155 }
 0x1d1   : > { %v1899_v35 = vadd.f32 1.0, %v2848_v53  ;;  %2849 = vpow2.f32 %v2730_v21  ;;  %v1594_v59 = vsel %vm1588_vm14, %v1561_v54, %v1314_v58 }
 0x1d2   : > { %2851 = vpow2.f32 %v2723_v44  ;;  %2692 = vmatmul.msk.bf16.gmra.mxu0 %vm1661_vm15, %v1594_v59 }
 0x1d3   : > { %2853 = vrcp.f32 %v1899_v35  ;;  %v2164_v30 = vand.u32 2147483647, %v1899_v35  ;;  %v2166_v19 = vand.u32 2147483648, %v1899_v35  ;;  %vm2160_vm1 = vweird.f32 %v1899_v35 }
 0x1d4   : > { %v1769_v13 = vpop.f32.mrf.mxu3 }
 0x1d5   : > { %v4151_v52 = vadd.f32 %v4120_v41, %v1769_v13  ;;  %vm2165_vm2 = vcmp.eq.f32.partialorder %v2164_v30, 8.507059e+37  ;;  %v2167_v16 = vor.u32 1.1754944e-38, %v2166_v19 }
 0x1d7   : > { %v2850_v3 = vpop.eup %2849  ;;  %v2731_v51 = vmul.f32 -1.442695, %v4151_v52  ;;  %v1322_v43 = vpop.permute.xlu0 %1321 }
 0x1d8   : > { %v2852_v8 = vpop.eup %2851  ;;  %v4156_v33 = vadd.f32 1.0, %v2850_v3  ;;  %v1602_v4 = vsel %vm1588_vm14, %v1569_v36, %v1322_v43  ;;  %v1727_v48 = vpop.f32.mrf.mxu1 }
 0x1d9   : > { %v4159_v22 = vpop.permute.xlu1 %1198  ;;  %v2854_v18 = vpop.eup %2853  ;;  %v4161_v14 = vadd.f32 1.0, %v2852_v8  ;;  %2855 = vpow2.f32 %v2731_v51  ;;  %2696 = vmatmul.msk.bf16.gmra.mxu1 %vm1661_vm15, %v1602_v4  ;;  %v4165_v40 = vadd.f32 %v4120_v41, %v1727_v48 }
 0x1da   : > { %v2156_v62 = vmul.f32 %v2854_v18, %v1899_v35  ;;  %2857 = vrcp.f32 %v4156_v33  ;;  %vm2161_vm0 = vweird.f32 %v2854_v18  ;;  %v2284_v60 = vand.u32 2147483647, %v4156_v33  ;;  %v1332_v48 = vpop.permute.xlu2 %1331 }
 0x1db   : > { %2859 = vrcp.f32 %v4161_v14  ;;  %v2714_v29 = vmul.f32 -1.442695, %v4165_v40  ;;  %vm2162_vm3 = vmor %vm2160_vm1, %vm2161_vm0  ;;  %v2286_v5 = vand.u32 2147483648, %v4156_v33  ;;  %v2179_v2 = vand.u32 2147483647, %v4161_v14 }
 0x1dc   : > { %v2157_v9 = vsub.f32 1.0, %v2156_v62  ;;  %v2181_v56 = vand.u32 2147483648, %v4161_v14  ;;  %vm2280_vm5 = vweird.f32 %v4156_v33  ;;  %vm4205_vm7 = vcmp.eq.f32.partialorder %v2284_v60, 8.507059e+37 }
 0x1dd   : > { %2861 = vpow2.f32 %v2714_v29  ;;  %vm2175_vm9 = vweird.f32 %v4161_v14  ;;  %v2287_v13 = vor.u32 1.1754944e-38, %v2286_v5 }
 0x1de   : > { %v2158_v28 = vmul.f32 %v2854_v18, %v2157_v9  ;;  %v1707_v45 = vpop.f32.mrf.mxu0  ;;  %v2182_v51 = vor.u32 1.1754944e-38, %v2181_v56 }
 0x1df   : > { %v2856_v55 = vpop.eup %2855  ;;  %v4174_v1 = vadd.f32 %v4120_v41, %v1707_v45  ;;  %v1191_v39 = vpop.permute.xlu0 %1190 }
 0x1e0   : > { %v2858_v61 = vpop.eup %2857  ;;  %v2159_v57 = vadd.f32 %v2854_v18, %v2158_v28  ;;  %v4178_v10 = vadd.f32 1.0, %v2856_v55  ;;  %v1729_v26 = vpop.f32.mrf.mxu1 }
 0x1e1   : > { %v4180_v23 = vpop.permute.xlu1 %1261  ;;  %v2860_v42 = vpop.eup %2859  ;;  %v2276_v20 = vmul.f32 %v2858_v61, %v4156_v33  ;;  %v2706_v27 = vmul.f32 -1.442695, %v4174_v1  ;;  %v4186_v46 = vadd.f32 %v4120_v41, %v1729_v26  ;;  %vm2281_vm4 = vweird.f32 %v2858_v61 }
 0x1e2   : > { %v2163_v58 = vsel %vm2162_vm3, %v2854_v18, %v2159_v57  ;;  %v2171_v6 = vmul.f32 %v2860_v42, %v4161_v14  ;;  %2863 = vrcp.f32 %v4178_v10  ;;  %vm2176_vm6 = vweird.f32 %v2860_v42  ;;  %vm2282_vm0 = vmor %vm2280_vm5, %vm2281_vm4 }
 0x1e3   : > { %v2168_v38 = vsel %vm2165_vm2, %v2167_v16, %v2163_v58  ;;  %v2277_v37 = vsub.f32 1.0, %v2276_v20  ;;  %v2862_v63 = vpop.eup %2861  ;;  %2865 = vpow2.f32 %v2706_v27  ;;  %v2715_v53 = vmul.f32 -1.442695, %v4186_v46  ;;  %vm2177_vm1 = vmor %vm2175_vm9, %vm2176_vm6 }
 0x1e4   : > { %v2411_v34 = vmul.f32 %v2168_v38, %v4123_v32  ;;  %v2172_v15 = vsub.f32 1.0, %v2171_v6  ;;  %v4195_v49 = vadd.f32 1.0, %v2862_v63  ;;  %v4591_v32 = vld [vmem:[#allocation9_spill] sm:$0xff]  ;;  %vm2180_vm2 = vcmp.eq.f32.partialorder %v2179_v2, 8.507059e+37 }
 0x1e5   : > { %v2278_v21 = vmul.f32 %v2858_v61, %v2277_v37  ;;  %v1447_v54 = vsel %vm1423_vm8, %v4591_v32, %v4141_v12  ;;  %v2299_v28 = vand.u32 2147483647, %v4178_v10  ;;  %v2301_v45 = vand.u32 2147483648, %v4178_v10 }
 0x1e6   : > { %2443 = vst [vmem:[%s4198_s9 + $0x80] sm:$0xff] %v2411_v34  ;;  %v2173_v44 = vmul.f32 %v2860_v42, %v2172_v15  ;;  %v1709_v35 = vpop.f32.mrf.mxu0  ;;  %2867 = vrcp.f32 %v4195_v49  ;;  %v1480_v18 = vsel %vm1456_vm10, %v1447_v54, %v1191_v39  ;;  %vm2295_vm4 = vweird.f32 %v4178_v10 }
 0x1e7   : > { %v2279_v59 = vadd.f32 %v2858_v61, %v2278_v21  ;;  %v1234_v0 = vpop.permute.xlu0 %1233  ;;  %v4213_v3 = vadd.f32 %v4120_v41, %v1709_v35  ;;  %2869 = vpow2.f32 %v2715_v53  ;;  %vm2300_vm5 = vcmp.eq.f32.partialorder %v2299_v28, 8.507059e+37 }
 0x1e8   : > { %v2864_v47 = vpop.eup %2863  ;;  %v2174_v31 = vadd.f32 %v2860_v42, %v2173_v44  ;;  %v2302_v58 = vor.u32 1.1754944e-38, %v2301_v45  ;;  %v2046_v37 = vand.u32 2147483648, %v4195_v49  ;;  %v4259_v44 = vpop.permute.xlu2 %1182 }
 0x1e9   : > { %v4215_v12 = vpop.permute.xlu1 %1304  ;;  %v2283_v36 = vsel %vm2282_vm0, %v2858_v61, %v2279_v59  ;;  %v2291_v43 = vmul.f32 %v2864_v47, %v4178_v10  ;;  %v2866_v8 = vpop.eup %2865  ;;  %v2707_v14 = vmul.f32 -1.442695, %v4213_v3  ;;  %v4594_v61 = vld [vmem:[#allocation10_spill] sm:$0xff]  ;;  %vm2296_vm3 = vweird.f32 %v2864_v47 }
 0x1ea   : > { %v2288_v33 = vsel %vm4205_vm7, %v2287_v13, %v2283_v36  ;;  %v2178_v4 = vsel %vm2177_vm1, %v2860_v42, %v2174_v31  ;;  %v4224_v29 = vadd.f32 1.0, %v2866_v8  ;;  %v1455_v39 = vsel %vm1423_vm8, %v4594_v61, %v4126_v11  ;;  %vm2297_vm8 = vmor %vm2295_vm4, %vm2296_vm3 }
 0x1eb   : > { %v2419_v62 = vmul.f32 %v2288_v33, %v4131_v25  ;;  %v2183_v9 = vsel %vm2180_vm2, %v2182_v51, %v2178_v4  ;;  %v2292_v30 = vsub.f32 1.0, %v2291_v43  ;;  %2871 = vpow2.f32 %v2707_v14 }
 0x1ec   : > { %v2412_v19 = vmul.f32 %v2183_v9, %v4135_v50  ;;  %v2868_v55 = vpop.eup %2867  ;;  %2873 = vrcp.f32 %v4224_v29  ;;  %v1488_v50 = vsel %vm1456_vm10, %v1455_v39, %v4159_v22  ;;  %v1513_v42 = vsel %vm1489_vm11, %v1480_v18, %v4148_v7 }
 0x1ed   : > { %2451 = vst [vmem:[%s4198_s9 + $0xc0] sm:$0xff] %v2419_v62  ;;  %v2293_v57 = vmul.f32 %v2864_v47, %v2292_v30  ;;  %v2870_v25 = vpop.eup %2869  ;;  %v2036_v26 = vmul.f32 %v2868_v55, %v4195_v49  ;;  %v1546_v11 = vsel %vm1522_vm12, %v1513_v42, %v4180_v23  ;;  %v2044_v7 = vand.u32 2147483647, %v4195_v49 }
 0x1ee   : > { %2444 = vst [vmem:[%s4198_s9 + $0x88] sm:$0xff] %v2412_v19  ;;  %v4241_v20 = vadd.f32 1.0, %v2870_v25  ;;  %vm2041_vm6 = vweird.f32 %v2868_v55  ;;  %v1521_v56 = vsel %vm1489_vm11, %v1488_v50, %v1234_v0  ;;  %vm2040_vm7 = vweird.f32 %v4195_v49 }
 0x1ef   : > { %v2294_v16 = vadd.f32 %v2864_v47, %v2293_v57  ;;  %v1297_v27 = vpop.permute.xlu0 %1296  ;;  %v2037_v60 = vsub.f32 1.0, %v2036_v26  ;;  %vm2042_vm9 = vmor %vm2040_vm7, %vm2041_vm6  ;;  %v2047_v32 = vor.u32 1.1754944e-38, %v2046_v37  ;;  %vm2045_vm0 = vcmp.eq.f32.partialorder %v2044_v7, 8.507059e+37  ;;  %v4595_v7 = vld [vmem:[#allocation13_spill] sm:$0xff] }
 0x1f0   : > { %v1579_v6 = vsel %vm1555_vm13, %v1546_v11, %v1297_v27  ;;  %2875 = vrcp.f32 %v4241_v20  ;;  %v1554_v35 = vsel %vm1522_vm12, %v1521_v56, %v4171_v24  ;;  %v1924_v17 = vand.u32 2147483647, %v4224_v29  ;;  %v1246_v9 = vpop.permute.xlu2 %1245 }
 0x1f1   : > { %v4246_v38 = vpop.permute.xlu1 %1174  ;;  %v2298_v22 = vsel %vm2297_vm8, %v2864_v47, %v2294_v16  ;;  %v2872_v10 = vpop.eup %2871  ;;  %v2038_v23 = vmul.f32 %v2868_v55, %v2037_v60  ;;  %v1612_v2 = vsel %vm1588_vm14, %v1579_v6, %v1332_v48  ;;  %v1926_v0 = vand.u32 2147483648, %v4224_v29 }
 0x1f2   : > { %v2303_v5 = vsel %vm2300_vm5, %v2302_v58, %v2298_v22  ;;  %v2874_v63 = vpop.eup %2873  ;;  %v4253_v15 = vadd.f32 1.0, %v2872_v10  ;;  %2701 = vmatmul.msk.bf16.gmra.mxu2 %vm1661_vm15, %v1612_v2  ;;  %v1587_v47 = vsel %vm1555_vm13, %v1554_v35, %v4215_v12  ;;  %vm1920_vm2 = vweird.f32 %v4224_v29 }
 0x1f3   : > { %v2420_v34 = vmul.f32 %v2303_v5, %v4151_v52  ;;  %v1916_v21 = vmul.f32 %v2874_v63, %v4224_v29  ;;  %v2039_v53 = vadd.f32 %v2868_v55, %v2038_v23  ;;  %vm1921_vm1 = vweird.f32 %v2874_v63 }
 0x1f4   : > { %2877 = vrcp.f32 %v4253_v15  ;;  %vm1922_vm3 = vmor %vm1920_vm2, %vm1921_vm1  ;;  %vm1925_vm4 = vcmp.eq.f32.partialorder %v1924_v17, 8.507059e+37  ;;  %v1927_v12 = vor.u32 1.1754944e-38, %v1926_v0  ;;  %v2059_v48 = vand.u32 2147483647, %v4241_v20 }
 0x1f5   : > { %2452 = vst [vmem:[%s4198_s9 + $0xc8] sm:$0xff] %v2420_v34  ;;  %v1917_v54 = vsub.f32 1.0, %v1916_v21  ;;  %v2043_v52 = vsel %vm2042_vm9, %v2868_v55, %v2039_v53  ;;  %vm2055_vm5 = vweird.f32 %v4241_v20  ;;  %v1941_v55 = vand.u32 2147483648, %v4253_v15 }
 0x1f6   : > { %v2876_v59 = vpop.eup %2875  ;;  %v2048_v49 = vsel %vm2045_vm0, %v2047_v32, %v2043_v52  ;;  %vm2060_vm7 = vcmp.eq.f32.partialorder %v2059_v48, 8.507059e+37  ;;  %vm1935_vm0 = vweird.f32 %v4253_v15  ;;  %v1472_v37 = vsel %vm1456_vm10, %v4595_v7, %v4259_v44  ;;  %v4596_v44 = vld [vmem:[#allocation7_spill] sm:$0xff] }
 0x1f7   : > { %v1340_v13 = vpop.permute.xlu0 %1339  ;;  %v1918_v31 = vmul.f32 %v2874_v63, %v1917_v54  ;;  %v2403_v36 = vmul.f32 %v2048_v49, %v4165_v40  ;;  %v2051_v51 = vmul.f32 %v2876_v59, %v4241_v20  ;;  %v2061_v40 = vand.u32 2147483648, %v4241_v20 }
 0x1f8   : > { %v1620_v8 = vsel %vm1588_vm14, %v1587_v47, %v1340_v13  ;;  %vm2056_vm8 = vweird.f32 %v2876_v59  ;;  %v1942_v27 = vor.u32 1.1754944e-38, %v1941_v55  ;;  %v1289_v5 = vpop.permute.xlu2 %1288  ;;  %v1464_v32 = vsel %vm1456_vm10, %v4596_v44, %v4246_v38 }
 0x1f9   : > { %v1218_v43 = vpop.permute.xlu1 %1217  ;;  %v1919_v24 = vadd.f32 %v2874_v63, %v1918_v31  ;;  %2435 = vst [vmem:[%s4198_s9 + $0x40] sm:$0xff] %v2403_v36  ;;  %v2052_v33 = vsub.f32 1.0, %v2051_v51  ;;  %2705 = vmatmul.msk.bf16.gmra.mxu3 %vm1661_vm15, %v1620_v8  ;;  %vm2057_vm6 = vmor %vm2055_vm5, %vm2056_vm8  ;;  %v2062_v61 = vor.u32 1.1754944e-38, %v2061_v40 }
 0x1fa   : > { %v2878_v4 = vpop.eup %2877  ;;  %v1505_v23 = vsel %vm1489_vm11, %v1472_v37, %v1218_v43 }
 0x1fb   : > { %v1923_v18 = vsel %vm1922_vm3, %v2874_v63, %v1919_v24  ;;  %v1931_v14 = vmul.f32 %v2878_v4, %v4253_v15  ;;  %v2053_v62 = vmul.f32 %v2876_v59, %v2052_v33  ;;  %vm1936_vm9 = vweird.f32 %v2878_v4 }
 0x1fc   : > { %v1928_v30 = vsel %vm1925_vm4, %v1927_v12, %v1923_v18  ;;  %vm1937_vm1 = vmor %vm1935_vm0, %vm1936_vm9 }
 0x1fd   : > { %v2395_v29 = vmul.f32 %v1928_v30, %v4174_v1  ;;  %v1932_v19 = vsub.f32 1.0, %v1931_v14  ;;  %v2054_v28 = vadd.f32 %v2876_v59, %v2053_v62  ;;  %v1939_v1 = vand.u32 2147483647, %v4253_v15 }
 0x1fe   : > { %v1772_v45 = vpop.f32.mrf.mxu3 }
 0x1ff   : > { %v1210_v39 = vpop.permute.xlu0 %1209  ;;  %v4282_v57 = vadd.f32 %v4120_v41, %v1772_v45  ;;  %2427 = vst [vmem:[%s4198_s9] sm:$0xff] %v2395_v29  ;;  %v1933_v25 = vmul.f32 %v2878_v4, %v1932_v19  ;;  %v2058_v26 = vsel %vm2057_vm6, %v2876_v59, %v2054_v28  ;;  %vm1940_vm2 = vcmp.eq.f32.partialorder %v1939_v1, 8.507059e+37 }
 0x200   : > { %v2063_v42 = vsel %vm2060_vm7, %v2062_v61, %v2058_v26  ;;  %v1497_v35 = vsel %vm1489_vm11, %v1464_v32, %v1210_v39 }
 0x201   : > { %v1281_v50 = vpop.permute.xlu1 %1280  ;;  %v2732_v16 = vmul.f32 -1.442695, %v4282_v57  ;;  %v1934_v20 = vadd.f32 %v2878_v4, %v1933_v25  ;;  %v2404_v11 = vmul.f32 %v2063_v42, %v4186_v46  ;;  %v1530_v0 = vsel %vm1522_vm12, %v1497_v35, %v1246_v9 }
 0x202   : > { %v1563_v47 = vsel %vm1555_vm13, %v1530_v0, %v1281_v50 }
 0x203   : > { %2879 = vpow2.f32 %v2732_v16  ;;  %v1938_v58 = vsel %vm1937_vm1, %v2878_v4, %v1934_v20  ;;  %2436 = vst [vmem:[%s4198_s9 + $0x48] sm:$0xff] %v2404_v11 }
 0x204   : > { %v1752_v60 = vpop.f32.mrf.mxu2  ;;  %v1943_v6 = vsel %vm1940_vm2, %v1942_v27, %v1938_v58 }
 0x205   : > { %v4291_v22 = vadd.f32 %v4120_v41, %v1752_v60  ;;  %v2396_v10 = vmul.f32 %v1943_v6, %v4213_v3 }
 0x206   : > { %v1774_v46 = vpop.f32.mrf.mxu3 }
 0x207   : > { %v2724_v2 = vmul.f32 -1.442695, %v4291_v22  ;;  %v1254_v63 = vpop.permute.xlu0 %1253  ;;  %v4300_v34 = vadd.f32 %v4120_v41, %v1774_v46  ;;  %2428 = vst [vmem:[%s4198_s9 + $0x8] sm:$0xff] %v2396_v10 }
 0x208   : > { %v1538_v15 = vsel %vm1522_vm12, %v1505_v23, %v1254_v63 }
 0x209   : > { %v1324_v56 = vpop.permute.xlu1 %1323  ;;  %v2880_v21 = vpop.eup %2879  ;;  %2881 = vpow2.f32 %v2724_v2  ;;  %v1571_v53 = vsel %vm1555_vm13, %v1538_v15, %v1289_v5  ;;  %v2733_v3 = vmul.f32 -1.442695, %v4300_v34 }
 0x20a   : > { %v1909_v54 = vadd.f32 1.0, %v2880_v21  ;;  %v1604_v52 = vsel %vm1588_vm14, %v1571_v53, %v1324_v56 }
 0x20b   : > { %2883 = vpow2.f32 %v2733_v3  ;;  %2697 = vmatmul.msk.bf16.gmra.mxu1 %vm1661_vm15, %v1604_v52 }
 0x20c   : > { %2885 = vrcp.f32 %v1909_v54  ;;  %v1754_v59 = vpop.f32.mrf.mxu2  ;;  %v2316_v40 = vand.u32 2147483648, %v1909_v54  ;;  %v2314_v62 = vand.u32 2147483647, %v1909_v54  ;;  %vm2310_vm11 = vweird.f32 %v1909_v54 }
 0x20d   : > { %v4313_v17 = vadd.f32 %v4120_v41, %v1754_v59 }
 0x20e   : > { %v2317_v25 = vor.u32 1.1754944e-38, %v2316_v40  ;;  %vm2315_vm13 = vcmp.eq.f32.partialorder %v2314_v62, 8.507059e+37 }
 0x20f   : > { %v2882_v49 = vpop.eup %2881  ;;  %v2725_v38 = vmul.f32 -1.442695, %v4313_v17  ;;  %v1316_v13 = vpop.permute.xlu0 %1315 }
 0x210   : > { %v4318_v31 = vadd.f32 1.0, %v2882_v49  ;;  %v1596_v36 = vsel %vm1588_vm14, %v1563_v47, %v1316_v13  ;;  %v1712_v51 = vpop.f32.mrf.mxu0 }
 0x211   : > { %v2884_v43 = vpop.eup %2883  ;;  %2887 = vpow2.f32 %v2725_v38  ;;  %2693 = vmatmul.msk.bf16.gmra.mxu0 %vm1661_vm15, %v1596_v36  ;;  %v4323_v8 = vadd.f32 %v4120_v41, %v1712_v51 }
 0x212   : > { %v2886_v24 = vpop.eup %2885  ;;  %2889 = vrcp.f32 %v4318_v31  ;;  %v4326_v4 = vadd.f32 1.0, %v2884_v43  ;;  %v2196_v39 = vand.u32 2147483648, %v4318_v31  ;;  %v2194_v20 = vand.u32 2147483647, %v4318_v31 }
 0x213   : > { %v2306_v33 = vmul.f32 %v2886_v24, %v1909_v54  ;;  %v2708_v12 = vmul.f32 -1.442695, %v4323_v8  ;;  %vm2311_vm10 = vweird.f32 %v2886_v24  ;;  %vm2190_vm15 = vweird.f32 %v4318_v31 }
 0x214   : > { %2891 = vrcp.f32 %v4326_v4  ;;  %vm2312_vm12 = vmor %vm2310_vm11, %vm2311_vm10  ;;  %v2197_v37 = vor.u32 1.1754944e-38, %v2196_v39  ;;  %v2329_v46 = vand.u32 2147483647, %v4326_v4  ;;  %v2331_v23 = vand.u32 2147483648, %v4326_v4 }
 0x215   : > { %v2307_v48 = vsub.f32 1.0, %v2306_v33  ;;  %2893 = vpow2.f32 %v2708_v12  ;;  %vm2195_vm8 = vcmp.eq.f32.partialorder %v2194_v20, 8.507059e+37  ;;  %vm2325_vm5 = vweird.f32 %v4326_v4 }
 0x216   : > { %vm2330_vm7 = vcmp.eq.f32.partialorder %v2329_v46, 8.507059e+37  ;;  %v2332_v52 = vor.u32 1.1754944e-38, %v2331_v23 }
 0x217   : > { %v2888_v18 = vpop.eup %2887  ;;  %v2308_v14 = vmul.f32 %v2886_v24, %v2307_v48  ;;  %v1732_v9 = vpop.f32.mrf.mxu1 }
 0x218   : > { %v2890_v30 = vpop.eup %2889  ;;  %v4330_v29 = vadd.f32 1.0, %v2888_v18  ;;  %v4333_v19 = vadd.f32 %v4120_v41, %v1732_v9  ;;  %v1714_v28 = vpop.f32.mrf.mxu0 }
 0x219   : > { %v2186_v45 = vmul.f32 %v2890_v30, %v4318_v31  ;;  %v2309_v55 = vadd.f32 %v2886_v24, %v2308_v14  ;;  %v4337_v61 = vadd.f32 %v4120_v41, %v1714_v28  ;;  %vm2191_vm14 = vweird.f32 %v2890_v30 }
 0x21a   : > { %2895 = vrcp.f32 %v4330_v29  ;;  %v2892_v1 = vpop.eup %2891  ;;  %v2716_v42 = vmul.f32 -1.442695, %v4333_v19  ;;  %vm2192_vm3 = vmor %vm2190_vm15, %vm2191_vm14  ;;  %v2209_v59 = vand.u32 2147483647, %v4330_v29  ;;  %v2211_v0 = vand.u32 2147483648, %v4330_v29 }
 0x21b   : > { %v2187_v26 = vsub.f32 1.0, %v2186_v45  ;;  %v2313_v50 = vsel %vm2312_vm12, %v2886_v24, %v2309_v55  ;;  %v2894_v16 = vpop.eup %2893  ;;  %v2321_v27 = vmul.f32 %v2892_v1, %v4326_v4  ;;  %v2709_v58 = vmul.f32 -1.442695, %v4337_v61 }
 0x21c   : > { %v2318_v11 = vsel %vm2315_vm13, %v2317_v25, %v2313_v50  ;;  %v4346_v7 = vadd.f32 1.0, %v2894_v16  ;;  %2897 = vpow2.f32 %v2716_v42  ;;  %vm2326_vm4 = vweird.f32 %v2892_v1 }
 0x21d   : > { %v2188_v60 = vmul.f32 %v2890_v30, %v2187_v26  ;;  %v2421_v6 = vmul.f32 %v2318_v11, %v4282_v57  ;;  %v2322_v10 = vsub.f32 1.0, %v2321_v27  ;;  %vm2327_vm6 = vmor %vm2325_vm5, %vm2326_vm4  ;;  %vm2205_vm0 = vweird.f32 %v4330_v29 }
 0x21e   : > { %2899 = vrcp.f32 %v4346_v7  ;;  %v2212_v24 = vor.u32 1.1754944e-38, %v2211_v0  ;;  %vm2210_vm2 = vcmp.eq.f32.partialorder %v2209_v59, 8.507059e+37  ;;  %v1954_v48 = vand.u32 2147483647, %v4346_v7 }
 0x21f   : > { %v2189_v5 = vadd.f32 %v2890_v30, %v2188_v60  ;;  %2453 = vst [vmem:[%s4198_s9 + $0xd0] sm:$0xff] %v2421_v6  ;;  %v1734_v2 = vpop.f32.mrf.mxu1  ;;  %v2323_v15 = vmul.f32 %v2892_v1, %v2322_v10  ;;  %2901 = vpow2.f32 %v2709_v58  ;;  %v1956_v40 = vand.u32 2147483648, %v4346_v7 }
 0x220   : > { %v2896_v63 = vpop.eup %2895  ;;  %v4354_v57 = vadd.f32 %v4120_v41, %v1734_v2  ;;  %vm1950_vm11 = vweird.f32 %v4346_v7  ;;  %vm1955_vm13 = vcmp.eq.f32.partialorder %v1954_v48, 8.507059e+37 }
 0x221   : > { %v2193_v56 = vsel %vm2192_vm3, %v2890_v30, %v2189_v5  ;;  %v2201_v21 = vmul.f32 %v2896_v63, %v4330_v29  ;;  %v2324_v3 = vadd.f32 %v2892_v1, %v2323_v15  ;;  %vm2206_vm9 = vweird.f32 %v2896_v63 }
 0x222   : > { %v2198_v53 = vsel %vm2195_vm8, %v2197_v37, %v2193_v56  ;;  %v2717_v44 = vmul.f32 -1.442695, %v4354_v57  ;;  %v2898_v35 = vpop.eup %2897  ;;  %vm2207_vm1 = vmor %vm2205_vm0, %vm2206_vm9  ;;  %v1957_v28 = vor.u32 1.1754944e-38, %v1956_v40 }
 0x223   : > { %v2413_v32 = vmul.f32 %v2198_v53, %v4291_v22  ;;  %v2202_v54 = vsub.f32 1.0, %v2201_v21  ;;  %v2328_v49 = vsel %vm2327_vm6, %v2892_v1, %v2324_v3  ;;  %v1893_v31 = vadd.f32 1.0, %v2898_v35 }
 0x224   : > { %2903 = vpow2.f32 %v2717_v44  ;;  %v2900_v47 = vpop.eup %2899  ;;  %v2333_v13 = vsel %vm2330_vm7, %v2332_v52, %v2328_v49 }
 0x225   : > { %2445 = vst [vmem:[%s4198_s9 + $0x90] sm:$0xff] %v2413_v32  ;;  %v2203_v38 = vmul.f32 %v2896_v63, %v2202_v54  ;;  %v2902_v36 = vpop.eup %2901  ;;  %v2422_v22 = vmul.f32 %v2333_v13, %v4300_v34  ;;  %v1946_v51 = vmul.f32 %v2900_v47, %v4346_v7  ;;  %2905 = vrcp.f32 %v1893_v31 }
 0x226   : > { %v1886_v4 = vadd.f32 1.0, %v2902_v36  ;;  %vm1951_vm10 = vweird.f32 %v2900_v47  ;;  %v2076_v50 = vand.u32 2147483648, %v1893_v31  ;;  %v2074_v16 = vand.u32 2147483647, %v1893_v31 }
 0x227   : > { %v2204_v43 = vadd.f32 %v2896_v63, %v2203_v38  ;;  %2454 = vst [vmem:[%s4198_s9 + $0xd8] sm:$0xff] %v2422_v22  ;;  %v1947_v33 = vsub.f32 1.0, %v1946_v51  ;;  %vm1952_vm12 = vmor %vm1950_vm11, %vm1951_vm10  ;;  %vm2070_vm15 = vweird.f32 %v1893_v31 }
 0x228   : > { %2907 = vrcp.f32 %v1886_v4  ;;  %v1969_v20 = vand.u32 2147483647, %v1886_v4  ;;  %v1971_v60 = vand.u32 2147483648, %v1886_v4  ;;  %v2077_v6 = vor.u32 1.1754944e-38, %v2076_v50 }
 0x229   : > { %v2208_v12 = vsel %vm2207_vm1, %v2896_v63, %v2204_v43  ;;  %v1948_v14 = vmul.f32 %v2900_v47, %v1947_v33  ;;  %vm2075_vm8 = vcmp.eq.f32.partialorder %v2074_v16, 8.507059e+37  ;;  %vm1965_vm5 = vweird.f32 %v1886_v4 }
 0x22a   : > { %v2904_v18 = vpop.eup %2903  ;;  %v2213_v34 = vsel %vm2210_vm2, %v2212_v24, %v2208_v12  ;;  %vm4374_vm6 = vcmp.eq.f32.partialorder %v1969_v20, 8.507059e+37  ;;  %v1972_v56 = vor.u32 1.1754944e-38, %v1971_v60 }
 0x22b   : > { %v2414_v62 = vmul.f32 %v2213_v34, %v4313_v17  ;;  %v1949_v9 = vadd.f32 %v2900_v47, %v1948_v14  ;;  %v1894_v30 = vadd.f32 1.0, %v2904_v18  ;;  %v2906_v29 = vpop.eup %2905 }
 0x22c   : > { %v2066_v55 = vmul.f32 %v2906_v29, %v1893_v31  ;;  %vm2071_vm14 = vweird.f32 %v2906_v29 }
 0x22d   : > { %2446 = vst [vmem:[%s4198_s9 + $0x98] sm:$0xff] %v2414_v62  ;;  %v1953_v45 = vsel %vm1952_vm12, %v2900_v47, %v1949_v9  ;;  %2909 = vrcp.f32 %v1894_v30  ;;  %vm2072_vm3 = vmor %vm2070_vm15, %vm2071_vm14  ;;  %v2089_v21 = vand.u32 2147483647, %v1894_v30  ;;  %v2091_v53 = vand.u32 2147483648, %v1894_v30 }
 0x22e   : > { %v1958_v39 = vsel %vm1955_vm13, %v1957_v28, %v1953_v45  ;;  %v2908_v25 = vpop.eup %2907  ;;  %v2067_v26 = vsub.f32 1.0, %v2066_v55  ;;  %vm2085_vm0 = vweird.f32 %v1894_v30 }
 0x22f   : > { %v2397_v1 = vmul.f32 %v1958_v39, %v4323_v8  ;;  %v1961_v17 = vmul.f32 %v2908_v25, %v1886_v4  ;;  %vm1966_vm4 = vweird.f32 %v2908_v25  ;;  %vm2090_vm2 = vcmp.eq.f32.partialorder %v2089_v21, 8.507059e+37 }
 0x230   : > { %v2068_v42 = vmul.f32 %v2906_v29, %v2067_v26  ;;  %vm1967_vm7 = vmor %vm1965_vm5, %vm1966_vm4 }
 0x231   : > { %2429 = vst [vmem:[%s4198_s9 + $0x10] sm:$0xff] %v2397_v1  ;;  %v1962_v11 = vsub.f32 1.0, %v1961_v17 }
 0x232   : > { %v2069_v58 = vadd.f32 %v2906_v29, %v2068_v42 }
 0x233   : > { %v2910_v27 = vpop.eup %2909  ;;  %v1963_v7 = vmul.f32 %v2908_v25, %v1962_v11 }
 0x234   : > { %v2081_v37 = vmul.f32 %v2910_v27, %v1894_v30  ;;  %v2073_v10 = vsel %vm2072_vm3, %v2906_v29, %v2069_v58  ;;  %vm2086_vm9 = vweird.f32 %v2910_v27 }
 0x235   : > { %v2078_v46 = vsel %vm2075_vm8, %v2077_v6, %v2073_v10  ;;  %v1964_v23 = vadd.f32 %v2908_v25, %v1963_v7  ;;  %vm2087_vm1 = vmor %vm2085_vm0, %vm2086_vm9 }
 0x236   : > { %v1757_v5 = vpop.f32.mrf.mxu2  ;;  %v2082_v2 = vsub.f32 1.0, %v2081_v37  ;;  %v2405_v15 = vmul.f32 %v2078_v46, %v4333_v19  ;;  %v2092_v19 = vor.u32 1.1754944e-38, %v2091_v53 }
 0x237   : > { %v4379_v63 = vadd.f32 %v4120_v41, %v1757_v5  ;;  %v1968_v3 = vsel %vm1967_vm7, %v2908_v25, %v1964_v23 }
 0x238   : > { %v2083_v44 = vmul.f32 %v2910_v27, %v2082_v2  ;;  %2437 = vst [vmem:[%s4198_s9 + $0x50] sm:$0xff] %v2405_v15  ;;  %v1973_v54 = vsel %vm4374_vm6, %v1972_v56, %v1968_v3 }
 0x239   : > { %v2726_v32 = vmul.f32 -1.442695, %v4379_v63  ;;  %v2398_v52 = vmul.f32 %v1973_v54, %v4337_v61 }
 0x23a   : > { %v2084_v35 = vadd.f32 %v2910_v27, %v2083_v44 }
 0x23b   : > { %2911 = vpow2.f32 %v2726_v32  ;;  %2430 = vst [vmem:[%s4198_s9 + $0x18] sm:$0xff] %v2398_v52 }
 0x23c   : > { %v2088_v59 = vsel %vm2087_vm1, %v2910_v27, %v2084_v35 }
 0x23d   : > { %v1777_v0 = vpop.f32.mrf.mxu3  ;;  %v2093_v49 = vsel %vm2090_vm2, %v2092_v19, %v2088_v59 }
 0x23e   : > { %v4389_v47 = vadd.f32 %v4120_v41, %v1777_v0  ;;  %v1759_v38 = vpop.f32.mrf.mxu2  ;;  %v2406_v13 = vmul.f32 %v2093_v49, %v4354_v57 }
 0x23f   : > { %v4393_v31 = vadd.f32 %v4120_v41, %v1759_v38 }
 0x240   : > { %v2734_v61 = vmul.f32 -1.442695, %v4389_v47  ;;  %2438 = vst [vmem:[%s4198_s9 + $0x58] sm:$0xff] %v2406_v13 }
 0x241   : > { %v2912_v36 = vpop.eup %2911  ;;  %v2727_v22 = vmul.f32 -1.442695, %v4393_v31 }
 0x242   : > { %v1903_v51 = vadd.f32 1.0, %v2912_v36  ;;  %2913 = vpow2.f32 %v2734_v61 }
 0x243   : > { %2915 = vpow2.f32 %v2727_v22 }
 0x244   : > { %2917 = vrcp.f32 %v1903_v51  ;;  %v2226_v14 = vand.u32 2147483648, %v1903_v51  ;;  %v2224_v9 = vand.u32 2147483647, %v1903_v51  ;;  %vm2220_vm11 = vweird.f32 %v1903_v51 }
 0x245   : > { %v1779_v43 = vpop.f32.mrf.mxu3 }
 0x246   : > { %v4399_v24 = vadd.f32 %v4120_v41, %v1779_v43  ;;  %v2227_v1 = vor.u32 1.1754944e-38, %v2226_v14  ;;  %vm2225_vm13 = vcmp.eq.f32.partialorder %v2224_v9, 8.507059e+37 }
 0x248   : > { %v2914_v33 = vpop.eup %2913  ;;  %v2735_v57 = vmul.f32 -1.442695, %v4399_v24 }
 0x249   : > { %v2916_v4 = vpop.eup %2915  ;;  %v1911_v12 = vadd.f32 1.0, %v2914_v33 }
 0x24a   : > { %v2918_v48 = vpop.eup %2917  ;;  %v1904_v40 = vadd.f32 1.0, %v2916_v4  ;;  %2919 = vpow2.f32 %v2735_v57 }
 0x24b   : > { %v2216_v18 = vmul.f32 %v2918_v48, %v1903_v51  ;;  %2921 = vrcp.f32 %v1911_v12  ;;  %vm2221_vm10 = vweird.f32 %v2918_v48  ;;  %v2344_v11 = vand.u32 2147483647, %v1911_v12 }
 0x24c   : > { %2923 = vrcp.f32 %v1904_v40  ;;  %vm2222_vm12 = vmor %vm2220_vm11, %vm2221_vm10  ;;  %v2346_v58 = vand.u32 2147483648, %v1911_v12  ;;  %v2241_v7 = vand.u32 2147483648, %v1904_v40  ;;  %v2239_v8 = vand.u32 2147483647, %v1904_v40 }
 0x24d   : > { %v2217_v34 = vsub.f32 1.0, %v2216_v18  ;;  %vm2340_vm3 = vweird.f32 %v1911_v12  ;;  %vm2235_vm4 = vweird.f32 %v1904_v40  ;;  %vm2345_vm5 = vcmp.eq.f32.partialorder %v2344_v11, 8.507059e+37 }
 0x24e   : > { %v2347_v15 = vor.u32 1.1754944e-38, %v2346_v58  ;;  %v2242_v3 = vor.u32 1.1754944e-38, %v2241_v7  ;;  %vm2240_vm7 = vcmp.eq.f32.partialorder %v2239_v8, 8.507059e+37 }
 0x24f   : > { %v2218_v62 = vmul.f32 %v2918_v48, %v2217_v34  ;;  %v1717_v30 = vpop.f32.mrf.mxu0 }
 0x250   : > { %v2920_v29 = vpop.eup %2919  ;;  %v4403_v28 = vadd.f32 %v4120_v41, %v1717_v30 }
 0x251   : > { %v2922_v45 = vpop.eup %2921  ;;  %v2219_v55 = vadd.f32 %v2918_v48, %v2218_v62  ;;  %v4405_v39 = vadd.f32 1.0, %v2920_v29 }
 0x252   : > { %v2924_v25 = vpop.eup %2923  ;;  %v2336_v26 = vmul.f32 %v2922_v45, %v1911_v12  ;;  %v2710_v50 = vmul.f32 -1.442695, %v4403_v28  ;;  %vm2341_vm14 = vweird.f32 %v2922_v45 }
 0x253   : > { %v2223_v17 = vsel %vm2222_vm12, %v2918_v48, %v2219_v55  ;;  %v2231_v42 = vmul.f32 %v2924_v25, %v1904_v40  ;;  %2925 = vrcp.f32 %v4405_v39  ;;  %vm2236_vm15 = vweird.f32 %v2924_v25  ;;  %vm2342_vm8 = vmor %vm2340_vm3, %vm2341_vm14 }
 0x254   : > { %v2228_v16 = vsel %vm2225_vm13, %v2227_v1, %v2223_v17  ;;  %v2337_v20 = vsub.f32 1.0, %v2336_v26  ;;  %2927 = vpow2.f32 %v2710_v50  ;;  %vm2237_vm6 = vmor %vm2235_vm4, %vm2236_vm15  ;;  %v2361_v38 = vand.u32 2147483648, %v4405_v39 }
 0x255   : > { %v2415_v27 = vmul.f32 %v2228_v16, %v4379_v63  ;;  %v2232_v60 = vsub.f32 1.0, %v2231_v42  ;;  %v2359_v61 = vand.u32 2147483647, %v4405_v39  ;;  %vm2355_vm0 = vweird.f32 %v4405_v39 }
 0x256   : > { %v2338_v6 = vmul.f32 %v2922_v45, %v2337_v20  ;;  %v1737_v37 = vpop.f32.mrf.mxu1  ;;  %v2362_v43 = vor.u32 1.1754944e-38, %v2361_v38 }
 0x257   : > { %2447 = vst [vmem:[%s4198_s9 + $0xa0] sm:$0xff] %v2415_v27  ;;  %v2233_v10 = vmul.f32 %v2924_v25, %v2232_v60  ;;  %v4412_v5 = vadd.f32 %v4120_v41, %v1737_v37  ;;  %v1719_v46 = vpop.f32.mrf.mxu0  ;;  %vm2360_vm2 = vcmp.eq.f32.partialorder %v2359_v61, 8.507059e+37 }
 0x258   : > { %v2339_v23 = vadd.f32 %v2922_v45, %v2338_v6  ;;  %v4415_v2 = vadd.f32 %v4120_v41, %v1719_v46 }
 0x259   : > { %v2926_v63 = vpop.eup %2925  ;;  %v2234_v56 = vadd.f32 %v2924_v25, %v2233_v10  ;;  %v2718_v21 = vmul.f32 -1.442695, %v4412_v5 }
 0x25a   : > { %v2343_v53 = vsel %vm2342_vm8, %v2922_v45, %v2339_v23  ;;  %v2351_v44 = vmul.f32 %v2926_v63, %v4405_v39  ;;  %v2711_v32 = vmul.f32 -1.442695, %v4415_v2  ;;  %v2928_v54 = vpop.eup %2927  ;;  %vm2356_vm9 = vweird.f32 %v2926_v63 }
 0x25b   : > { %v2348_v52 = vsel %vm2345_vm5, %v2347_v15, %v2343_v53  ;;  %v2238_v41 = vsel %vm2237_vm6, %v2924_v25, %v2234_v56  ;;  %2929 = vpow2.f32 %v2718_v21  ;;  %v1887_v0 = vadd.f32 1.0, %v2928_v54  ;;  %vm2357_vm1 = vmor %vm2355_vm0, %vm2356_vm9 }
 0x25c   : > { %v2423_v35 = vmul.f32 %v2348_v52, %v4389_v47  ;;  %v2243_v19 = vsel %vm2240_vm7, %v2242_v3, %v2238_v41  ;;  %v2352_v59 = vsub.f32 1.0, %v2351_v44  ;;  %2931 = vpow2.f32 %v2711_v32  ;;  %v4430_v47 = vld [vmem:[%s4565_s2] ss:$0 sm:$0xff] }
 0x25d   : > { %v2416_v49 = vmul.f32 %v2243_v19, %v4393_v31  ;;  %2933 = vrcp.f32 %v1887_v0  ;;  %v1986_v9 = vand.u32 2147483648, %v1887_v0  ;;  %v1984_v45 = vand.u32 2147483647, %v1887_v0 }
 0x25e   : > { %2455 = vst [vmem:[%s4198_s9 + $0xe0] sm:$0xff] %v2423_v35  ;;  %v2353_v13 = vmul.f32 %v2926_v63, %v2352_v59  ;;  %v1739_v36 = vpop.f32.mrf.mxu1  ;;  %vm1980_vm11 = vweird.f32 %v1887_v0 }
 0x25f   : > { %2448 = vst [vmem:[%s4198_s9 + $0xa8] sm:$0xff] %v2416_v49  ;;  %v4433_v22 = vadd.f32 %v4430_v47, %v1739_v36  ;;  %v1987_v26 = vor.u32 1.1754944e-38, %v1986_v9  ;;  %vm1985_vm13 = vcmp.eq.f32.partialorder %v1984_v45, 8.507059e+37 }
 0x260   : > { %v2354_v31 = vadd.f32 %v2926_v63, %v2353_v13 }
 0x261   : > { %v2930_v51 = vpop.eup %2929  ;;  %v2719_v33 = vmul.f32 -1.442695, %v4433_v22 }
 0x262   : > { %v2358_v57 = vsel %vm2357_vm1, %v2926_v63, %v2354_v31  ;;  %v1895_v4 = vadd.f32 1.0, %v2930_v51  ;;  %v2932_v12 = vpop.eup %2931 }
 0x263   : > { %v2363_v48 = vsel %vm2360_vm2, %v2362_v43, %v2358_v57  ;;  %2935 = vpow2.f32 %v2719_v33  ;;  %v2934_v40 = vpop.eup %2933  ;;  %v1888_v14 = vadd.f32 1.0, %v2932_v12 }
 0x264   : > { %v2424_v18 = vmul.f32 %v2363_v48, %v4399_v24  ;;  %2937 = vrcp.f32 %v1895_v4  ;;  %v1976_v34 = vmul.f32 %v2934_v40, %v1887_v0  ;;  %vm1981_vm10 = vweird.f32 %v2934_v40 }
 0x265   : > { %2939 = vrcp.f32 %v1888_v14  ;;  %vm1982_vm12 = vmor %vm1980_vm11, %vm1981_vm10  ;;  %v2106_v16 = vand.u32 2147483648, %v1895_v4  ;;  %v2104_v58 = vand.u32 2147483647, %v1895_v4  ;;  %vm2100_vm15 = vweird.f32 %v1895_v4 }
 0x266   : > { %2456 = vst [vmem:[%s4198_s9 + $0xe8] sm:$0xff] %v2424_v18  ;;  %v1977_v62 = vsub.f32 1.0, %v1976_v34  ;;  %v2001_v7 = vand.u32 2147483648, %v1888_v14  ;;  %v1999_v46 = vand.u32 2147483647, %v1888_v14  ;;  %vm1995_vm5 = vweird.f32 %v1888_v14 }
 0x267   : > { %v2107_v10 = vor.u32 1.1754944e-38, %v2106_v16  ;;  %vm2105_vm8 = vcmp.eq.f32.partialorder %v2104_v58, 8.507059e+37 }
 0x268   : > { %v1978_v29 = vmul.f32 %v2934_v40, %v1977_v62  ;;  %v2002_v21 = vor.u32 1.1754944e-38, %v2001_v7  ;;  %vm2000_vm7 = vcmp.eq.f32.partialorder %v1999_v46, 8.507059e+37 }
 0x269   : > { %v2936_v30 = vpop.eup %2935 }
 0x26a   : > { %v2938_v55 = vpop.eup %2937  ;;  %v1896_v39 = vadd.f32 1.0, %v2936_v30  ;;  %v1979_v25 = vadd.f32 %v2934_v40, %v1978_v29 }
 0x26b   : > { %v2096_v1 = vmul.f32 %v2938_v55, %v1895_v4  ;;  %v2940_v24 = vpop.eup %2939  ;;  %vm2101_vm14 = vweird.f32 %v2938_v55 }
 0x26c   : > { %2941 = vrcp.f32 %v1896_v39  ;;  %v1983_v50 = vsel %vm1982_vm12, %v2934_v40, %v1979_v25  ;;  %v1991_v20 = vmul.f32 %v2940_v24, %v1888_v14  ;;  %vm2102_vm3 = vmor %vm2100_vm15, %vm2101_vm14  ;;  %vm1996_vm4 = vweird.f32 %v2940_v24 }
 0x26d   : > { %v2097_v17 = vsub.f32 1.0, %v2096_v1  ;;  %v1988_v42 = vsel %vm1985_vm13, %v1987_v26, %v1983_v50  ;;  %vm1997_vm6 = vmor %vm1995_vm5, %vm1996_vm4  ;;  %v2119_v44 = vand.u32 2147483647, %v1896_v39  ;;  %v2121_v32 = vand.u32 2147483648, %v1896_v39 }
 0x26e   : > { %v2399_v11 = vmul.f32 %v1988_v42, %v4403_v28  ;;  %v1992_v60 = vsub.f32 1.0, %v1991_v20  ;;  %vm2115_vm0 = vweird.f32 %v1896_v39 }
 0x26f   : > { %v2098_v27 = vmul.f32 %v2938_v55, %v2097_v17  ;;  %v2122_v0 = vor.u32 1.1754944e-38, %v2121_v32  ;;  %vm2120_vm2 = vcmp.eq.f32.partialorder %v2119_v44, 8.507059e+37 }
 0x270   : > { %2431 = vst [vmem:[%s4198_s9 + $0x20] sm:$0xff] %v2399_v11  ;;  %v1993_v8 = vmul.f32 %v2940_v24, %v1992_v60 }
 0x271   : > { %v2099_v6 = vadd.f32 %v2938_v55, %v2098_v27 }
 0x272   : > { %v2942_v37 = vpop.eup %2941  ;;  %v1994_v28 = vadd.f32 %v2940_v24, %v1993_v8 }
 0x273   : > { %v2103_v23 = vsel %vm2102_vm3, %v2938_v55, %v2099_v6  ;;  %v2111_v63 = vmul.f32 %v2942_v37, %v1896_v39  ;;  %vm2116_vm9 = vweird.f32 %v2942_v37 }
 0x274   : > { %v2108_v15 = vsel %vm2105_vm8, %v2107_v10, %v2103_v23  ;;  %v1998_v3 = vsel %vm1997_vm6, %v2940_v24, %v1994_v28  ;;  %vm2117_vm1 = vmor %vm2115_vm0, %vm2116_vm9 }
 0x275   : > { %v2407_v56 = vmul.f32 %v2108_v15, %v4412_v5  ;;  %v2112_v53 = vsub.f32 1.0, %v2111_v63  ;;  %v1762_v54 = vpop.f32.mrf.mxu2  ;;  %v2003_v52 = vsel %vm2000_vm7, %v2002_v21, %v1998_v3 }
 0x276   : > { %v4444_v35 = vadd.f32 %v4430_v47, %v1762_v54  ;;  %v2400_v19 = vmul.f32 %v2003_v52, %v4415_v2 }
 0x277   : > { %2439 = vst [vmem:[%s4198_s9 + $0x60] sm:$0xff] %v2407_v56  ;;  %v2113_v41 = vmul.f32 %v2942_v37, %v2112_v53 }
 0x278   : > { %v2728_v59 = vmul.f32 -1.442695, %v4444_v35  ;;  %2432 = vst [vmem:[%s4198_s9 + $0x28] sm:$0xff] %v2400_v19 }
 0x279   : > { %v2114_v5 = vadd.f32 %v2942_v37, %v2113_v41 }
 0x27a   : > { %2943 = vpow2.f32 %v2728_v59 }
 0x27b   : > { %v2118_v49 = vsel %vm2117_vm1, %v2942_v37, %v2114_v5 }
 0x27c   : > { %v2123_v38 = vsel %vm2120_vm2, %v2122_v0, %v2118_v49  ;;  %v1782_v61 = vpop.f32.mrf.mxu3 }
 0x27d   : > { %v2408_v13 = vmul.f32 %v2123_v38, %v4433_v22  ;;  %v4451_v36 = vadd.f32 %v4430_v47, %v1782_v61  ;;  %v1764_v31 = vpop.f32.mrf.mxu2 }
 0x27e   : > { %v4455_v2 = vadd.f32 %v4430_v47, %v1764_v31 }
 0x27f   : > { %2440 = vst [vmem:[%s4198_s9 + $0x68] sm:$0xff] %v2408_v13  ;;  %v2736_v51 = vmul.f32 -1.442695, %v4451_v36 }
 0x280   : > { %v2944_v43 = vpop.eup %2943  ;;  %v2729_v33 = vmul.f32 -1.442695, %v4455_v2 }
 0x281   : > { %v1905_v57 = vadd.f32 1.0, %v2944_v43  ;;  %2945 = vpow2.f32 %v2736_v51 }
 0x282   : > { %2947 = vpow2.f32 %v2729_v33 }
 0x283   : > { %2949 = vrcp.f32 %v1905_v57  ;;  %v2256_v55 = vand.u32 2147483648, %v1905_v57  ;;  %v2254_v1 = vand.u32 2147483647, %v1905_v57  ;;  %vm2250_vm11 = vweird.f32 %v1905_v57 }
 0x284   : > { %v1784_v4 = vpop.f32.mrf.mxu3 }
 0x285   : > { %v4460_v22 = vadd.f32 %v4430_v47, %v1784_v4  ;;  %v2257_v27 = vor.u32 1.1754944e-38, %v2256_v55  ;;  %vm2255_vm13 = vcmp.eq.f32.partialorder %v2254_v1, 8.507059e+37 }
 0x287   : > { %v2946_v12 = vpop.eup %2945  ;;  %v2737_v48 = vmul.f32 -1.442695, %v4460_v22 }
 0x288   : > { %v1742_v40 = vpop.f32.mrf.mxu1  ;;  %v2948_v18 = vpop.eup %2947  ;;  %v4463_v34 = vadd.f32 1.0, %v2946_v12 }
 0x289   : > { %v4466_v14 = vadd.f32 %v4430_v47, %v1742_v40  ;;  %v2950_v62 = vpop.eup %2949  ;;  %v4468_v9 = vadd.f32 1.0, %v2948_v18  ;;  %2951 = vpow2.f32 %v2737_v48 }
 0x28a   : > { %v2246_v30 = vmul.f32 %v2950_v62, %v1905_v57  ;;  %2953 = vrcp.f32 %v4463_v34  ;;  %vm2251_vm10 = vweird.f32 %v2950_v62  ;;  %v2374_v8 = vand.u32 2147483647, %v4463_v34 }
 0x28b   : > { %2955 = vrcp.f32 %v4468_v9  ;;  %v2720_v45 = vmul.f32 -1.442695, %v4466_v14  ;;  %vm2252_vm12 = vmor %vm2250_vm11, %vm2251_vm10  ;;  %v2376_v46 = vand.u32 2147483648, %v4463_v34  ;;  %v2269_v15 = vand.u32 2147483647, %v4468_v9 }
 0x28c   : > { %v2247_v29 = vsub.f32 1.0, %v2246_v30  ;;  %v2271_v21 = vand.u32 2147483648, %v4468_v9  ;;  %vm2370_vm3 = vweird.f32 %v4463_v34  ;;  %vm2265_vm8 = vweird.f32 %v4468_v9 }
 0x28d   : > { %2957 = vpow2.f32 %v2720_v45  ;;  %vm2375_vm5 = vcmp.eq.f32.partialorder %v2374_v8, 8.507059e+37  ;;  %vm2270_vm7 = vcmp.eq.f32.partialorder %v2269_v15, 8.507059e+37 }
 0x28e   : > { %v1722_v39 = vpop.f32.mrf.mxu0  ;;  %v2248_v25 = vmul.f32 %v2950_v62, %v2247_v29  ;;  %v2272_v59 = vor.u32 1.1754944e-38, %v2271_v21 }
 0x28f   : > { %v4474_v26 = vadd.f32 %v4430_v47, %v1722_v39  ;;  %v2952_v24 = vpop.eup %2951 }
 0x290   : > { %v1744_v50 = vpop.f32.mrf.mxu1  ;;  %v2954_v17 = vpop.eup %2953  ;;  %v2249_v42 = vadd.f32 %v2950_v62, %v2248_v25  ;;  %v4476_v16 = vadd.f32 1.0, %v2952_v24 }
 0x291   : > { %v2712_v20 = vmul.f32 -1.442695, %v4474_v26  ;;  %v2956_v11 = vpop.eup %2955  ;;  %v2366_v58 = vmul.f32 %v2954_v17, %v4463_v34  ;;  %v4481_v60 = vadd.f32 %v4430_v47, %v1744_v50  ;;  %vm2371_vm14 = vweird.f32 %v2954_v17 }
 0x292   : > { %v2253_v6 = vsel %vm2252_vm12, %v2950_v62, %v2249_v42  ;;  %v2261_v7 = vmul.f32 %v2956_v11, %v4468_v9  ;;  %2959 = vrcp.f32 %v4476_v16  ;;  %vm2266_vm15 = vweird.f32 %v2956_v11  ;;  %vm2372_vm4 = vmor %vm2370_vm3, %vm2371_vm14 }
 0x293   : > { %v2258_v37 = vsel %vm2255_vm13, %v2257_v27, %v2253_v6  ;;  %v2367_v10 = vsub.f32 1.0, %v2366_v58  ;;  %2961 = vpow2.f32 %v2712_v20  ;;  %v2958_v28 = vpop.eup %2957  ;;  %v2721_v3 = vmul.f32 -1.442695, %v4481_v60  ;;  %vm2267_vm6 = vmor %vm2265_vm8, %vm2266_vm15 }
 0x294   : > { %v2417_v23 = vmul.f32 %v2258_v37, %v4444_v35  ;;  %v2262_v63 = vsub.f32 1.0, %v2261_v7  ;;  %v4492_v32 = vadd.f32 1.0, %v2958_v28  ;;  %v2377_v35 = vor.u32 1.1754944e-38, %v2376_v46 }
 0x295   : > { %v2368_v56 = vmul.f32 %v2954_v17, %v2367_v10  ;;  %2963 = vpow2.f32 %v2721_v3  ;;  %v2391_v57 = vand.u32 2147483648, %v4476_v16  ;;  %v2389_v48 = vand.u32 2147483647, %v4476_v16 }
 0x296   : > { %v1724_v53 = vpop.f32.mrf.mxu0  ;;  %2449 = vst [vmem:[%s4198_s9 + $0xb0] sm:$0xff] %v2417_v23  ;;  %v2263_v44 = vmul.f32 %v2956_v11, %v2262_v63  ;;  %2965 = vrcp.f32 %v4492_v32  ;;  %vm2385_vm0 = vweird.f32 %v4476_v16  ;;  %v2134_v45 = vand.u32 2147483647, %v4492_v32 }
 0x297   : > { %v4495_v54 = vadd.f32 %v4430_v47, %v1724_v53  ;;  %v2369_v52 = vadd.f32 %v2954_v17, %v2368_v56  ;;  %vm2390_vm2 = vcmp.eq.f32.partialorder %v2389_v48, 8.507059e+37  ;;  %v2136_v55 = vand.u32 2147483648, %v4492_v32 }
 0x298   : > { %v2960_v41 = vpop.eup %2959  ;;  %v2264_v19 = vadd.f32 %v2956_v11, %v2263_v44  ;;  %vm2130_vm11 = vweird.f32 %v4492_v32  ;;  %vm2135_vm13 = vcmp.eq.f32.partialorder %v2134_v45, 8.507059e+37 }
 0x299   : > { %v2373_v5 = vsel %vm2372_vm4, %v2954_v17, %v2369_v52  ;;  %v2381_v47 = vmul.f32 %v2960_v41, %v4476_v16  ;;  %v2962_v0 = vpop.eup %2961  ;;  %v2713_v13 = vmul.f32 -1.442695, %v4495_v54  ;;  %vm2386_vm9 = vweird.f32 %v2960_v41 }
 0x29a   : > { %v2378_v49 = vsel %vm2375_vm5, %v2377_v35, %v2373_v5  ;;  %v2268_v38 = vsel %vm2267_vm6, %v2956_v11, %v2264_v19  ;;  %v1889_v43 = vadd.f32 1.0, %v2962_v0  ;;  %vm2387_vm1 = vmor %vm2385_vm0, %vm2386_vm9  ;;  %v2137_v20 = vor.u32 1.1754944e-38, %v2136_v55 }
 0x29b   : > { %v2425_v61 = vmul.f32 %v2378_v49, %v4451_v36  ;;  %v2273_v31 = vsel %vm2270_vm7, %v2272_v59, %v2268_v38  ;;  %v2382_v51 = vsub.f32 1.0, %v2381_v47  ;;  %2967 = vpow2.f32 %v2713_v13  ;;  %v2964_v4 = vpop.eup %2963 }
 0x29c   : > { %v2418_v33 = vmul.f32 %v2273_v31, %v4455_v2  ;;  %2969 = vrcp.f32 %v1889_v43  ;;  %v2966_v40 = vpop.eup %2965  ;;  %v1898_v18 = vadd.f32 1.0, %v2964_v4  ;;  %v2392_v2 = vor.u32 1.1754944e-38, %v2391_v57 }
 0x29d   : > { %2457 = vst [vmem:[%s4198_s9 + $0xf0] sm:$0xff] %v2425_v61  ;;  %v2383_v12 = vmul.f32 %v2960_v41, %v2382_v51  ;;  %v2126_v36 = vmul.f32 %v2966_v40, %v4492_v32  ;;  %vm2131_vm10 = vweird.f32 %v2966_v40  ;;  %v2016_v11 = vand.u32 2147483648, %v1889_v43 }
 0x29e   : > { %2450 = vst [vmem:[%s4198_s9 + $0xb8] sm:$0xff] %v2418_v33  ;;  %2971 = vrcp.f32 %v1898_v18  ;;  %vm2132_vm12 = vmor %vm2130_vm11, %vm2131_vm10  ;;  %vm2010_vm15 = vweird.f32 %v1889_v43  ;;  %v2151_v46 = vand.u32 2147483648, %v1898_v18  ;;  %v2149_v28 = vand.u32 2147483647, %v1898_v18 }
 0x29f   : > { %v2384_v34 = vadd.f32 %v2960_v41, %v2383_v12  ;;  %v2127_v9 = vsub.f32 1.0, %v2126_v36  ;;  %v2017_v63 = vor.u32 1.1754944e-38, %v2016_v11  ;;  %vm2145_vm5 = vweird.f32 %v1898_v18 }
 0x2a0   : > { %v2152_v32 = vor.u32 1.1754944e-38, %v2151_v46  ;;  %vm2150_vm7 = vcmp.eq.f32.partialorder %v2149_v28, 8.507059e+37 }
 0x2a1   : > { %v2388_v62 = vsel %vm2387_vm1, %v2960_v41, %v2384_v34  ;;  %v2968_v30 = vpop.eup %2967  ;;  %v2128_v1 = vmul.f32 %v2966_v40, %v2127_v9 }
 0x2a2   : > { %v2393_v29 = vsel %vm2390_vm2, %v2392_v2, %v2388_v62  ;;  %v2970_v39 = vpop.eup %2969  ;;  %v1890_v24 = vadd.f32 1.0, %v2968_v30 }
 0x2a3   : > { %v2426_v25 = vmul.f32 %v2393_v29, %v4460_v22  ;;  %v2006_v50 = vmul.f32 %v2970_v39, %v1889_v43  ;;  %v2129_v17 = vadd.f32 %v2966_v40, %v2128_v1  ;;  %vm2011_vm14 = vweird.f32 %v2970_v39 }
 0x2a4   : > { %2973 = vrcp.f32 %v1890_v24  ;;  %v2972_v42 = vpop.eup %2971  ;;  %v2014_v22 = vand.u32 2147483647, %v1889_v43  ;;  %vm2012_vm3 = vmor %vm2010_vm15, %vm2011_vm14  ;;  %v2031_v52 = vand.u32 2147483648, %v1890_v24  ;;  %v2029_v19 = vand.u32 2147483647, %v1890_v24 }
 0x2a5   : > { %2458 = vst [vmem:[%s4198_s9 + $0xf8] sm:$0xff] %v2426_v25  ;;  %v2007_v16 = vsub.f32 1.0, %v2006_v50  ;;  %v2133_v27 = vsel %vm2132_vm12, %v2966_v40, %v2129_v17  ;;  %v2141_v58 = vmul.f32 %v2972_v42, %v1898_v18  ;;  %vm2146_vm4 = vweird.f32 %v2972_v42 }
 0x2a6   : > { %v2138_v7 = vsel %vm2135_vm13, %v2137_v20, %v2133_v27  ;;  %vm2015_vm8 = vcmp.eq.f32.partialorder %v2014_v22, 8.507059e+37  ;;  %vm2147_vm6 = vmor %vm2145_vm5, %vm2146_vm4  ;;  %vm2025_vm0 = vweird.f32 %v1890_v24  ;;  %v2032_v47 = vor.u32 1.1754944e-38, %v2031_v52 }
 0x2a7   : > { %v2008_v6 = vmul.f32 %v2970_v39, %v2007_v16  ;;  %v2409_v37 = vmul.f32 %v2138_v7, %v4466_v14  ;;  %v2142_v10 = vsub.f32 1.0, %v2141_v58  ;;  %vm2030_vm2 = vcmp.eq.f32.partialorder %v2029_v19, 8.507059e+37 }
 0x2a9   : > { %v2009_v8 = vadd.f32 %v2970_v39, %v2008_v6  ;;  %2441 = vst [vmem:[%s4198_s9 + $0x70] sm:$0xff] %v2409_v37  ;;  %v2143_v15 = vmul.f32 %v2972_v42, %v2142_v10 }
 0x2aa   : > { %v2974_v23 = vpop.eup %2973 }
 0x2ab   : > { %v2013_v56 = vsel %vm2012_vm3, %v2970_v39, %v2009_v8  ;;  %v2021_v21 = vmul.f32 %v2974_v23, %v1890_v24  ;;  %v2144_v3 = vadd.f32 %v2972_v42, %v2143_v15  ;;  %vm2026_vm9 = vweird.f32 %v2974_v23 }
 0x2ac   : > { %v2018_v53 = vsel %vm2015_vm8, %v2017_v63, %v2013_v56  ;;  %vm2027_vm1 = vmor %vm2025_vm0, %vm2026_vm9 }
 0x2ad   : > { %v2401_v14 = vmul.f32 %v2018_v53, %v4474_v26  ;;  %v2022_v44 = vsub.f32 1.0, %v2021_v21  ;;  %v2148_v41 = vsel %vm2147_vm6, %v2972_v42, %v2144_v3 }
 0x2ae   : > { %v2153_v5 = vsel %vm2150_vm7, %v2152_v32, %v2148_v41 }
 0x2af   : > { %2433 = vst [vmem:[%s4198_s9 + $0x30] sm:$0xff] %v2401_v14  ;;  %v2023_v35 = vmul.f32 %v2974_v23, %v2022_v44  ;;  %v2410_v26 = vmul.f32 %v2153_v5, %v4481_v60 }
 0x2b1   : > { %v2024_v59 = vadd.f32 %v2974_v23, %v2023_v35  ;;  %2442 = vst [vmem:[%s4198_s9 + $0x78] sm:$0xff] %v2410_v26 }
 0x2b3   : > { %v2028_v0 = vsel %vm2027_vm1, %v2974_v23, %v2024_v59 }
 0x2b4   : > { %v2033_v49 = vsel %vm2030_vm2, %v2032_v47, %v2028_v0 }
 0x2b5   : > { %v2402_v38 = vmul.f32 %v2033_v49, %v4495_v54 }
 0x2b7   : > { %2434 = vst [vmem:[%s4198_s9 + $0x38] sm:$0xff] %v2402_v38 }
 0x2b8   : > { %3003 = shalt.err (!%p3000_p5)
}
 0x2b9   : > { %s3064_s7 = smov 128  }
 0x2ba   : > { %2782 = dma.vmem_to_hbm [thread:$0]  (%p3125_p4), %s2474_s26, 4096, %s2476_s27, %s2460_s28, %s3064_s7, %s3064_s7, %s3056_s4  }
 0x2bb PF: > { %p2788_p6 = scmp.ge.s32.totalorder %s3054_s17, 2  ;;  %s2490_s9 = sand.u32 1, %s3034_s12  }
 0x2bc   : > { %s2491_s11 = scalar_lea.sflag [#allocation3], %s2490_s9 }
 0x2bd   : > { %p2785_p7 = pnand %p2788_p6, %p3132_p8 }
 0x2bf   : > { %p2786_p9 = pneg %p2785_p7 }
 0x2c1   : > { %3029 = dma.done.wait (%p2786_p9), %s2491_s11, 4096  }
 0x2c2   : > { %3031 = vsyncadd (%p2786_p9), %s2491_s11, 4294963200  ;;  %s16_s17 = sadd.s32 1, %s3054_s17   ;;  %s4599_s12 = smov %s3038_s13 }
 0x2c3   : > { %p13_p10 = scmp.ge.s32.totalorder %s16_s17, 4   ;;  %s4600_s13 = smov %s3042_s14 }
 0x2c4   : > { %s4601_s14 = smov %s3138_s25  ;;  %s4602_s15 = smov %s3050_s16 }
 0x2c5   : > { %s4603_s16 = smov %s4605_s20  ;;  %15 = sbr.rel (!%p13_p10) target bundleno = 4 (0x4), region = 73 }
 0x2ca   :  { %2497 = vsyncpa [#allocation3], 1 }
 0x2cb   :  { %2499 = vsyncpa [#allocation3 + $0x1], 1 }

// kernel: tpu_custom_call.1
= control target key start
LH: loop header
LB: loop body
LE: loop exit
PB: predicated region body
PF: predicated region fallthrough
CT: control target
= control target key end

     0   :  { %8 = vsyncpa [#allocation4], 0  ;;  %s5476_s0 = inlined_call_operand.vmem [shape: bf16[2,18,18,8], index: 0, kind: input, shape index: {}]   ;;  %s5477_s1 = inlined_call_operand.vmem [shape: bf16[9,8,128], index: 1, kind: input, shape index: {}]   ;;  %s5478_s2 = inlined_call_operand.vmem [shape: f32[1,128], index: 2, kind: input, shape index: {}]   ;;  %s5479_s3 = inlined_call_operand.hbm [shape: f32[2,16,16,128], index: 3, kind: output, shape index: {}]  }
   0x1   :  { %10 = vsyncpa [#allocation4 + $0x1], 0  ;;  %s3997_s12 = smov 0   ;;  %s3999_s13 = smov 0  }
   0x2   :  { %s4001_s14 = smov 0   ;;  %s4003_s15 = smov 0  }
   0x3   :  { %s4005_s16 = smov 0   ;;  %s4007_s17 = smov 0  }
   0x4 LB: > { %s3382_s18 = sadd.s32 4294967295, %s3973_s17   ;;  %s3383_s19 = sadd.s32 4294967294, %s3973_s17   ;;  %s3973_s17 = sphi %s4007_s17, %s16_s17   ;;  %s3969_s16 = sphi %s4005_s16, %s5567_s16   ;;  %s3965_s15 = sphi %s4003_s15, %s5566_s15   ;;  %s3961_s14 = sphi %s4001_s14, %s5565_s14   ;;  %s3957_s13 = sphi %s3999_s13, %s5564_s13   ;;  %s3953_s12 = sphi %s3997_s12, %s5563_s12  }
   0x5   : > { %s35_s20 = sadd.s32 1, %s3969_s16  ;;  %s126_s21 = sadd.s32 1, %s3961_s14 }
   0x6   : > { %p37_p0 = scmp.ge.s32.totalorder %s35_s20, 2  ;;  %p136_p1 = scmp.ne.s32.totalorder %s3961_s14, %s3957_s13 }
   0x7   : > { %p137_p2 = scmp.eq.s32.totalorder %s3382_s18, 1  ;;  %p142_p3 = scmp.ne.s32.totalorder %s3957_s13, %s3953_s12 }
   0x8   : > { %s5569_s20 = smov (%p37_p0, %s35_s20), 0  ;;  %p143_p5 = scmp.eq.s32.totalorder %s3383_s19, 1 }
   0x9   : > { %p4037_p4 = por %p137_p2, %p136_p1  ;;  %s121_s23 = ssub.s32 %s3969_s16, %s5569_s20 }
   0xa   : > { %p3388_p6 = scmp.ge.s32.totalorder %s3973_s17, 1  ;;  %p124_p7 = scmp.eq.s32.totalorder %s121_s23, 0 }
   0xb   : > { %p4044_p8 = por %p143_p5, %p142_p3  ;;  %p188_p9 = scmp.lt.s32.totalorder %s3973_s17, 3 }
   0xc   : > { %s4050_s25 = scalar_select %p124_p7, %s3961_s14, %s126_s21  }
   0xd   : > { %p189_p10 = pnand %p3388_p6, %p188_p9 }
   0xf   : > { %192 = sbr.rel (%p189_p10) target bundleno = 770 (0x302), region = 32 }
  0x14   : > { %v1002_v0 = vld [vmem:[%s5477_s1] sm:$0xf]  ;;  %vm1116_vm0 = vcmask 1043456   ;;  %p225_p11 = scmp.lt.s32.totalorder %s3965_s15, 1  ;;  %v3506_v2 = vld [vmem:[%s5477_s1 + $0x8] sm:$0xf] }
  0x15   : > { %v1118_v1 = vsel %vm1116_vm0, %v1002_v0, 0  ;;  %v3523_v3 = vld [vmem:[%s5477_s1 + $0xc] sm:$0xf]  ;;  %v1562_v4 = vsel %vm1116_vm0, %v3506_v2, 0  ;;  %v3489_v6 = vld [vmem:[%s5477_s1 + $0x4] sm:$0xf] }
  0x16   : > { %3689 = vmatpush.bf16.msra.mxu1 %v1118_v1  ;;  %3690 = vmatpush.bf16.msra.mxu2 %v1118_v1  ;;  %s226_s5 = scalar_select %p225_p11, %s3965_s15, 1  ;;  %v1695_v5 = vsel %vm1116_vm0, %v3523_v3, 0  ;;  %v1340_v7 = vsel %vm1116_vm0, %v3489_v6, 0  ;;  %v3544_v8 = vld [vmem:[%s5477_s1 + $0x10] sm:$0xf]  ;;  %vm1067_vm1 = vcmask 64512  }
  0x17   : > { %3691 = vmatpush.bf16.msra.mxu3 %v1118_v1  ;;  %1127 = vmatpush.bf16.msra.mxu0 %v1118_v1  ;;  %v1827_v9 = vsel %vm1116_vm0, %v3544_v8, 0  ;;  %v3578_v28 = vld [vmem:[%s5477_s1 + $0x18] sm:$0xf]  ;;  %v3599_v29 = vld [vmem:[%s5477_s1 + $0x1c] sm:$0xf]  ;;  %vm841_vm4 = vcmask 1042432  }
  0x18   : > { %s3692_s10 = smul.u32 216, %s226_s5  ;;  %v2092_v30 = vsel %vm1116_vm0, %v3578_v28, 0  ;;  %v2224_v31 = vsel %vm1116_vm0, %v3599_v29, 0  ;;  %v3561_v32 = vld [vmem:[%s5477_s1 + $0x14] sm:$0xf]  ;;  %vm842_vm5 = vcmask 1046532  }
  0x19   : > { %v3616_v33 = vld [vmem:[%s5477_s1 + $0x20] sm:$0xf]  ;;  %v1959_v36 = vsel %vm1116_vm0, %v3561_v32, 0  ;;  %vm334_vm2 = vsmask.f32 3328  ;;  %vm4180_vm7 = vmor %vm841_vm4, %vm842_vm5  ;;  %s222_s7 = sand.u32 1, %s3957_s13  }
  0x1a   : > { %1571 = vmatpush.bf16.msrb.mxu2 %v1562_v4  ;;  %1349 = vmatpush.bf16.msrb.mxu1 %v1340_v7  ;;  %s4077_s19 = scalar_lea.vmem %s5476_s0, %s3692_s10  ;;  %v2356_v37 = vsel %vm1116_vm0, %v3616_v33, 0  ;;  %vm335_vm3 = vsmask.f32 7440  ;;  %s3389_s8 = sshll.u32 %s222_s7, 8 }
  0x1b   : > { %1704 = vmatpush.bf16.msrb.mxu3 %v1695_v5  ;;  %1836 = vmatpush.bf16.msrb.mxu0 %v1827_v9  ;;  %v4080_v10 = vld [vmem:[%s4077_s19 + $0x30] sm:$0xff]  ;;  %v4083_v11 = vld [vmem:[%s4077_s19 + $0x60] sm:$0xff]  ;;  %v4111_v18 = vld [vmem:[%s4077_s19 + $0x48] sm:$0xff]  ;;  %s4984_s9 = scalar_lea.vmem [#allocation3], %s3389_s8  ;;  %s3688_s18 = sshll.u32 %s3965_s15, 8 }
  0x1c   : > { %v3682_v12 = vld [vmem:[%s4077_s19 + $0x90] sm:$0xff]  ;;  %v3670_v13 = vld [vmem:[%s4077_s19] sm:$0xff]  ;;  %3477 = vmatmul.msk.bf16.vlgmr.msra.gmra.mxu1 %vm1067_vm1, %v4080_v10  ;;  %3481 = vmatmul.msk.bf16.vlgmr.msra.gmra.mxu2 %vm1067_vm1, %v4083_v11  ;;  %v4114_v19 = vld [vmem:[%s4077_s19 + $0x78] sm:$0xff]  ;;  %s3267_s23 = scalar_lea.hbm %s5479_s3, %s3688_s18  ;;  %s3268_s15 = sshll.u32 %s4984_s9, 4  ;;  %s3269_s15 = int_to_ptr.vmem [resolvable:$true] %s3268_s15 }
  0x1d   : > { %3485 = vmatmul.msk.bf16.vlgmr.msra.gmra.mxu3 %vm1067_vm1, %v3682_v12  ;;  %3473 = vmatmul.msk.bf16.vlgmr.msra.gmra.mxu0 %vm1067_vm1, %v3670_v13  ;;  %v4094_v14 = vld [vmem:[%s4077_s19 + $0x3c] sm:$0xff]  ;;  %v4097_v15 = vld [vmem:[%s4077_s19 + $0x6c] sm:$0xff]  ;;  %v4122_v23 = vld [vmem:[%s4077_s19 + $0x4] sm:$0xf]  ;;  %s3270_s26 = sshll.u32 %s3267_s23, 4  ;;  %s3255_s27 = scalar_lea.sflag [#allocation4], %s222_s7  ;;  %s3271_s26 = int_to_ptr.hbm [resolvable:$true] %s3270_s26 }
  0x1e   : > { %v3683_v16 = vld [vmem:[%s4077_s19 + $0x9c] sm:$0xff]  ;;  %v4101_v17 = vld [vmem:[%s4077_s19 + $0xc] sm:$0xff]  ;;  %v347_v26 = vshll.u32 %v4122_v23, 16  ;;  %v351_v27 = vshrl.u32 %v4122_v23, 16  ;;  %2101 = vmatpush.bf16.msra.mxu2 %v2092_v30  ;;  %1968 = vmatpush.bf16.msra.mxu1 %v1959_v36  ;;  %v316_v40 = vld [vmem:[%s4077_s19 + $0x8] sm:$0x1] }
  0x1f   : > { %v3684_v20 = vld [vmem:[%s4077_s19 + $0xa8] sm:$0xff]  ;;  %v4118_v21 = vld [vmem:[%s4077_s19 + $0x18] sm:$0xff]  ;;  %v280_v22 = vld [vmem:[%s4077_s19] sm:$0xf]  ;;  %2233 = vmatpush.bf16.msra.mxu3 %v2224_v31  ;;  %2365 = vmatpush.bf16.msra.mxu0 %v2356_v37  ;;  %v357_v48 = vshll.u32 %v316_v40, 16  ;;  %v846_v56 = vrot.slane %v4122_v23, 5 }
  0x20   : > { %v338_v24 = vshrl.u32 %v280_v22, 16  ;;  %v341_v25 = vshll.u32 %v280_v22, 16  ;;  %v282_v34 = vld [vmem:[%s4077_s19 + $0xc] sm:$0xf]  ;;  %v4149_v35 = vld [vmem:[%s4077_s19 + $0x10] sm:$0xf]  ;;  %vm4172_vm6 = vmor %vm334_vm2, %vm335_vm3 }
  0x21   : > { %v362_v41 = vshrl.u32 %v282_v34, 16  ;;  %v365_v42 = vshll.u32 %v282_v34, 16  ;;  %v371_v43 = vshll.u32 %v4149_v35, 16  ;;  %v375_v44 = vshrl.u32 %v4149_v35, 16  ;;  %v4157_v53 = vld [vmem:[%s4077_s19 + $0x54] sm:$0xff]  ;;  %v4160_v54 = vld [vmem:[%s4077_s19 + $0x84] sm:$0xff] }
  0x22   : > { %v340_v38 = vrot.slane %v338_v24, 4  ;;  %v343_v39 = vrot.slane %v341_v25, 5  ;;  %v349_v45 = vrot.slane %v347_v26, 5  ;;  %v353_v46 = vrot.slane %v351_v27, 4  ;;  %v4164_v57 = vld [vmem:[%s4077_s19 + $0x14] sm:$0x1] }
  0x23   : > { %v364_v49 = vrot.slane %v362_v41, 4  ;;  %v367_v50 = vrot.slane %v365_v42, 5  ;;  %v373_v51 = vrot.slane %v371_v43, 5  ;;  %v377_v52 = vrot.slane %v375_v44, 4  ;;  %v769_v58 = vld [vmem:[%s4077_s19] sm:$0xe] }
  0x24   : > { %v344_v47 = vor.u32 %v343_v39, %v340_v38  ;;  %v354_v55 = vor.u32 %v353_v46, %v349_v45  ;;  %v3685_v59 = vld [vmem:[%s4077_s19 + $0xb4] sm:$0xff]  ;;  %v4169_v60 = vld [vmem:[%s4077_s19 + $0x24] sm:$0xff]  ;;  %v359_v61 = vrot.slane %v357_v48, 5  ;;  %v381_v1 = vshll.u32 %v4164_v57, 16  ;;  %v4189_v9 = vld [vmem:[%s4077_s19 + $0x1c] sm:$0xf] }
  0x25   : > { %v368_v63 = vor.u32 %v367_v50, %v364_v49  ;;  %v378_v0 = vor.u32 %v377_v52, %v373_v51  ;;  %v3391_v4 = vrot.slane %v769_v58, 9  ;;  %v848_v5 = vrot.slane %v846_v56, 4  ;;  %v284_v8 = vld [vmem:[%s4077_s19 + $0x18] sm:$0xf]  ;;  %v318_v42 = vld [vmem:[%s4077_s19 + $0x20] sm:$0x1] }
  0x26   : > { %v345_v62 = vrot.slane %v344_v47, 4  ;;  %v355_v3 = vrot.slane %v354_v55, 4  ;;  %v849_v6 = vrot.slane %v316_v40, 5  ;;  %v386_v25 = vshrl.u32 %v284_v8, 16  ;;  %v770_v46 = vld [vmem:[%s4077_s19 + $0xc] sm:$0xe] }
  0x27   : > { %v369_v12 = vrot.slane %v368_v63, 4  ;;  %v379_v13 = vrot.slane %v378_v0, 4  ;;  %v847_v23 = vsel %vm4180_vm7, %v3391_v4, %v846_v56  ;;  %v389_v26 = vshll.u32 %v284_v8, 16  ;;  %s3909_s28 = sshra.s32 %s3271_s26, 4  ;;  %s3915_s5 = scalar_lea.hbm %s5479_s3, 512  ;;  %s3910_s28 = int_to_ptr.hbm [resolvable:$true] %s3909_s28 }
  0x28   : > { %v360_v22 = vsel %vm4172_vm6, %v355_v3, %v359_v61  ;;  %v850_v24 = vsel %vm4180_vm7, %v848_v5, %v849_v6  ;;  %v395_v27 = vshll.u32 %v4189_v9, 16  ;;  %v399_v28 = vshrl.u32 %v4189_v9, 16  ;;  %v4216_v61 = vld [vmem:[%s4077_s19 + $0x28] sm:$0xf]  ;;  %s3911_s29 = scalar_lea.hbm %s3910_s28, 256  ;;  %p3916_p1 = scmp.lt.s32.totalorder %s3910_s28, %s5479_s3 }
  0x29   : > { %v374_v29 = vsel %vm4172_vm6, %v369_v12, %v373_v51  ;;  %v1244_v32 = vunpack.c.l.b16 %v360_v22  ;;  %v1465_v33 = vunpack.c.l.b16 %v847_v23  ;;  %v1466_v34 = vunpack.c.l.b16 %v850_v24  ;;  %v319_v23 = vld [vmem:[%s4077_s19 + $0x2c] sm:$0x1]  ;;  %p3912_p12 = scmp.ne.s32.totalorder %s3910_s28, %s3911_s29  ;;  %p3917_p2 = scmp.lt.s32.totalorder %s3915_s5, %s3911_s29 }
  0x2a   : > { %v388_v36 = vrot.slane %v386_v25, 4  ;;  %v391_v37 = vrot.slane %v389_v26, 5  ;;  %v397_v38 = vrot.slane %v395_v27, 5  ;;  %v401_v39 = vrot.slane %v399_v28, 4  ;;  %v771_v27 = vld [vmem:[%s4077_s19 + $0x18] sm:$0xe] }
  0x2b   : > { %v1245_v40 = vunpack.c.l.b16 %v374_v29  ;;  %v853_v44 = vrot.slane %v4149_v35, 5  ;;  %v405_v49 = vshll.u32 %v318_v42, 16  ;;  %v3392_v51 = vrot.slane %v770_v46, 9  ;;  %v286_v35 = vld [vmem:[%s4077_s19 + $0x24] sm:$0xf]  ;;  %p3913_p13 = pnand %p3912_p12, %p4037_p4  ;;  %p3918_p3 = por %p3917_p2, %p3916_p1 }
  0x2c   : > { %3478 = vmatmul.msk.bf16.gmra.mxu1 %vm1067_vm1, %v4094_v14  ;;  %3482 = vmatmul.msk.bf16.gmra.mxu2 %vm1067_vm1, %v4097_v15  ;;  %v392_v47 = vor.u32 %v391_v37, %v388_v36  ;;  %v402_v48 = vor.u32 %v401_v39, %v397_v38  ;;  %v856_v55 = vrot.slane %v4164_v57, 5  ;;  %v419_v3 = vshll.u32 %v4216_v61, 16  ;;  %v288_v37 = vld [vmem:[%s4077_s19 + $0x30] sm:$0xf] }
  0x2d   : > { %3486 = vmatmul.msk.bf16.gmra.mxu3 %vm1067_vm1, %v3683_v16  ;;  %3474 = vmatmul.msk.bf16.gmra.mxu0 %vm1067_vm1, %v4101_v17  ;;  %v383_v16 = vrot.slane %v381_v1, 5  ;;  %v855_v52 = vrot.slane %v853_v44, 4  ;;  %v410_v1 = vshrl.u32 %v286_v35, 16  ;;  %v423_v4 = vshrl.u32 %v4216_v61, 16  ;;  %p3914_p0 = pneg %p3913_p13 }
  0x2e   : > { %v393_v56 = vrot.slane %v392_v47, 4  ;;  %v403_v58 = vrot.slane %v402_v48, 4  ;;  %v860_v25 = vrot.slane %v4189_v9, 5  ;;  %v863_v9 = vrot.slane %v318_v42, 5 }
  0x2f   : > { %v384_v30 = vsel %vm4172_vm6, %v379_v13, %v383_v16  ;;  %v857_v63 = vsel %vm4180_vm7, %v855_v52, %v856_v55  ;;  %v412_v13 = vrot.slane %v410_v1, 4  ;;  %v425_v22 = vrot.slane %v423_v4, 4  ;;  %v4273_v4 = vld [vmem:[%s4077_s19 + $0x40] sm:$0xf]  ;;  %p3919_p5 = pnand %p3918_p3, %p3914_p0 }
  0x30   : > { %v1246_v41 = vunpack.c.l.b16 %v384_v30  ;;  %v398_v57 = vsel %vm4172_vm6, %v393_v56, %v397_v38  ;;  %v1468_v6 = vunpack.c.l.b16 %v857_v63  ;;  %v429_v30 = vshll.u32 %v319_v23, 16  ;;  %v4244_v38 = vld [vmem:[%s4077_s19 + $0x34] sm:$0xf] }
  0x31   : > { %v1247_v8 = vunpack.c.l.b16 %v398_v57  ;;  %v434_v42 = vshrl.u32 %v288_v37, 16  ;;  %v867_v56 = vrot.slane %v4216_v61, 5  ;;  %v290_v61 = vld [vmem:[%s4077_s19 + $0x3c] sm:$0xf] }
  0x32   : > { %v1276_v50 = vpack.c.b16 %v1246_v41, %v1245_v40  ;;  %v431_v36 = vrot.slane %v429_v30, 5 }
  0x3c   : > { %3479 = vmatmul.msk.bf16.gmra.mxu1 %vm1067_vm1, %v4111_v18  ;;  %3483 = vmatmul.msk.bf16.gmra.mxu2 %vm1067_vm1, %v4114_v19 }
  0x3d   : > { %3487 = vmatmul.msk.bf16.gmra.mxu3 %vm1067_vm1, %v3684_v20  ;;  %3475 = vmatmul.msk.bf16.gmra.mxu0 %vm1067_vm1, %v4118_v21  ;;  %v350_v20 = vsel %vm4172_vm6, %v345_v62, %v349_v45  ;;  %v1497_v45 = vpack.c.b16 %v1466_v34, %v1465_v33  ;;  %v854_v62 = vsel %vm4180_vm7, %v3392_v51, %v853_v44  ;;  %v443_v44 = vshll.u32 %v4244_v38, 16 }
  0x3e   : > { %v1243_v31 = vunpack.c.l.b16 %v350_v20  ;;  %v1467_v5 = vunpack.c.l.b16 %v854_v62  ;;  %v421_v20 = vrot.slane %v419_v3, 5  ;;  %v870_v3 = vrot.slane %v319_v23, 5 }
  0x3f   : > { %v445_v52 = vrot.slane %v443_v44, 5 }
  0x40   : > { %v1275_v43 = vpack.c.b16 %v1244_v32, %v1243_v31  ;;  %v4229_v24 = vpack.c.b16 %v1468_v6, %v1467_v5  ;;  %v426_v29 = vor.u32 %v425_v22, %v421_v20  ;;  %v3393_v31 = vrot.slane %v771_v27, 9 }
  0x41   : > { %v862_v32 = vrot.slane %v860_v25, 4  ;;  %v471_v22 = vshrl.u32 %v4273_v4, 16 }
  0x42   : > { %v427_v34 = vrot.slane %v426_v29, 4  ;;  %v861_v39 = vsel %vm4180_vm7, %v3393_v31, %v860_v25 }
  0x43   : > { %v864_v40 = vsel %vm4180_vm7, %v862_v32, %v863_v9  ;;  %v1469_v46 = vunpack.c.l.b16 %v861_v39  ;;  %v473_v32 = vrot.slane %v471_v22, 4  ;;  %v773_v39 = vld [vmem:[%s4077_s19 + $0x30] sm:$0xe] }
  0x44   : > { %v432_v41 = vsel %vm4172_vm6, %v427_v34, %v431_v36  ;;  %v1470_v47 = vunpack.c.l.b16 %v864_v40  ;;  %v4286_v34 = vld [vmem:[%s4077_s19 + $0x44] sm:$0x1]  ;;  %v874_v36 = vrot.slane %v4244_v38, 5 }
  0x46   : > { %v876_v44 = vrot.slane %v874_v36, 4 }
  0x4c   : > { %3480 = vmatmul.msk.bf16.gmra.mxu1 %vm1067_vm1, %v4157_v53  ;;  %3484 = vmatmul.msk.bf16.gmra.mxu2 %vm1067_vm1, %v4160_v54 }
  0x4d   : > { %3488 = vmatmul.msk.bf16.gmra.mxu3 %vm1067_vm1, %v3685_v59  ;;  %3476 = vmatmul.msk.bf16.gmra.mxu0 %vm1067_vm1, %v4169_v60  ;;  %v407_v59 = vrot.slane %v405_v49, 5  ;;  %v1250_v49 = vunpack.c.l.b16 %v432_v41  ;;  %v477_v41 = vshll.u32 %v4286_v34, 16 }
  0x4f   : > { %v408_v0 = vsel %vm4172_vm6, %v403_v58, %v407_v59  ;;  %v320_v58 = vld [vmem:[%s4077_s19 + $0x38] sm:$0x1]  ;;  %v4258_v59 = vpack.c.b16 %v1470_v47, %v1469_v46  ;;  %v479_v47 = vrot.slane %v477_v41, 5 }
  0x50   : > { %v1248_v12 = vunpack.c.l.b16 %v408_v0  ;;  %v453_v0 = vshll.u32 %v320_v58, 16 }
  0x52   : > { %v4232_v26 = vpack.c.b16 %v1248_v12, %v1247_v8  ;;  %v455_v8 = vrot.slane %v453_v0, 5 }
  0x5c   : > { %3490 = vmatmul.msk.bf16.vlgmr.msrb.gmra.mxu1 %vm1067_vm1, %v1275_v43  ;;  %3507 = vmatmul.msk.bf16.vlgmr.msrb.gmra.mxu2 %vm1067_vm1, %v1497_v45  ;;  %v437_v43 = vshll.u32 %v288_v37, 16  ;;  %v447_v45 = vshrl.u32 %v4244_v38, 16  ;;  %v877_v38 = vrot.slane %v320_v58, 5 }
  0x5d   : > { %3528 = vmatmul.msk.bf16.vlgmr.msrb.gmra.mxu3 %vm1067_vm1, %v4101_v17  ;;  %3545 = vmatmul.msk.bf16.vlgmr.msrb.gmra.mxu0 %vm1067_vm1, %v1276_v50  ;;  %v413_v17 = vshll.u32 %v286_v35, 16  ;;  %v772_v35 = vld [vmem:[%s4077_s19 + $0x24] sm:$0xe] }
  0x5e   : > { %v439_v51 = vrot.slane %v437_v43, 5  ;;  %v449_v55 = vrot.slane %v447_v45, 4  ;;  %v3394_v1 = vrot.slane %v772_v35, 9  ;;  %v3395_v43 = vrot.slane %v773_v39, 9 }
  0x5f   : > { %v415_v16 = vrot.slane %v413_v17, 5  ;;  %v869_v17 = vrot.slane %v867_v56, 4 }
  0x60   : > { %v450_v57 = vor.u32 %v449_v55, %v445_v52  ;;  %v868_v12 = vsel %vm4180_vm7, %v3394_v1, %v867_v56 }
  0x61   : > { %v416_v28 = vor.u32 %v415_v16, %v412_v13  ;;  %v871_v13 = vsel %vm4180_vm7, %v869_v17, %v870_v3  ;;  %v458_v16 = vshrl.u32 %v290_v61, 16  ;;  %v1471_v27 = vunpack.c.l.b16 %v868_v12 }
  0x62   : > { %v451_v6 = vrot.slane %v450_v57, 4  ;;  %v881_v12 = vrot.slane %v4273_v4, 5 }
  0x63   : > { %v417_v33 = vrot.slane %v416_v28, 4  ;;  %v1472_v28 = vunpack.c.l.b16 %v871_v13  ;;  %v460_v29 = vrot.slane %v458_v16, 4 }
  0x64   : > { %v456_v25 = vsel %vm4172_vm6, %v451_v6, %v455_v8  ;;  %v4318_v6 = vld [vmem:[%s4077_s19 + $0x50] sm:$0x1] }
  0x65   : > { %v4289_v37 = vpack.c.b16 %v1472_v28, %v1471_v27  ;;  %v883_v27 = vrot.slane %v881_v12, 4  ;;  %v884_v28 = vrot.slane %v4286_v34, 5 }
  0x6c   : > { %3491 = vmatmul.msk.bf16.gmra.mxu1 %vm1067_vm1, %v1276_v50  ;;  %3508 = vmatmul.msk.bf16.gmra.mxu2 %vm1067_vm1, %v4229_v24  ;;  %v436_v50 = vrot.slane %v434_v42, 4 }
  0x6d   : > { %3529 = vmatmul.msk.bf16.gmra.mxu3 %vm1067_vm1, %v4118_v21  ;;  %3546 = vmatmul.msk.bf16.gmra.mxu0 %vm1067_vm1, %v4232_v26  ;;  %v422_v21 = vsel %vm4172_vm6, %v417_v33, %v421_v20  ;;  %v461_v20 = vshll.u32 %v290_v61, 16  ;;  %v1252_v33 = vunpack.c.l.b16 %v456_v25 }
  0x6e   : > { %v1249_v48 = vunpack.c.l.b16 %v422_v21  ;;  %v440_v63 = vor.u32 %v439_v51, %v436_v50  ;;  %v875_v50 = vsel %vm4180_vm7, %v3395_v43, %v874_v36  ;;  %v878_v51 = vsel %vm4180_vm7, %v876_v44, %v877_v38 }
  0x6f   : > { %v463_v30 = vrot.slane %v461_v20, 5  ;;  %v1474_v57 = vunpack.c.l.b16 %v878_v51  ;;  %v774_v20 = vld [vmem:[%s4077_s19 + $0x3c] sm:$0xe] }
  0x70   : > { %v4261_v62 = vpack.c.b16 %v1250_v49, %v1249_v48  ;;  %v441_v5 = vrot.slane %v440_v63, 4  ;;  %v292_v48 = vld [vmem:[%s4077_s19 + $0x48] sm:$0xf]  ;;  %v4305_v49 = vld [vmem:[%s4077_s19 + $0x4c] sm:$0xf]  ;;  %v1473_v63 = vunpack.c.l.b16 %v875_v50 }
  0x71   : > { %v464_v40 = vor.u32 %v463_v30, %v460_v29  ;;  %v485_v56 = vshll.u32 %v292_v48, 16  ;;  %v491_v58 = vshll.u32 %v4305_v49, 16  ;;  %v495_v35 = vshrl.u32 %v4305_v49, 16 }
  0x72   : > { %v446_v23 = vsel %vm4172_vm6, %v441_v5, %v445_v52  ;;  %v4320_v8 = vpack.c.b16 %v1474_v57, %v1473_v63 }
  0x73   : > { %v1251_v9 = vunpack.c.l.b16 %v446_v23  ;;  %v465_v45 = vrot.slane %v464_v40, 4  ;;  %v487_v3 = vrot.slane %v485_v56, 5  ;;  %v493_v61 = vrot.slane %v491_v58, 5 }
  0x74   : > { %v497_v5 = vrot.slane %v495_v35, 4  ;;  %v501_v23 = vshll.u32 %v4318_v6, 16  ;;  %v885_v40 = vsel %vm4180_vm7, %v883_v27, %v884_v28  ;;  %v888_v58 = vrot.slane %v4305_v49, 5  ;;  %v4366_v35 = vld [vmem:[%s4077_s19 + $0x5c] sm:$0x1] }
  0x75   : > { %v4293_v42 = vpack.c.b16 %v1252_v33, %v1251_v9  ;;  %v294_v9 = vld [vmem:[%s4077_s19 + $0x54] sm:$0xf]  ;;  %v4344_v33 = vld [vmem:[%s4077_s19 + $0x58] sm:$0xf] }
  0x76   : > { %v498_v22 = vor.u32 %v497_v5, %v493_v61  ;;  %v506_v43 = vshrl.u32 %v294_v9, 16  ;;  %v509_v44 = vshll.u32 %v294_v9, 16  ;;  %v515_v38 = vshll.u32 %v4344_v33, 16 }
  0x78   : > { %v499_v30 = vrot.slane %v498_v22, 4  ;;  %v508_v51 = vrot.slane %v506_v43, 4  ;;  %v296_v22 = vld [vmem:[%s4077_s19 + $0x60] sm:$0xf] }
  0x79   : > { %v533_v9 = vshll.u32 %v296_v22, 16 }
  0x7c   : > { %3492 = vmatmul.msk.bf16.gmra.mxu1 %vm1067_vm1, %v4232_v26  ;;  %3509 = vmatmul.msk.bf16.gmra.mxu2 %vm1067_vm1, %v4258_v59 }
  0x7d   : > { %3530 = vmatmul.msk.bf16.gmra.mxu3 %vm1067_vm1, %v4169_v60  ;;  %3547 = vmatmul.msk.bf16.gmra.mxu0 %vm1067_vm1, %v4261_v62  ;;  %v467_v60 = vshll.u32 %v4273_v4, 16  ;;  %v3396_v4 = vrot.slane %v774_v20, 9  ;;  %v890_v20 = vrot.slane %v888_v58, 4 }
  0x7f   : > { %v469_v31 = vrot.slane %v467_v60, 5 }
  0x81   : > { %v474_v21 = vor.u32 %v473_v32, %v469_v31  ;;  %v470_v52 = vsel %vm4172_vm6, %v465_v45, %v469_v31  ;;  %v503_v31 = vrot.slane %v501_v23, 5  ;;  %v519_v45 = vshrl.u32 %v4344_v33, 16  ;;  %v4391_v23 = vld [vmem:[%s4077_s19 + $0x64] sm:$0xf] }
  0x82   : > { %v1253_v0 = vunpack.c.l.b16 %v470_v52  ;;  %v511_v52 = vrot.slane %v509_v44, 5 }
  0x83   : > { %v475_v46 = vrot.slane %v474_v21, 4  ;;  %v504_v21 = vsel %vm4172_vm6, %v499_v30, %v503_v31 }
  0x84   : > { %v1256_v50 = vunpack.c.l.b16 %v504_v21 }
  0x85   : > { %v480_v55 = vsel %vm4172_vm6, %v475_v46, %v479_v47  ;;  %v1476_v47 = vunpack.c.l.b16 %v885_v40  ;;  %v543_v40 = vshrl.u32 %v4391_v23, 16 }
  0x86   : > { %v1254_v1 = vunpack.c.l.b16 %v480_v55  ;;  %v517_v55 = vrot.slane %v515_v38, 5 }
  0x88   : > { %v4325_v16 = vpack.c.b16 %v1254_v1, %v1253_v0  ;;  %v775_v0 = vld [vmem:[%s4077_s19 + $0x48] sm:$0xe] }
  0x89   : > { %v3397_v49 = vrot.slane %v775_v0, 9  ;;  %v895_v0 = vrot.slane %v4344_v33, 5  ;;  %v898_v33 = vrot.slane %v4366_v35, 5 }
  0x8c   : > { %3493 = vmatmul.msk.bf16.gmra.mxu1 %vm1067_vm1, %v4261_v62  ;;  %3510 = vmatmul.msk.bf16.gmra.mxu2 %vm1067_vm1, %v4289_v37 }
  0x8d   : > { %3531 = vmatmul.msk.bf16.gmra.mxu3 %vm1067_vm1, %v4080_v10  ;;  %3548 = vmatmul.msk.bf16.gmra.mxu0 %vm1067_vm1, %v4293_v42  ;;  %v482_v10 = vshrl.u32 %v292_v48, 16 }
  0x8f   : > { %v484_v17 = vrot.slane %v482_v10, 4  ;;  %v521_v10 = vrot.slane %v519_v45, 4 }
  0x91   : > { %v488_v60 = vor.u32 %v487_v3, %v484_v17  ;;  %v522_v5 = vor.u32 %v521_v10, %v517_v55  ;;  %v4412_v10 = vld [vmem:[%s4077_s19 + $0x68] sm:$0x1] }
  0x93   : > { %v489_v29 = vrot.slane %v488_v60, 4  ;;  %v891_v60 = vrot.slane %v4318_v6, 5  ;;  %v523_v27 = vrot.slane %v522_v5, 4  ;;  %v889_v6 = vsel %vm4180_vm7, %v3397_v49, %v888_v58  ;;  %v776_v5 = vld [vmem:[%s4077_s19 + $0x54] sm:$0xe] }
  0x94   : > { %v1477_v38 = vunpack.c.l.b16 %v889_v6 }
  0x95   : > { %v494_v34 = vsel %vm4172_vm6, %v489_v29, %v493_v61  ;;  %v512_v61 = vor.u32 %v511_v52, %v508_v51  ;;  %v892_v30 = vsel %vm4180_vm7, %v890_v20, %v891_v60  ;;  %v549_v20 = vshll.u32 %v4412_v10, 16 }
  0x96   : > { %v1255_v48 = vunpack.c.l.b16 %v494_v34  ;;  %v1478_v45 = vunpack.c.l.b16 %v892_v30 }
  0x98   : > { %v4375_v17 = vpack.c.b16 %v1256_v50, %v1255_v48  ;;  %v545_v50 = vrot.slane %v543_v40, 4 }
  0x99   : > { %v4323_v13 = vpop.f32.mrf.mxu1 }
  0x9a   : > { %v4329_v25 = vpop.f32.mrf.mxu0  ;;  %5505 = vst [vmem:[#allocation9_spill] sm:$0xff] %v4375_v17 }
  0x9c   : > { %3494 = vmatmul.msk.bf16.gmra.mxu1 %vm1067_vm1, %v4293_v42  ;;  %3511 = vmatmul.msk.bf16.gmra.mxu2 %vm1067_vm1, %v4320_v8 }
  0x9d   : > { %3532 = vmatmul.msk.bf16.gmra.mxu3 %vm1067_vm1, %v4094_v14  ;;  %3549 = vmatmul.msk.bf16.gmra.mxu0 %vm1067_vm1, %v4325_v16  ;;  %v882_v14 = vsel %vm4180_vm7, %v3396_v4, %v881_v12  ;;  %v525_v12 = vshll.u32 %v4366_v35, 16  ;;  %v513_v4 = vrot.slane %v512_v61, 4 }
  0x9e   : > { %v1475_v46 = vunpack.c.l.b16 %v882_v14  ;;  %v539_v14 = vshll.u32 %v4391_v23, 16 }
  0x9f   : > { %v4340_v32 = vpop.f32.mrf.mxu2  ;;  %v527_v28 = vrot.slane %v525_v12, 5  ;;  %v518_v43 = vsel %vm4172_vm6, %v513_v4, %v517_v55  ;;  %v4419_v55 = vpack.c.b16 %v1478_v45, %v1477_v38 }
  0xa0   : > { %v4346_v36 = vpop.f32.mrf.mxu3  ;;  %v4370_v57 = vpack.c.b16 %v1476_v47, %v1475_v46  ;;  %v535_v47 = vrot.slane %v533_v9, 5  ;;  %v541_v48 = vrot.slane %v539_v14, 5  ;;  %v1257_v51 = vunpack.c.l.b16 %v518_v43  ;;  %v298_v9 = vld [vmem:[%s4077_s19 + $0x6c] sm:$0xf]  ;;  %v4440_v14 = vld [vmem:[%s4077_s19 + $0x70] sm:$0xf] }
  0xa1   : > { %5502 = vst [vmem:[#allocation6_spill] sm:$0xff] %v4346_v36  ;;  %v4348_v39 = vpop.f32.mrf.mxu1  ;;  %v528_v44 = vsel %vm4172_vm6, %v523_v27, %v527_v28  ;;  %v3398_v27 = vrot.slane %v776_v5, 9  ;;  %v897_v28 = vrot.slane %v895_v0, 4 }
  0xa2   : > { %v4358_v41 = vpop.f32.mrf.mxu0  ;;  %5504 = vst [vmem:[#allocation8_spill] sm:$0xff] %v4370_v57  ;;  %v1258_v52 = vunpack.c.l.b16 %v528_v44  ;;  %v546_v49 = vor.u32 %v545_v50, %v541_v48  ;;  %v563_v50 = vshll.u32 %v4440_v14, 16 }
  0xa3   : > { %5508 = vst [vmem:[#allocation12_spill] sm:$0xff] %v4419_v55  ;;  %v896_v44 = vsel %vm4180_vm7, %v3398_v27, %v895_v0  ;;  %v899_v35 = vsel %vm4180_vm7, %v897_v28, %v898_v33  ;;  %v4461_v33 = vld [vmem:[%s4077_s19 + $0x74] sm:$0x1] }
  0xa4   : > { %v547_v30 = vrot.slane %v546_v49, 4  ;;  %v1479_v0 = vunpack.c.l.b16 %v896_v44  ;;  %v1480_v5 = vunpack.c.l.b16 %v899_v35  ;;  %v565_v27 = vrot.slane %v563_v50, 5  ;;  %v777_v44 = vld [vmem:[%s4077_s19 + $0x60] sm:$0xe] }
  0xa5   : > { %v902_v35 = vrot.slane %v4391_v23, 5  ;;  %v905_v50 = vrot.slane %v4412_v10, 5 }
  0xa7   : > { %v4362_v56 = vpop.f32.mrf.mxu2  ;;  %v904_v23 = vrot.slane %v902_v35, 4 }
  0xa8   : > { %v4368_v63 = vpop.f32.mrf.mxu3 }
  0xa9   : > { %5503 = vst [vmem:[#allocation7_spill] sm:$0xff] %v4368_v63  ;;  %v4373_v1 = vpop.f32.mrf.mxu1 }
  0xaa   : > { %v4377_v3 = vpop.f32.mrf.mxu0 }
  0xac   : > { %3495 = vmatmul.msk.bf16.gmra.mxu1 %vm1067_vm1, %v4325_v16  ;;  %3512 = vmatmul.msk.bf16.gmra.mxu2 %vm1067_vm1, %v4370_v57 }
  0xad   : > { %3533 = vmatmul.msk.bf16.gmra.mxu3 %vm1067_vm1, %v4111_v18  ;;  %3550 = vmatmul.msk.bf16.gmra.mxu0 %vm1067_vm1, %v4375_v17  ;;  %v530_v18 = vshrl.u32 %v296_v22, 16  ;;  %v4425_v22 = vpack.c.b16 %v1258_v52, %v1257_v51  ;;  %v567_v51 = vshrl.u32 %v4440_v14, 16 }
  0xaf   : > { %v4393_v29 = vpop.f32.mrf.mxu2  ;;  %v532_v46 = vrot.slane %v530_v18, 4  ;;  %5509 = vst [vmem:[#allocation13_spill] sm:$0xff] %v4425_v22  ;;  %v551_v18 = vrot.slane %v549_v20, 5  ;;  %v569_v28 = vrot.slane %v567_v51, 4  ;;  %v3399_v51 = vrot.slane %v777_v44, 9 }
  0xb0   : > { %v4399_v31 = vpop.f32.mrf.mxu3 }
  0xb1   : > { %5506 = vst [vmem:[#allocation10_spill] sm:$0xff] %v4399_v31  ;;  %v4403_v34 = vpop.f32.mrf.mxu1  ;;  %v536_v12 = vor.u32 %v535_v47, %v532_v46  ;;  %v554_v46 = vshrl.u32 %v298_v9, 16  ;;  %v557_v47 = vshll.u32 %v298_v9, 16  ;;  %v903_v10 = vsel %vm4180_vm7, %v3399_v51, %v902_v35 }
  0xb2   : > { %v4405_v21 = vpop.f32.mrf.mxu0  ;;  %v1481_v35 = vunpack.c.l.b16 %v903_v10 }
  0xb3   : > { %v537_v6 = vrot.slane %v536_v12, 4  ;;  %v559_v20 = vrot.slane %v557_v47, 5 }
  0xb5   : > { %v542_v38 = vsel %vm4172_vm6, %v537_v6, %v541_v48  ;;  %v556_v48 = vrot.slane %v554_v46, 4  ;;  %v573_v46 = vshll.u32 %v4461_v33, 16 }
  0xb6   : > { %v1259_v12 = vunpack.c.l.b16 %v542_v38 }
  0xb7   : > { %v4414_v58 = vpop.f32.mrf.mxu2  ;;  %v560_v38 = vor.u32 %v559_v20, %v556_v48  ;;  %v300_v48 = vld [vmem:[%s4077_s19 + $0x78] sm:$0xf]  ;;  %v4491_v20 = vld [vmem:[%s4077_s19 + $0x7c] sm:$0xf] }
  0xb8   : > { %v4417_v61 = vpop.f32.mrf.mxu3  ;;  %v591_v31 = vshrl.u32 %v4491_v20, 16 }
  0xb9   : > { %5507 = vst [vmem:[#allocation11_spill] sm:$0xff] %v4417_v61  ;;  %v4423_v60 = vpop.f32.mrf.mxu1  ;;  %v581_v61 = vshll.u32 %v300_v48, 16 }
  0xba   : > { %v4427_v4 = vpop.f32.mrf.mxu0 }
  0xbc   : > { %3496 = vmatmul.msk.bf16.gmra.mxu1 %vm1067_vm1, %v4375_v17  ;;  %3513 = vmatmul.msk.bf16.gmra.mxu2 %vm1067_vm1, %v4419_v55  ;;  %v778_v55 = vld [vmem:[%s4077_s19 + $0x6c] sm:$0xe]  ;;  %v912_v17 = vrot.slane %v4461_v33, 5 }
  0xbd   : > { %3534 = vmatmul.msk.bf16.gmra.mxu3 %vm1067_vm1, %v4157_v53  ;;  %3551 = vmatmul.msk.bf16.gmra.mxu0 %vm1067_vm1, %v4425_v22  ;;  %v552_v53 = vsel %vm4172_vm6, %v547_v30, %v551_v18  ;;  %v4467_v18 = vpack.c.b16 %v1480_v5, %v1479_v0  ;;  %v561_v0 = vrot.slane %v560_v38, 4 }
  0xbe   : > { %v1260_v49 = vunpack.c.l.b16 %v552_v53  ;;  %v570_v53 = vor.u32 %v569_v28, %v565_v27 }
  0xbf   : > { %v4442_v40 = vpop.f32.mrf.mxu2  ;;  %5512 = vst [vmem:[#allocation16_spill] sm:$0xff] %v4467_v18  ;;  %v566_v44 = vsel %vm4172_vm6, %v561_v0, %v565_v27  ;;  %v593_v0 = vrot.slane %v591_v31, 4 }
  0xc0   : > { %v4444_v43 = vpop.f32.mrf.mxu3  ;;  %v4469_v9 = vpack.c.b16 %v1260_v49, %v1259_v12  ;;  %v571_v5 = vrot.slane %v570_v53, 4  ;;  %v575_v12 = vrot.slane %v573_v46, 5  ;;  %v578_v46 = vshrl.u32 %v300_v48, 16 }
  0xc1   : > { %5510 = vst [vmem:[#allocation14_spill] sm:$0xff] %v4444_v43  ;;  %v4454_v45 = vpop.f32.mrf.mxu1 }
  0xc2   : > { %v4458_v52 = vpop.f32.mrf.mxu0  ;;  %5513 = vst [vmem:[#allocation17_spill] sm:$0xff] %v4469_v9  ;;  %v576_v38 = vsel %vm4172_vm6, %v571_v5, %v575_v12  ;;  %v909_v5 = vrot.slane %v4440_v14, 5  ;;  %v4513_v12 = vld [vmem:[%s4077_s19 + $0x80] sm:$0x1]  ;;  %v3400_v14 = vrot.slane %v778_v55, 9 }
  0xc4   : > { %v910_v33 = vsel %vm4180_vm7, %v3400_v14, %v909_v5 }
  0xc7   : > { %v4463_v6 = vpop.f32.mrf.mxu2 }
  0xc8   : > { %v4465_v30 = vpop.f32.mrf.mxu3 }
  0xc9   : > { %5511 = vst [vmem:[#allocation15_spill] sm:$0xff] %v4465_v30  ;;  %v4471_v43 = vpop.f32.mrf.mxu1 }
  0xca   : > { %v4476_v47 = vpop.f32.mrf.mxu0 }
  0xcc   : > { %3497 = vmatmul.msk.bf16.gmra.mxu1 %vm1067_vm1, %v4425_v22  ;;  %3514 = vmatmul.msk.bf16.gmra.mxu2 %vm1067_vm1, %v4467_v18  ;;  %v1261_v18 = vunpack.c.l.b16 %v566_v44  ;;  %v583_v22 = vrot.slane %v581_v61, 5 }
  0xcd   : > { %3535 = vmatmul.msk.bf16.gmra.mxu3 %vm1067_vm1, %v4083_v11  ;;  %3552 = vmatmul.msk.bf16.gmra.mxu0 %vm1067_vm1, %v4469_v9  ;;  %v906_v11 = vsel %vm4180_vm7, %v904_v23, %v905_v50  ;;  %v1262_v50 = vunpack.c.l.b16 %v576_v38  ;;  %v580_v23 = vrot.slane %v578_v46, 4  ;;  %v597_v38 = vshll.u32 %v4513_v12, 16 }
  0xce   : > { %v1482_v51 = vunpack.c.l.b16 %v906_v11  ;;  %v911_v46 = vrot.slane %v909_v5, 4 }
  0xcf   : > { %v4487_v49 = vpop.f32.mrf.mxu2  ;;  %v4520_v11 = vpack.c.b16 %v1262_v50, %v1261_v18  ;;  %v584_v31 = vor.u32 %v583_v22, %v580_v23  ;;  %v599_v18 = vrot.slane %v597_v38, 5 }
  0xd0   : > { %5514 = vst [vmem:[#allocation18_spill] sm:$0xff] %v4487_v49  ;;  %v4493_v28 = vpop.f32.mrf.mxu3  ;;  %v4517_v36 = vpack.c.b16 %v1482_v51, %v1481_v35  ;;  %v302_v35 = vld [vmem:[%s4077_s19 + $0x84] sm:$0xf]  ;;  %v913_v50 = vsel %vm4180_vm7, %v911_v46, %v912_v17 }
  0xd1   : > { %5515 = vst [vmem:[#allocation19_spill] sm:$0xff] %v4493_v28  ;;  %v4495_v30 = vpop.f32.mrf.mxu1  ;;  %v587_v28 = vshll.u32 %v4491_v20, 16  ;;  %v585_v22 = vrot.slane %v584_v31, 4  ;;  %v602_v23 = vshrl.u32 %v302_v35, 16  ;;  %v1484_v14 = vunpack.c.l.b16 %v913_v50 }
  0xd2   : > { %v4505_v53 = vpop.f32.mrf.mxu0  ;;  %5518 = vst [vmem:[#allocation22_spill] sm:$0xff] %v4517_v36 }
  0xd3   : > { %v589_v27 = vrot.slane %v587_v28, 5  ;;  %v604_v46 = vrot.slane %v602_v23, 4 }
  0xd5   : > { %v594_v44 = vor.u32 %v593_v0, %v589_v27  ;;  %v590_v5 = vsel %vm4172_vm6, %v585_v22, %v589_v27  ;;  %v916_v27 = vrot.slane %v4491_v20, 5  ;;  %v919_v20 = vrot.slane %v4513_v12, 5 }
  0xd6   : > { %v1263_v57 = vunpack.c.l.b16 %v590_v5 }
  0xd7   : > { %v4509_v63 = vpop.f32.mrf.mxu2  ;;  %v595_v55 = vrot.slane %v594_v44, 4 }
  0xd8   : > { %5516 = vst [vmem:[#allocation20_spill] sm:$0xff] %v4509_v63  ;;  %v4515_v48 = vpop.f32.mrf.mxu3 }
  0xd9   : > { %5517 = vst [vmem:[#allocation21_spill] sm:$0xff] %v4515_v48  ;;  %v1351_v10 = vpop.f32.mrf.mxu1  ;;  %v605_v48 = vshll.u32 %v302_v35, 16  ;;  %v600_v17 = vsel %vm4172_vm6, %v595_v55, %v599_v18  ;;  %v779_v18 = vld [vmem:[%s4077_s19 + $0x78] sm:$0xe] }
  0xda   : > { %v1431_v61 = vadd.f32 %v1351_v10, %v4329_v25  ;;  %v1838_v28 = vpop.f32.mrf.mxu0  ;;  %v4535_v25 = vld [vmem:[%s4077_s19 + $0x88] sm:$0xf]  ;;  %v3401_v5 = vrot.slane %v779_v18, 9 }
  0xdb   : > { %v607_v35 = vrot.slane %v605_v48, 5 }
  0xdc   : > { %3498 = vmatmul.msk.bf16.gmra.mxu1 %vm1067_vm1, %v4469_v9  ;;  %3515 = vmatmul.msk.bf16.gmra.mxu2 %vm1067_vm1, %v4517_v36  ;;  %v615_v36 = vshrl.u32 %v4535_v25, 16 }
  0xdd   : > { %3536 = vmatmul.msk.bf16.gmra.mxu3 %vm1067_vm1, %v4097_v15  ;;  %3553 = vmatmul.msk.bf16.gmra.mxu0 %vm1067_vm1, %v4520_v11  ;;  %v611_v15 = vshll.u32 %v4535_v25, 16 }
  0xde   : > { %v617_v63 = vrot.slane %v615_v36, 4 }
  0xdf   : > { %v1573_v51 = vpop.f32.mrf.mxu2 }
  0xe0   : > { %v1653_v0 = vadd.f32 %v1573_v51, %v1431_v61  ;;  %v1706_v10 = vpop.f32.mrf.mxu3  ;;  %v1483_v61 = vunpack.c.l.b16 %v910_v33  ;;  %v613_v51 = vrot.slane %v611_v15, 5  ;;  %v608_v33 = vor.u32 %v607_v35, %v604_v46 }
  0xe1   : > { %v1353_v9 = vpop.f32.mrf.mxu1  ;;  %v917_v46 = vsel %vm4180_vm7, %v3401_v5, %v916_v27 }
  0xe2   : > { %v1786_v31 = vadd.f32 %v1706_v10, %v1653_v0  ;;  %v1432_v44 = vadd.f32 %v1353_v9, %v4358_v41  ;;  %v1840_v38 = vpop.f32.mrf.mxu0  ;;  %v1264_v0 = vunpack.c.l.b16 %v600_v17  ;;  %v4551_v10 = vld [vmem:[%s4077_s19 + $0x8c] sm:$0x1]  ;;  %v4553_v9 = vpack.c.b16 %v1484_v14, %v1483_v61  ;;  %v4574_v14 = vld [vmem:[%s4077_s19 + $0x94] sm:$0xf] }
  0xe3   : > { %v618_v50 = vor.u32 %v617_v63, %v613_v51  ;;  %v621_v48 = vshll.u32 %v4551_v10, 16  ;;  %v918_v17 = vrot.slane %v916_v27, 4  ;;  %v609_v63 = vrot.slane %v608_v33, 4 }
  0xe4   : > { %v4548_v49 = vadd.f32 %v1838_v28, %v1786_v31  ;;  %v4558_v36 = vpack.c.b16 %v1264_v0, %v1263_v57  ;;  %v635_v33 = vshll.u32 %v4574_v14, 16 }
  0xe5   : > { %v623_v61 = vrot.slane %v621_v48, 5 }
  0xe6   : > { %5519 = vst [vmem:[#allocation23_spill] sm:$0xff] %v4548_v49 }
  0xe7   : > { %v1575_v41 = vpop.f32.mrf.mxu2 }
  0xe8   : > { %v1654_v22 = vadd.f32 %v1575_v41, %v1432_v44  ;;  %v1708_v55 = vpop.f32.mrf.mxu3  ;;  %v619_v44 = vrot.slane %v618_v50, 4  ;;  %v920_v41 = vsel %vm4180_vm7, %v918_v17, %v919_v20  ;;  %v639_v50 = vshrl.u32 %v4574_v14, 16 }
  0xe9   : > { %v1356_v23 = vpop.f32.mrf.mxu1 }
  0xea   : > { %v1787_v28 = vadd.f32 %v1708_v55, %v1654_v22  ;;  %v1433_v15 = vadd.f32 %v1356_v23, %v4377_v3  ;;  %v1843_v31 = vpop.f32.mrf.mxu0  ;;  %v304_v3 = vld [vmem:[%s4077_s19 + $0x90] sm:$0xf] }
  0xeb   : > { %v626_v55 = vshrl.u32 %v304_v3, 16  ;;  %v629_v18 = vshll.u32 %v304_v3, 16  ;;  %v4590_v3 = vld [vmem:[%s4077_s19 + $0x98] sm:$0x1] }
  0xec   : > { %3499 = vmatmul.msk.bf16.gmra.mxu1 %vm1067_vm1, %v4520_v11  ;;  %3516 = vmatmul.msk.bf16.gmra.mxu2 %vm1067_vm1, %v4553_v9  ;;  %v4566_v57 = vadd.f32 %v1840_v38, %v1787_v28  ;;  %v614_v38 = vsel %vm4172_vm6, %v609_v63, %v613_v51  ;;  %v1485_v28 = vunpack.c.l.b16 %v917_v46 }
  0xed   : > { %3537 = vmatmul.msk.bf16.gmra.mxu3 %vm1067_vm1, %v4114_v19  ;;  %3554 = vmatmul.msk.bf16.gmra.mxu0 %vm1067_vm1, %v4558_v36  ;;  %v624_v19 = vsel %vm4172_vm6, %v619_v44, %v623_v61  ;;  %v1265_v5 = vunpack.c.l.b16 %v614_v38  ;;  %v628_v20 = vrot.slane %v626_v55, 4  ;;  %v631_v63 = vrot.slane %v629_v18, 5 }
  0xee   : > { %5520 = vst [vmem:[#allocation24_spill] sm:$0xff] %v4566_v57  ;;  %v1266_v51 = vunpack.c.l.b16 %v624_v19  ;;  %v637_v44 = vrot.slane %v635_v33, 5  ;;  %v641_v61 = vrot.slane %v639_v50, 4  ;;  %v645_v19 = vshll.u32 %v4590_v3, 16 }
  0xef   : > { %v1578_v12 = vpop.f32.mrf.mxu2  ;;  %v632_v38 = vor.u32 %v631_v63, %v628_v20  ;;  %v926_v50 = vrot.slane %v4551_v10, 5 }
  0xf0   : > { %v1655_v35 = vadd.f32 %v1578_v12, %v1433_v15  ;;  %v1711_v0 = vpop.f32.mrf.mxu3  ;;  %v1486_v15 = vunpack.c.l.b16 %v920_v41  ;;  %v780_v41 = vld [vmem:[%s4077_s19 + $0x84] sm:$0xe] }
  0xf1   : > { %v1358_v22 = vpop.f32.mrf.mxu1 }
  0xf2   : > { %v1788_v27 = vadd.f32 %v1711_v0, %v1655_v35  ;;  %v1434_v48 = vadd.f32 %v1358_v22, %v4405_v21  ;;  %v1845_v23 = vpop.f32.mrf.mxu0  ;;  %v4592_v35 = vpack.c.b16 %v1486_v15, %v1485_v28  ;;  %v923_v21 = vrot.slane %v4535_v25, 5  ;;  %v4613_v15 = vld [vmem:[%s4077_s19 + $0xa0] sm:$0xf] }
  0xf3   : > { %v4595_v0 = vpack.c.b16 %v1266_v51, %v1265_v5  ;;  %v3402_v25 = vrot.slane %v780_v41, 9 }
  0xf4   : > { %v4587_v17 = vadd.f32 %v1843_v31, %v1788_v27  ;;  %v642_v31 = vor.u32 %v641_v61, %v637_v44  ;;  %v925_v33 = vrot.slane %v923_v21, 4 }
  0xf5   : > { %v924_v10 = vsel %vm4180_vm7, %v3402_v25, %v923_v21  ;;  %v663_v21 = vshrl.u32 %v4613_v15, 16 }
  0xf7   : > { %v1580_v12 = vpop.f32.mrf.mxu2 }
  0xf8   : > { %v1656_v57 = vadd.f32 %v1580_v12, %v1434_v48  ;;  %v1713_v49 = vpop.f32.mrf.mxu3  ;;  %v306_v48 = vld [vmem:[%s4077_s19 + $0x9c] sm:$0xf] }
  0xf9   : > { %v1361_v46 = vpop.f32.mrf.mxu1  ;;  %v650_v61 = vshrl.u32 %v306_v48, 16  ;;  %v653_v12 = vshll.u32 %v306_v48, 16  ;;  %v930_v48 = vrot.slane %v4574_v14, 5 }
  0xfa   : > { %v1789_v22 = vadd.f32 %v1713_v49, %v1656_v57  ;;  %v1435_v55 = vadd.f32 %v1361_v46, %v4427_v4  ;;  %v1848_v18 = vpop.f32.mrf.mxu0  ;;  %v633_v4 = vrot.slane %v632_v38, 4  ;;  %v643_v49 = vrot.slane %v642_v31, 4 }
  0xfb   : > { %v647_v57 = vrot.slane %v645_v19, 5  ;;  %v659_v31 = vshll.u32 %v4613_v15, 16  ;;  %v1487_v19 = vunpack.c.l.b16 %v924_v10  ;;  %v781_v10 = vld [vmem:[%s4077_s19 + $0x90] sm:$0xe] }
  0xfc   : > { %3500 = vmatmul.msk.bf16.gmra.mxu1 %vm1067_vm1, %v4558_v36  ;;  %3517 = vmatmul.msk.bf16.gmra.mxu2 %vm1067_vm1, %v4592_v35  ;;  %v4605_v27 = vadd.f32 %v1845_v23, %v1789_v22  ;;  %v927_v23 = vsel %vm4180_vm7, %v925_v33, %v926_v50  ;;  %v652_v33 = vrot.slane %v650_v61, 4  ;;  %v655_v50 = vrot.slane %v653_v12, 5 }
  0xfd   : > { %3538 = vmatmul.msk.bf16.gmra.mxu3 %vm1067_vm1, %v4160_v54  ;;  %3555 = vmatmul.msk.bf16.gmra.mxu0 %vm1067_vm1, %v4595_v0  ;;  %v638_v54 = vsel %vm4172_vm6, %v633_v4, %v637_v44  ;;  %v648_v63 = vsel %vm4172_vm6, %v643_v49, %v647_v57  ;;  %v1488_v22 = vunpack.c.l.b16 %v927_v23  ;;  %v661_v4 = vrot.slane %v659_v31, 5 }
  0xfe   : > { %v1267_v44 = vunpack.c.l.b16 %v638_v54  ;;  %v1268_v25 = vunpack.c.l.b16 %v648_v63  ;;  %v665_v49 = vrot.slane %v663_v21, 4  ;;  %v933_v31 = vrot.slane %v4590_v3, 5  ;;  %v308_v21 = vld [vmem:[%s4077_s19 + $0xa8] sm:$0xf] }
  0xff   : > { %v1583_v28 = vpop.f32.mrf.mxu2 }
 0x100   : > { %v1657_v5 = vadd.f32 %v1583_v28, %v1435_v55  ;;  %v1716_v51 = vpop.f32.mrf.mxu3  ;;  %v4635_v23 = vpack.c.b16 %v1268_v25, %v1267_v44  ;;  %v666_v12 = vor.u32 %v665_v49, %v661_v4  ;;  %v674_v49 = vshrl.u32 %v308_v21, 16 }
 0x101   : > { %v1363_v20 = vpop.f32.mrf.mxu1 }
 0x102   : > { %v1790_v46 = vadd.f32 %v1716_v51, %v1657_v5  ;;  %v1436_v41 = vadd.f32 %v1363_v20, %v4458_v52  ;;  %v1850_v38 = vpop.f32.mrf.mxu0  ;;  %v4630_v52 = vld [vmem:[%s4077_s19 + $0xa4] sm:$0x1]  ;;  %v4632_v51 = vpack.c.b16 %v1488_v22, %v1487_v19  ;;  %v656_v20 = vor.u32 %v655_v50, %v652_v33  ;;  %v4648_v22 = vld [vmem:[%s4077_s19 + $0x90] sm:$0xff] }
 0x103   : > { %v669_v14 = vshll.u32 %v4630_v52, 16  ;;  %5523 = vst [vmem:[#allocation27_spill] sm:$0xff] %v4648_v22  ;;  %v667_v44 = vrot.slane %v666_v12, 4 }
 0x104   : > { %v4626_v55 = vadd.f32 %v1848_v18, %v1790_v46  ;;  %v3403_v46 = vrot.slane %v781_v10, 9  ;;  %v657_v3 = vrot.slane %v656_v20, 4 }
 0x105   : > { %v671_v25 = vrot.slane %v669_v14, 5 }
 0x106   : > { %5521 = vst [vmem:[#allocation25_spill] sm:$0xff] %v4626_v55  ;;  %v931_v50 = vsel %vm4180_vm7, %v3403_v46, %v930_v48 }
 0x107   : > { %v1585_v57 = vpop.f32.mrf.mxu2  ;;  %v672_v46 = vsel %vm4172_vm6, %v667_v44, %v671_v25  ;;  %v782_v25 = vld [vmem:[%s4077_s19 + $0x9c] sm:$0xe] }
 0x108   : > { %v1658_v28 = vadd.f32 %v1585_v57, %v1436_v41  ;;  %v1718_v5 = vpop.f32.mrf.mxu3  ;;  %v932_v41 = vrot.slane %v930_v48, 4  ;;  %v662_v48 = vsel %vm4172_vm6, %v657_v3, %v661_v4  ;;  %v937_v4 = vrot.slane %v4613_v15, 5 }
 0x109   : > { %v1366_v18 = vpop.f32.mrf.mxu1 }
 0x10a   : > { %v1791_v54 = vadd.f32 %v1718_v5, %v1658_v28  ;;  %v1437_v63 = vadd.f32 %v1366_v18, %v4476_v47  ;;  %v1853_v61 = vpop.f32.mrf.mxu0  ;;  %v4655_v47 = vld [vmem:[%s4077_s19 + $0xac] sm:$0xf]  ;;  %v677_v5 = vshll.u32 %v308_v21, 16 }
 0x10b   : > { %v683_v10 = vshll.u32 %v4655_v47, 16  ;;  %v687_v18 = vshrl.u32 %v4655_v47, 16 }
 0x10c   : > { %3501 = vmatmul.msk.bf16.gmra.mxu1 %vm1067_vm1, %v4595_v0  ;;  %3518 = vmatmul.msk.bf16.gmra.mxu2 %vm1067_vm1, %v4632_v51  ;;  %v4645_v19 = vadd.f32 %v1850_v38, %v1791_v54  ;;  %v934_v38 = vsel %vm4180_vm7, %v932_v41, %v933_v31  ;;  %v676_v31 = vrot.slane %v674_v49, 4  ;;  %v679_v21 = vrot.slane %v677_v5, 5 }
 0x10d   : > { %3539 = vmatmul.msk.bf16.gmra.mxu3 %vm1067_vm1, %v4648_v22  ;;  %3556 = vmatmul.msk.bf16.gmra.mxu0 %vm1067_vm1, %v4635_v23  ;;  %v1490_v41 = vunpack.c.l.b16 %v934_v38  ;;  %v1269_v22 = vunpack.c.l.b16 %v662_v48  ;;  %v939_v48 = vrot.slane %v937_v4, 4 }
 0x10e   : > { %5522 = vst [vmem:[#allocation26_spill] sm:$0xff] %v4645_v19  ;;  %v689_v19 = vrot.slane %v687_v18, 4 }
 0x10f   : > { %v1588_v33 = vpop.f32.mrf.mxu2 }
 0x110   : > { %v1659_v57 = vadd.f32 %v1588_v33, %v1437_v63  ;;  %v1721_v28 = vpop.f32.mrf.mxu3  ;;  %v1489_v63 = vunpack.c.l.b16 %v931_v50  ;;  %v685_v33 = vrot.slane %v683_v10, 5  ;;  %v680_v50 = vor.u32 %v679_v21, %v676_v31  ;;  %v4697_v31 = vld [vmem:[%s4077_s19 + $0xb8] sm:$0xf] }
 0x111   : > { %v1368_v54 = vpop.f32.mrf.mxu1 }
 0x112   : > { %v1792_v20 = vadd.f32 %v1721_v28, %v1659_v57  ;;  %v1438_v12 = vadd.f32 %v1368_v54, %v4505_v53  ;;  %v1855_v14 = vpop.f32.mrf.mxu0  ;;  %v1270_v57 = vunpack.c.l.b16 %v672_v46  ;;  %v4671_v28 = vld [vmem:[%s4077_s19 + $0xb0] sm:$0x1]  ;;  %v4673_v54 = vpack.c.b16 %v1490_v41, %v1489_v63  ;;  %v310_v41 = vld [vmem:[%s4077_s19 + $0xb4] sm:$0xf] }
 0x113   : > { %v690_v38 = vor.u32 %v689_v19, %v685_v33  ;;  %v693_v49 = vshll.u32 %v4671_v28, 16  ;;  %v940_v46 = vrot.slane %v4630_v52, 5  ;;  %v681_v15 = vrot.slane %v680_v50, 4 }
 0x114   : > { %v4668_v55 = vadd.f32 %v1853_v61, %v1792_v20  ;;  %5525 = vst [vmem:[#allocation29_spill] sm:$0xff] %v4673_v54  ;;  %v4678_v61 = vpack.c.b16 %v1270_v57, %v1269_v22  ;;  %v3404_v20 = vrot.slane %v782_v25, 9  ;;  %v4688_v22 = vld [vmem:[%s4077_s19 + $0x9c] sm:$0xff] }
 0x115   : > { %v691_v19 = vrot.slane %v690_v38, 4  ;;  %5527 = vst [vmem:[#allocation31_spill] sm:$0xff] %v4688_v22  ;;  %v701_v38 = vshll.u32 %v310_v41, 16 }
 0x116   : > { %5524 = vst [vmem:[#allocation28_spill] sm:$0xff] %v4668_v55  ;;  %v938_v57 = vsel %vm4180_vm7, %v3404_v20, %v937_v4 }
 0x117   : > { %v1590_v53 = vpop.f32.mrf.mxu2  ;;  %v1491_v20 = vunpack.c.l.b16 %v938_v57  ;;  %v944_v57 = vrot.slane %v4655_v47, 5 }
 0x118   : > { %v1660_v3 = vadd.f32 %v1590_v53, %v1438_v12  ;;  %v1723_v44 = vpop.f32.mrf.mxu3  ;;  %v695_v12 = vrot.slane %v693_v49, 5  ;;  %v707_v49 = vshll.u32 %v4697_v31, 16 }
 0x119   : > { %v1371_v5 = vpop.f32.mrf.mxu1  ;;  %v946_v47 = vrot.slane %v944_v57, 4 }
 0x11a   : > { %v1793_v10 = vadd.f32 %v1723_v44, %v1660_v3  ;;  %v1858_v18 = vpop.f32.mrf.mxu0  ;;  %v1439_v52 = vadd.f32 %v1371_v5, %v4323_v13  ;;  %v941_v3 = vsel %vm4180_vm7, %v939_v48, %v940_v46  ;;  %v686_v44 = vsel %vm4172_vm6, %v681_v15, %v685_v33 }
 0x11b   : > { %v696_v25 = vsel %vm4172_vm6, %v691_v19, %v695_v12  ;;  %v698_v13 = vshrl.u32 %v310_v41, 16  ;;  %v711_v5 = vshrl.u32 %v4697_v31, 16  ;;  %v703_v15 = vrot.slane %v701_v38, 5  ;;  %v4713_v41 = vld [vmem:[%s4077_s19 + $0xbc] sm:$0x1]  ;;  %v4729_v38 = vld [vmem:[%s4077_s19 + $0xa8] sm:$0xff] }
 0x11c   : > { %3502 = vmatmul.msk.bf16.gmra.mxu1 %vm1067_vm1, %v4635_v23  ;;  %3519 = vmatmul.msk.bf16.gmra.mxu2 %vm1067_vm1, %v4673_v54  ;;  %v4685_v63 = vadd.f32 %v1855_v14, %v1793_v10  ;;  %v1272_v48 = vunpack.c.l.b16 %v696_v25  ;;  %v709_v19 = vrot.slane %v707_v49, 5 }
 0x11d   : > { %3540 = vmatmul.msk.bf16.gmra.mxu3 %vm1067_vm1, %v4688_v22  ;;  %3557 = vmatmul.msk.bf16.gmra.mxu0 %vm1067_vm1, %v4678_v61  ;;  %v700_v33 = vrot.slane %v698_v13, 4  ;;  %v713_v12 = vrot.slane %v711_v5, 4  ;;  %v717_v13 = vshll.u32 %v4713_v41, 16 }
 0x11e   : > { %5526 = vst [vmem:[#allocation30_spill] sm:$0xff] %v4685_v63 }
 0x11f   : > { %v1593_v21 = vpop.f32.mrf.mxu2  ;;  %v714_v25 = vor.u32 %v713_v12, %v709_v19  ;;  %v719_v5 = vrot.slane %v717_v13, 5 }
 0x120   : > { %v1661_v53 = vadd.f32 %v1593_v21, %v1439_v52  ;;  %v1726_v14 = vpop.f32.mrf.mxu3  ;;  %v1492_v52 = vunpack.c.l.b16 %v941_v3  ;;  %v1271_v21 = vunpack.c.l.b16 %v686_v44  ;;  %v704_v44 = vor.u32 %v703_v15, %v700_v33 }
 0x121   : > { %v1373_v50 = vpop.f32.mrf.mxu1  ;;  %v715_v49 = vrot.slane %v714_v25, 4 }
 0x122   : > { %v1794_v4 = vadd.f32 %v1726_v14, %v1661_v53  ;;  %v1860_v10 = vpop.f32.mrf.mxu0  ;;  %v1440_v63 = vadd.f32 %v1373_v50, %v4348_v39  ;;  %v4715_v53 = vpack.c.b16 %v1492_v52, %v1491_v20  ;;  %v4718_v3 = vpack.c.b16 %v1272_v48, %v1271_v21  ;;  %v312_v20 = vld [vmem:[%s4077_s19 + $0xc0] sm:$0xf]  ;;  %v4739_v21 = vld [vmem:[%s4077_s19 + $0xc4] sm:$0xf] }
 0x123   : > { %5529 = vst [vmem:[#allocation33_spill] sm:$0xff] %v4739_v21  ;;  %v725_v25 = vshll.u32 %v312_v20, 16  ;;  %v731_v13 = vshll.u32 %v4739_v21, 16 }
 0x124   : > { %v4709_v46 = vadd.f32 %v1858_v18, %v1794_v4  ;;  %v783_v18 = vld [vmem:[%s4077_s19 + $0xa8] sm:$0xe] }
 0x127   : > { %v1595_v55 = vpop.f32.mrf.mxu2 }
 0x128   : > { %v1662_v22 = vadd.f32 %v1595_v55, %v1440_v63  ;;  %v1728_v54 = vpop.f32.mrf.mxu3  ;;  %v3405_v55 = vrot.slane %v783_v18, 9  ;;  %v720_v18 = vsel %vm4172_vm6, %v715_v49, %v719_v5  ;;  %v727_v49 = vrot.slane %v725_v25, 5 }
 0x129   : > { %v1376_v14 = vpop.f32.mrf.mxu1  ;;  %v733_v5 = vrot.slane %v731_v13, 5  ;;  %v4771_v13 = vld [vmem:[%s4077_s19 + $0xb4] sm:$0xff] }
 0x12a   : > { %v1795_v39 = vadd.f32 %v1728_v54, %v1662_v22  ;;  %v1863_v50 = vpop.f32.mrf.mxu0  ;;  %v947_v54 = vrot.slane %v4671_v28, 5  ;;  %v705_v22 = vrot.slane %v704_v44, 4  ;;  %v1441_v4 = vadd.f32 %v1376_v14, %v4373_v1 }
 0x12b   : > { %v945_v33 = vsel %vm4180_vm7, %v3405_v55, %v944_v57  ;;  %v722_v1 = vshrl.u32 %v312_v20, 16 }
 0x12c   : > { %3503 = vmatmul.msk.bf16.gmra.mxu1 %vm1067_vm1, %v4678_v61  ;;  %3520 = vmatmul.msk.bf16.gmra.mxu2 %vm1067_vm1, %v4715_v53  ;;  %v4726_v63 = vadd.f32 %v1860_v10, %v1795_v39  ;;  %v948_v12 = vsel %vm4180_vm7, %v946_v47, %v947_v54  ;;  %v710_v28 = vsel %vm4172_vm6, %v705_v22, %v709_v19  ;;  %v735_v39 = vshrl.u32 %v4739_v21, 16 }
 0x12d   : > { %3541 = vmatmul.msk.bf16.gmra.mxu3 %vm1067_vm1, %v4729_v38  ;;  %3558 = vmatmul.msk.bf16.gmra.mxu0 %vm1067_vm1, %v4718_v3  ;;  %v1493_v57 = vunpack.c.l.b16 %v945_v33  ;;  %v1494_v55 = vunpack.c.l.b16 %v948_v12  ;;  %v1273_v47 = vunpack.c.l.b16 %v710_v28  ;;  %v1274_v54 = vunpack.c.l.b16 %v720_v18 }
 0x12e   : > { %5528 = vst [vmem:[#allocation32_spill] sm:$0xff] %v4726_v63  ;;  %v724_v19 = vrot.slane %v722_v1, 4  ;;  %v951_v12 = vrot.slane %v4697_v31, 5  ;;  %v784_v1 = vld [vmem:[%s4077_s19 + $0xb4] sm:$0xe] }
 0x12f   : > { %v1598_v52 = vpop.f32.mrf.mxu2  ;;  %v4757_v21 = vpack.c.b16 %v1494_v55, %v1493_v57  ;;  %v3406_v31 = vrot.slane %v784_v1, 9 }
 0x130   : > { %v1663_v10 = vadd.f32 %v1598_v52, %v1441_v4  ;;  %v1731_v48 = vpop.f32.mrf.mxu3  ;;  %v737_v52 = vrot.slane %v735_v39, 4  ;;  %v954_v39 = vrot.slane %v4713_v41, 5 }
 0x131   : > { %v1378_v15 = vpop.f32.mrf.mxu1 }
 0x132   : > { %v1796_v14 = vadd.f32 %v1731_v48, %v1663_v10  ;;  %v1865_v44 = vpop.f32.mrf.mxu0  ;;  %v1442_v22 = vadd.f32 %v1378_v15, %v4403_v34  ;;  %v4755_v48 = vld [vmem:[%s4077_s19 + $0xc8] sm:$0x1]  ;;  %v728_v34 = vor.u32 %v727_v49, %v724_v19  ;;  %v738_v15 = vor.u32 %v737_v52, %v733_v5 }
 0x133   : > { %v952_v52 = vsel %vm4180_vm7, %v3406_v31, %v951_v12 }
 0x134   : > { %v4751_v4 = vadd.f32 %v1863_v50, %v1796_v14  ;;  %v4759_v50 = vpack.c.b16 %v1274_v54, %v1273_v47  ;;  %v741_v14 = vshll.u32 %v4755_v48, 16  ;;  %v729_v55 = vrot.slane %v728_v34, 4 }
 0x135   : > { %v739_v47 = vrot.slane %v738_v15, 4 }
 0x136   : > { %v743_v54 = vrot.slane %v741_v14, 5  ;;  %v734_v41 = vsel %vm4172_vm6, %v729_v55, %v733_v5 }
 0x137   : > { %v1600_v10 = vpop.f32.mrf.mxu2  ;;  %v1820_v15 = vunpack.c.l.b16 %v734_v41 }
 0x138   : > { %v1664_v20 = vadd.f32 %v1600_v10, %v1442_v22  ;;  %v1733_v63 = vpop.f32.mrf.mxu3 }
 0x139   : > { %v1381_v33 = vpop.f32.mrf.mxu1 }
 0x13a   : > { %v1797_v28 = vadd.f32 %v1733_v63, %v1664_v20  ;;  %v1868_v18 = vpop.f32.mrf.mxu0  ;;  %v953_v63 = vrot.slane %v951_v12, 4  ;;  %v1443_v57 = vadd.f32 %v1381_v33, %v4423_v60  ;;  %v744_v60 = vsel %vm4172_vm6, %v739_v47, %v743_v54 }
 0x13b   : > { %v1495_v33 = vunpack.c.l.b16 %v952_v52  ;;  %v1821_v14 = vunpack.c.l.b16 %v744_v60 }
 0x13c   : > { %3504 = vmatmul.msk.bf16.gmra.mxu1 %vm1067_vm1, %v4718_v3  ;;  %3521 = vmatmul.msk.bf16.gmra.mxu2 %vm1067_vm1, %v4757_v21  ;;  %v4768_v25 = vadd.f32 %v1865_v44, %v1797_v28  ;;  %v955_v10 = vsel %vm4180_vm7, %v953_v63, %v954_v39 }
 0x13d   : > { %3542 = vmatmul.msk.bf16.gmra.mxu3 %vm1067_vm1, %v4771_v13  ;;  %3559 = vmatmul.msk.bf16.gmra.mxu0 %vm1067_vm1, %v4759_v50  ;;  %v1496_v1 = vunpack.c.l.b16 %v955_v10 }
 0x13f   : > { %v1603_v19 = vpop.f32.mrf.mxu2  ;;  %v4790_v39 = vpack.c.b16 %v1496_v1, %v1495_v33 }
 0x140   : > { %v1665_v44 = vadd.f32 %v1603_v19, %v1443_v57  ;;  %v1736_v22 = vpop.f32.mrf.mxu3 }
 0x141   : > { %v1383_v49 = vpop.f32.mrf.mxu1 }
 0x142   : > { %v1798_v20 = vadd.f32 %v1736_v22, %v1665_v44  ;;  %v1870_v28 = vpop.f32.mrf.mxu0  ;;  %v1444_v12 = vadd.f32 %v1383_v49, %v4454_v45  ;;  %v3686_v44 = vld [vmem:[%s4077_s19 + $0xc0] sm:$0xff]  ;;  %v4793_v22 = vpack.c.b16 %v1821_v14, %v1820_v15 }
 0x144   : > { %v4787_v34 = vadd.f32 %v1868_v18, %v1798_v20 }
 0x147   : > { %v1605_v31 = vpop.f32.mrf.mxu2 }
 0x148   : > { %v1666_v57 = vadd.f32 %v1605_v31, %v1444_v12  ;;  %v1738_v63 = vpop.f32.mrf.mxu3 }
 0x149   : > { %v1386_v19 = vpop.f32.mrf.mxu1 }
 0x14a   : > { %v1799_v5 = vadd.f32 %v1738_v63, %v1666_v57  ;;  %v1873_v55 = vpop.f32.mrf.mxu0  ;;  %v1445_v45 = vadd.f32 %v1386_v19, %v4471_v43  ;;  %v3883_v43 = vld [vmem:[%s4077_s19 + $0x18] sm:$0xff] }
 0x14c   : > { %3505 = vmatmul.msk.bf16.gmra.mxu1 %vm1067_vm1, %v4759_v50  ;;  %3522 = vmatmul.msk.bf16.gmra.mxu2 %vm1067_vm1, %v4790_v39  ;;  %v4799_v18 = vadd.f32 %v1870_v28, %v1799_v5 }
 0x14d   : > { %3543 = vmatmul.msk.bf16.gmra.mxu3 %vm1067_vm1, %v3686_v44  ;;  %3560 = vmatmul.msk.bf16.gmra.mxu0 %vm1067_vm1, %v4793_v22 }
 0x14f   : > { %v1608_v47 = vpop.f32.mrf.mxu2 }
 0x150   : > { %v1667_v54 = vadd.f32 %v1608_v47, %v1445_v45  ;;  %v1741_v49 = vpop.f32.mrf.mxu3 }
 0x151   : > { %v1388_v52 = vpop.f32.mrf.mxu1 }
 0x152   : > { %v1800_v10 = vadd.f32 %v1741_v49, %v1667_v54  ;;  %v1875_v20 = vpop.f32.mrf.mxu0  ;;  %v1446_v60 = vadd.f32 %v1388_v52, %v4495_v30 }
 0x154   : > { %v4805_v41 = vadd.f32 %v1873_v55, %v1800_v10 }
 0x157   : > { %v1610_v28 = vpop.f32.mrf.mxu2 }
 0x158   : > { %v1668_v33 = vadd.f32 %v1610_v28, %v1446_v60  ;;  %v1743_v1 = vpop.f32.mrf.mxu3 }
 0x159   : > { %v1391_v15 = vpop.f32.mrf.mxu1 }
 0x15a   : > { %v1801_v14 = vadd.f32 %v1743_v1, %v1668_v33  ;;  %v1878_v12 = vpop.f32.mrf.mxu0  ;;  %v1447_v30 = vadd.f32 %v1391_v15, %v4340_v32  ;;  %v3884_v32 = vld [vmem:[%s4077_s19 + $0x24] sm:$0xff] }
 0x15c   : > { %3562 = vmatmul.msk.bf16.vlgmr.msra.gmra.mxu1 %vm1067_vm1, %v4229_v24  ;;  %3583 = vmatmul.msk.bf16.vlgmr.msra.gmra.mxu2 %vm1067_vm1, %v3883_v43  ;;  %v4812_v31 = vadd.f32 %v1875_v20, %v1801_v14 }
 0x15d   : > { %3600 = vmatmul.msk.bf16.vlgmr.msra.gmra.mxu3 %vm1067_vm1, %v4232_v26  ;;  %3617 = vmatmul.msk.bf16.vlgmr.msra.gmra.mxu0 %vm1067_vm1, %v4258_v59 }
 0x15f   : > { %v1613_v57 = vpop.f32.mrf.mxu2 }
 0x160   : > { %v1669_v63 = vadd.f32 %v1613_v57, %v1447_v30  ;;  %v1746_v19 = vpop.f32.mrf.mxu3 }
 0x161   : > { %v1393_v44 = vpop.f32.mrf.mxu1 }
 0x162   : > { %v1802_v5 = vadd.f32 %v1746_v19, %v1669_v63  ;;  %v1880_v24 = vpop.f32.mrf.mxu0  ;;  %v1448_v45 = vadd.f32 %v1393_v44, %v4362_v56 }
 0x164   : > { %v4819_v55 = vadd.f32 %v1878_v12, %v1802_v5 }
 0x167   : > { %v1615_v47 = vpop.f32.mrf.mxu2 }
 0x168   : > { %v1670_v54 = vadd.f32 %v1615_v47, %v1448_v45  ;;  %v1748_v49 = vpop.f32.mrf.mxu3 }
 0x169   : > { %v1396_v26 = vpop.f32.mrf.mxu1 }
 0x16a   : > { %v1803_v52 = vadd.f32 %v1748_v49, %v1670_v54  ;;  %v1883_v10 = vpop.f32.mrf.mxu0  ;;  %v1449_v56 = vadd.f32 %v1396_v26, %v4393_v29  ;;  %v3885_v29 = vld [vmem:[%s4077_s19 + $0x30] sm:$0xff] }
 0x16c   : > { %3563 = vmatmul.msk.bf16.gmra.mxu1 %vm1067_vm1, %v4258_v59  ;;  %3584 = vmatmul.msk.bf16.gmra.mxu2 %vm1067_vm1, %v3884_v32  ;;  %v4826_v20 = vadd.f32 %v1880_v24, %v1803_v52 }
 0x16d   : > { %3601 = vmatmul.msk.bf16.gmra.mxu3 %vm1067_vm1, %v4261_v62  ;;  %3618 = vmatmul.msk.bf16.gmra.mxu0 %vm1067_vm1, %v4289_v37 }
 0x16f   : > { %v1618_v60 = vpop.f32.mrf.mxu2 }
 0x170   : > { %v1671_v28 = vadd.f32 %v1618_v60, %v1449_v56  ;;  %v1751_v33 = vpop.f32.mrf.mxu3 }
 0x171   : > { %v1398_v1 = vpop.f32.mrf.mxu1 }
 0x172   : > { %v1804_v15 = vadd.f32 %v1751_v33, %v1671_v28  ;;  %v1885_v59 = vpop.f32.mrf.mxu0  ;;  %v1450_v12 = vadd.f32 %v1398_v1, %v4414_v58  ;;  %v5530_v33 = vld [vmem:[#allocation8_spill] sm:$0xff] }
 0x174   : > { %v4833_v14 = vadd.f32 %v1883_v10, %v1804_v15 }
 0x177   : > { %v1620_v43 = vpop.f32.mrf.mxu2 }
 0x178   : > { %v1672_v30 = vadd.f32 %v1620_v43, %v1450_v12  ;;  %v1753_v57 = vpop.f32.mrf.mxu3 }
 0x179   : > { %v1401_v62 = vpop.f32.mrf.mxu1 }
 0x17a   : > { %v1805_v63 = vadd.f32 %v1753_v57, %v1672_v30  ;;  %v1888_v19 = vpop.f32.mrf.mxu0  ;;  %v1451_v58 = vadd.f32 %v1401_v62, %v4442_v40  ;;  %v3886_v40 = vld [vmem:[%s4077_s19 + $0x3c] sm:$0xff]  ;;  %v5532_v62 = vld [vmem:[#allocation20_spill] sm:$0xff] }
 0x17c   : > { %3564 = vmatmul.msk.bf16.gmra.mxu1 %vm1067_vm1, %v4289_v37  ;;  %3585 = vmatmul.msk.bf16.gmra.mxu2 %vm1067_vm1, %v3885_v29  ;;  %v4840_v44 = vadd.f32 %v1885_v59, %v1805_v63 }
 0x17d   : > { %3602 = vmatmul.msk.bf16.gmra.mxu3 %vm1067_vm1, %v4293_v42  ;;  %3619 = vmatmul.msk.bf16.gmra.mxu0 %vm1067_vm1, %v4320_v8 }
 0x17f   : > { %v1623_v5 = vpop.f32.mrf.mxu2 }
 0x180   : > { %v1673_v24 = vadd.f32 %v1623_v5, %v1451_v58  ;;  %v1756_v45 = vpop.f32.mrf.mxu3 }
 0x181   : > { %v1403_v47 = vpop.f32.mrf.mxu1 }
 0x182   : > { %v1806_v54 = vadd.f32 %v1756_v45, %v1673_v24  ;;  %v1890_v37 = vpop.f32.mrf.mxu0  ;;  %v1452_v26 = vadd.f32 %v1403_v47, %v4463_v6  ;;  %v5531_v6 = vld [vmem:[#allocation18_spill] sm:$0xff]  ;;  %v3887_v45 = vld [vmem:[%s4077_s19 + $0x48] sm:$0xff] }
 0x184   : > { %v4847_v49 = vadd.f32 %v1888_v19, %v1806_v54  ;;  %v5533_v54 = vld [vmem:[#allocation9_spill] sm:$0xff] }
 0x187   : > { %v1625_v52 = vpop.f32.mrf.mxu2 }
 0x188   : > { %v1674_v10 = vadd.f32 %v1625_v52, %v1452_v26  ;;  %v1758_v32 = vpop.f32.mrf.mxu3  ;;  %v5535_v26 = vld [vmem:[#allocation6_spill] sm:$0xff] }
 0x189   : > { %v1406_v42 = vpop.f32.mrf.mxu1 }
 0x18a   : > { %v1807_v56 = vadd.f32 %v1758_v32, %v1674_v10  ;;  %v1893_v60 = vpop.f32.mrf.mxu0  ;;  %v1453_v1 = vadd.f32 %v1406_v42, %v5531_v6  ;;  %v5536_v6 = vld [vmem:[#allocation7_spill] sm:$0xff] }
 0x18c   : > { %3565 = vmatmul.msk.bf16.gmra.mxu1 %vm1067_vm1, %v4320_v8  ;;  %3586 = vmatmul.msk.bf16.gmra.mxu2 %vm1067_vm1, %v3886_v40  ;;  %v4854_v28 = vadd.f32 %v1890_v37, %v1807_v56  ;;  %v5534_v37 = vld [vmem:[#allocation12_spill] sm:$0xff] }
 0x18d   : > { %3603 = vmatmul.msk.bf16.gmra.mxu3 %vm1067_vm1, %v4325_v16  ;;  %3620 = vmatmul.msk.bf16.gmra.mxu0 %vm1067_vm1, %v5530_v33 }
 0x18f   : > { %v1628_v15 = vpop.f32.mrf.mxu2 }
 0x190   : > { %v1675_v59 = vadd.f32 %v1628_v15, %v1453_v1  ;;  %v1761_v12 = vpop.f32.mrf.mxu3 }
 0x191   : > { %v1408_v43 = vpop.f32.mrf.mxu1 }
 0x192   : > { %v1808_v30 = vadd.f32 %v1761_v12, %v1675_v59  ;;  %v1895_v8 = vpop.f32.mrf.mxu0  ;;  %v1454_v63 = vadd.f32 %v1408_v43, %v5532_v62  ;;  %v3888_v62 = vld [vmem:[%s4077_s19 + $0x54] sm:$0xff] }
 0x194   : > { %v4861_v57 = vadd.f32 %v1893_v60, %v1808_v30 }
 0x197   : > { %v1630_v19 = vpop.f32.mrf.mxu2 }
 0x198   : > { %v1676_v29 = vadd.f32 %v1630_v19, %v1454_v63  ;;  %v1763_v58 = vpop.f32.mrf.mxu3  ;;  %v5537_v19 = vld [vmem:[#allocation13_spill] sm:$0xff] }
 0x199   : > { %v1411_v16 = vpop.f32.mrf.mxu1 }
 0x19a   : > { %v1809_v5 = vadd.f32 %v1763_v58, %v1676_v29  ;;  %v1898_v24 = vpop.f32.mrf.mxu0  ;;  %v1455_v52 = vadd.f32 %v1411_v16, %v5535_v26  ;;  %v5538_v29 = vld [vmem:[#allocation16_spill] sm:$0xff]  ;;  %v5539_v58 = vld [vmem:[#allocation10_spill] sm:$0xff] }
 0x19c   : > { %3566 = vmatmul.msk.bf16.gmra.mxu1 %vm1067_vm1, %v5530_v33  ;;  %3587 = vmatmul.msk.bf16.gmra.mxu2 %vm1067_vm1, %v3887_v45  ;;  %v4868_v47 = vadd.f32 %v1895_v8, %v1809_v5 }
 0x19d   : > { %3604 = vmatmul.msk.bf16.gmra.mxu3 %vm1067_vm1, %v5533_v54  ;;  %3621 = vmatmul.msk.bf16.gmra.mxu0 %vm1067_vm1, %v5534_v37 }
 0x19f   : > { %v1633_v10 = vpop.f32.mrf.mxu2 }
 0x1a0   : > { %v1677_v32 = vadd.f32 %v1633_v10, %v1455_v52  ;;  %v1766_v42 = vpop.f32.mrf.mxu3  ;;  %v5540_v10 = vld [vmem:[#allocation11_spill] sm:$0xff] }
 0x1a1   : > { %v1413_v56 = vpop.f32.mrf.mxu1 }
 0x1a2   : > { %v1810_v60 = vadd.f32 %v1766_v42, %v1677_v32  ;;  %v1900_v40 = vpop.f32.mrf.mxu0  ;;  %v1456_v1 = vadd.f32 %v1413_v56, %v5536_v6 }
 0x1a4   : > { %v4875_v33 = vadd.f32 %v1898_v24, %v1810_v60 }
 0x1a7   : > { %v1635_v15 = vpop.f32.mrf.mxu2 }
 0x1a8   : > { %v1678_v59 = vadd.f32 %v1635_v15, %v1456_v1  ;;  %v1768_v12 = vpop.f32.mrf.mxu3  ;;  %v3889_v15 = vld [vmem:[%s4077_s19 + $0x60] sm:$0xff] }
 0x1a9   : > { %v1416_v43 = vpop.f32.mrf.mxu1 }
 0x1aa   : > { %v1811_v30 = vadd.f32 %v1768_v12, %v1678_v59  ;;  %v1903_v8 = vpop.f32.mrf.mxu0  ;;  %v1457_v16 = vadd.f32 %v1416_v43, %v5539_v58  ;;  %v5541_v12 = vld [vmem:[#allocation17_spill] sm:$0xff]  ;;  %v5542_v43 = vld [vmem:[#allocation22_spill] sm:$0xff] }
 0x1ac   : > { %3567 = vmatmul.msk.bf16.gmra.mxu1 %vm1067_vm1, %v5534_v37  ;;  %3588 = vmatmul.msk.bf16.gmra.mxu2 %vm1067_vm1, %v3888_v62  ;;  %v4882_v63 = vadd.f32 %v1900_v40, %v1811_v30  ;;  %v5543_v30 = vld [vmem:[#allocation14_spill] sm:$0xff] }
 0x1ad   : > { %3605 = vmatmul.msk.bf16.gmra.mxu3 %vm1067_vm1, %v5537_v19  ;;  %3622 = vmatmul.msk.bf16.gmra.mxu0 %vm1067_vm1, %v5538_v29 }
 0x1af   : > { %v1638_v5 = vpop.f32.mrf.mxu2 }
 0x1b0   : > { %v1679_v24 = vadd.f32 %v1638_v5, %v1457_v16  ;;  %v1771_v45 = vpop.f32.mrf.mxu3 }
 0x1b1   : > { %v1418_v54 = vpop.f32.mrf.mxu1 }
 0x1b2   : > { %v1812_v26 = vadd.f32 %v1771_v45, %v1679_v24  ;;  %v1905_v37 = vpop.f32.mrf.mxu0  ;;  %v1458_v32 = vadd.f32 %v1418_v54, %v5540_v10  ;;  %v5544_v45 = vld [vmem:[#allocation15_spill] sm:$0xff] }
 0x1b4   : > { %v4889_v52 = vadd.f32 %v1903_v8, %v1812_v26 }
 0x1b7   : > { %v1640_v42 = vpop.f32.mrf.mxu2 }
 0x1b8   : > { %v1680_v56 = vadd.f32 %v1640_v42, %v1458_v32  ;;  %v1773_v60 = vpop.f32.mrf.mxu3 }
 0x1b9   : > { %v1421_v40 = vpop.f32.mrf.mxu1 }
 0x1ba   : > { %v1813_v6 = vadd.f32 %v1773_v60, %v1680_v56  ;;  %v1908_v1 = vpop.f32.mrf.mxu0  ;;  %v1459_v8 = vadd.f32 %v1421_v40, %v5543_v30  ;;  %v3890_v60 = vld [vmem:[%s4077_s19 + $0x6c] sm:$0xff] }
 0x1bc   : > { %3568 = vmatmul.msk.bf16.gmra.mxu1 %vm1067_vm1, %v5538_v29  ;;  %3589 = vmatmul.msk.bf16.gmra.mxu2 %vm1067_vm1, %v3889_v15  ;;  %v4896_v59 = vadd.f32 %v1905_v37, %v1813_v6  ;;  %v5545_v6 = vld [vmem:[#allocation19_spill] sm:$0xff] }
 0x1bd   : > { %3606 = vmatmul.msk.bf16.gmra.mxu3 %vm1067_vm1, %v5541_v12  ;;  %3623 = vmatmul.msk.bf16.gmra.mxu0 %vm1067_vm1, %v5542_v43 }
 0x1bf   : > { %v1643_v62 = vpop.f32.mrf.mxu2 }
 0x1c0   : > { %v1681_v19 = vadd.f32 %v1643_v62, %v1459_v8  ;;  %v1776_v58 = vpop.f32.mrf.mxu3 }
 0x1c1   : > { %v1423_v16 = vpop.f32.mrf.mxu1 }
 0x1c2   : > { %v1814_v5 = vadd.f32 %v1776_v58, %v1681_v19  ;;  %v1910_v29 = vpop.f32.mrf.mxu0  ;;  %v1460_v54 = vadd.f32 %v1423_v16, %v5544_v45  ;;  %v5546_v58 = vld [vmem:[#allocation21_spill] sm:$0xff] }
 0x1c4   : > { %v4903_v24 = vadd.f32 %v1908_v1, %v1814_v5 }
 0x1c7   : > { %v1645_v26 = vpop.f32.mrf.mxu2 }
 0x1c8   : > { %v1682_v37 = vadd.f32 %v1645_v26, %v1460_v54  ;;  %v1778_v10 = vpop.f32.mrf.mxu3 }
 0x1c9   : > { %v1426_v32 = vpop.f32.mrf.mxu1 }
 0x1ca   : > { %v1815_v42 = vadd.f32 %v1778_v10, %v1682_v37  ;;  %v1913_v56 = vpop.f32.mrf.mxu0  ;;  %v1461_v1 = vadd.f32 %v1426_v32, %v5545_v6  ;;  %v3891_v37 = vld [vmem:[%s4077_s19 + $0x78] sm:$0xff]  ;;  %v5547_v32 = vld [vmem:[#allocation23_spill] sm:$0xff] }
 0x1cc   : > { %3569 = vmatmul.msk.bf16.gmra.mxu1 %vm1067_vm1, %v5542_v43  ;;  %3590 = vmatmul.msk.bf16.gmra.mxu2 %vm1067_vm1, %v3890_v60  ;;  %v4910_v40 = vadd.f32 %v1910_v29, %v1815_v42 }
 0x1cd   : > { %3607 = vmatmul.msk.bf16.gmra.mxu3 %vm1067_vm1, %v4520_v11  ;;  %3624 = vmatmul.msk.bf16.gmra.mxu0 %vm1067_vm1, %v4553_v9 }
 0x1cf   : > { %v1648_v15 = vpop.f32.mrf.mxu2 }
 0x1d0   : > { %v1683_v12 = vadd.f32 %v1648_v15, %v1461_v1  ;;  %v1781_v30 = vpop.f32.mrf.mxu3 }
 0x1d1   : > { %v1428_v8 = vpop.f32.mrf.mxu1 }
 0x1d2   : > { %v1816_v62 = vadd.f32 %v1781_v30, %v1683_v12  ;;  %v1915_v43 = vpop.f32.mrf.mxu0  ;;  %v1462_v16 = vadd.f32 %v1428_v8, %v5546_v58  ;;  %v5548_v8 = vld [vmem:[#allocation24_spill] sm:$0xff] }
 0x1d4   : > { %v4917_v19 = vadd.f32 %v1913_v56, %v1816_v62 }
 0x1d7   : > { %v1650_v5 = vpop.f32.mrf.mxu2 }
 0x1d8   : > { %v1684_v29 = vadd.f32 %v1650_v5, %v1462_v16  ;;  %v1783_v45 = vpop.f32.mrf.mxu3 }
 0x1d9   : > { %v1970_v11 = vpop.f32.mrf.mxu1 }
 0x1da   : > { %v1817_v54 = vadd.f32 %v1783_v45, %v1684_v29  ;;  %v2367_v26 = vpop.f32.mrf.mxu0  ;;  %v2050_v42 = vadd.f32 %v1970_v11, %v5547_v32 }
 0x1dc   : > { %3570 = vmatmul.msk.bf16.gmra.mxu1 %vm1067_vm1, %v4553_v9  ;;  %3591 = vmatmul.msk.bf16.gmra.mxu2 %vm1067_vm1, %v3891_v37  ;;  %v4924_v10 = vadd.f32 %v1915_v43, %v1817_v54  ;;  %v4934_v9 = vld [vmem:[%s5478_s2] ss:$0 sm:$0xff]  ;;  %v3892_v37 = vld [vmem:[%s4077_s19 + $0x84] sm:$0xff] }
 0x1dd   : > { %3608 = vmatmul.msk.bf16.gmra.mxu3 %vm1067_vm1, %v4558_v36  ;;  %3625 = vmatmul.msk.bf16.gmra.mxu0 %vm1067_vm1, %v4592_v35 }
 0x1df   : > { %v2103_v56 = vpop.f32.mrf.mxu2 }
 0x1e0   : > { %v2183_v60 = vadd.f32 %v2103_v56, %v2050_v42  ;;  %v2235_v6 = vpop.f32.mrf.mxu3 }
 0x1e1   : > { %v1972_v1 = vpop.f32.mrf.mxu1 }
 0x1e2   : > { %v2315_v15 = vadd.f32 %v2235_v6, %v2183_v60  ;;  %v2369_v12 = vpop.f32.mrf.mxu0  ;;  %v2051_v62 = vadd.f32 %v1972_v1, %v5548_v8 }
 0x1e4   : > { %v2447_v30 = vadd.f32 %v2367_v26, %v2315_v15 }
 0x1e6   : > { %v4937_v36 = vadd.f32 %v4934_v9, %v2447_v30 }
 0x1e7   : > { %v2105_v43 = vpop.f32.mrf.mxu2 }
 0x1e8   : > { %v3633_v58 = vmul.f32 -1.442695, %v4937_v36  ;;  %v2184_v16 = vadd.f32 %v2105_v43, %v2051_v62  ;;  %v2237_v5 = vpop.f32.mrf.mxu3 }
 0x1e9   : > { %v1975_v29 = vpop.f32.mrf.mxu1 }
 0x1ea   : > { %3751 = vpow2.f32 %v3633_v58  ;;  %v2316_v45 = vadd.f32 %v2237_v5, %v2184_v16  ;;  %v2372_v11 = vpop.f32.mrf.mxu0  ;;  %v2052_v32 = vadd.f32 %v1975_v29, %v4587_v17 }
 0x1ec   : > { %v2448_v54 = vadd.f32 %v2369_v12, %v2316_v45  ;;  %3571 = vmatmul.msk.bf16.gmra.mxu1 %vm1067_vm1, %v4592_v35  ;;  %3592 = vmatmul.msk.bf16.gmra.mxu2 %vm1067_vm1, %v3892_v37 }
 0x1ed   : > { %3609 = vmatmul.msk.bf16.gmra.mxu3 %vm1067_vm1, %v4595_v0  ;;  %3626 = vmatmul.msk.bf16.gmra.mxu0 %vm1067_vm1, %v4632_v51 }
 0x1ee   : > { %v4950_v26 = vadd.f32 %v4934_v9, %v2448_v54 }
 0x1ef   : > { %v2108_v42 = vpop.f32.mrf.mxu2 }
 0x1f0   : > { %v3752_v56 = vpop.eup %3751  ;;  %v3634_v60 = vmul.f32 -1.442695, %v4950_v26  ;;  %v2185_v6 = vadd.f32 %v2108_v42, %v2052_v32  ;;  %v2240_v35 = vpop.f32.mrf.mxu3 }
 0x1f1   : > { %v2678_v1 = vadd.f32 1.0, %v3752_v56  ;;  %v1977_v15 = vpop.f32.mrf.mxu1  ;;  %v5549_v56 = vld [vmem:[#allocation27_spill] sm:$0xff] }
 0x1f2   : > { %3753 = vpow2.f32 %v3634_v60  ;;  %v2317_v12 = vadd.f32 %v2240_v35, %v2185_v6  ;;  %v2374_v30 = vpop.f32.mrf.mxu0  ;;  %v2053_v62 = vadd.f32 %v1977_v15, %v4605_v27  ;;  %v5550_v35 = vld [vmem:[#allocation29_spill] sm:$0xff] }
 0x1f3   : > { %3755 = vrcp.f32 %v2678_v1  ;;  %v2719_v60 = vand.u32 2147483647, %v2678_v1  ;;  %v2721_v6 = vand.u32 2147483648, %v2678_v1  ;;  %vm2715_vm9 = vweird.f32 %v2678_v1 }
 0x1f4   : > { %v2449_v0 = vadd.f32 %v2372_v11, %v2317_v12 }
 0x1f5   : > { %vm2720_vm11 = vcmp.eq.f32.partialorder %v2719_v60, 8.507059e+37 }
 0x1f6   : > { %v4955_v8 = vadd.f32 %v4934_v9, %v2449_v0 }
 0x1f7   : > { %v2110_v43 = vpop.f32.mrf.mxu2 }
 0x1f8   : > { %v3754_v17 = vpop.eup %3753  ;;  %v3635_v58 = vmul.f32 -1.442695, %v4955_v8  ;;  %v2186_v16 = vadd.f32 %v2110_v43, %v2053_v62  ;;  %v2242_v5 = vpop.f32.mrf.mxu3 }
 0x1f9   : > { %v3756_v29 = vpop.eup %3755  ;;  %v4959_v45 = vadd.f32 1.0, %v3754_v17  ;;  %v1980_v54 = vpop.f32.mrf.mxu1 }
 0x1fa   : > { %v2711_v37 = vmul.f32 %v3756_v29, %v2678_v1  ;;  %3757 = vpow2.f32 %v3635_v58  ;;  %v2318_v32 = vadd.f32 %v2242_v5, %v2186_v16  ;;  %v2377_v11 = vpop.f32.mrf.mxu0  ;;  %vm2716_vm8 = vweird.f32 %v3756_v29 }
 0x1fb   : > { %3759 = vrcp.f32 %v4959_v45  ;;  %vm2717_vm10 = vmor %vm2715_vm9, %vm2716_vm8  ;;  %v2722_v5 = vor.u32 1.1754944e-38, %v2721_v6  ;;  %vm2730_vm13 = vweird.f32 %v4959_v45 }
 0x1fc   : > { %v2712_v42 = vsub.f32 1.0, %v2711_v37  ;;  %v2450_v27 = vadd.f32 %v2374_v30, %v2318_v32  ;;  %3572 = vmatmul.msk.bf16.gmra.mxu1 %vm1067_vm1, %v4632_v51  ;;  %3593 = vmatmul.msk.bf16.gmra.mxu2 %vm1067_vm1, %v5549_v56  ;;  %v5551_v30 = vld [vmem:[#allocation25_spill] sm:$0xff] }
 0x1fd   : > { %3610 = vmatmul.msk.bf16.gmra.mxu3 %vm1067_vm1, %v4635_v23  ;;  %3627 = vmatmul.msk.bf16.gmra.mxu0 %vm1067_vm1, %v5550_v35  ;;  %v2054_v0 = vadd.f32 %v1980_v54, %v5551_v30 }
 0x1fe   : > { %v2713_v15 = vmul.f32 %v3756_v29, %v2712_v42  ;;  %v4972_v12 = vadd.f32 %v4934_v9, %v2450_v27 }
 0x1ff   : > { %v2113_v51 = vpop.f32.mrf.mxu2 }
 0x200   : > { %v3758_v62 = vpop.eup %3757  ;;  %v2714_v43 = vadd.f32 %v3756_v29, %v2713_v15  ;;  %v3636_v17 = vmul.f32 -1.442695, %v4972_v12  ;;  %v2187_v58 = vadd.f32 %v2113_v51, %v2054_v0  ;;  %v2245_v23 = vpop.f32.mrf.mxu3  ;;  %v2736_v0 = vand.u32 2147483648, %v4959_v45  ;;  %v5552_v51 = vld [vmem:[#allocation26_spill] sm:$0xff] }
 0x201   : > { %v3760_v16 = vpop.eup %3759  ;;  %v4978_v37 = vadd.f32 1.0, %v3758_v62  ;;  %v1982_v32 = vpop.f32.mrf.mxu1 }
 0x202   : > { %v2718_v42 = vsel %vm2717_vm10, %v3756_v29, %v2714_v43  ;;  %v2726_v54 = vmul.f32 %v3760_v16, %v4959_v45  ;;  %3761 = vpow2.f32 %v3636_v17  ;;  %v2379_v27 = vpop.f32.mrf.mxu0  ;;  %v2319_v30 = vadd.f32 %v2245_v23, %v2187_v58 }
 0x203   : > { %v2723_v56 = vsel %vm2720_vm11, %v2722_v5, %v2718_v42  ;;  %3763 = vrcp.f32 %v4978_v37  ;;  %vm2731_vm12 = vweird.f32 %v3760_v16  ;;  %v2734_v29 = vand.u32 2147483647, %v4959_v45 }
 0x204   : > { %v3190_v1 = vmul.f32 %v2723_v56, %v4937_v36  ;;  %v2727_v15 = vsub.f32 1.0, %v2726_v54  ;;  %v2451_v60 = vadd.f32 %v2377_v11, %v2319_v30  ;;  %v2055_v62 = vadd.f32 %v1982_v32, %v5552_v51  ;;  %vm2732_vm14 = vmor %vm2730_vm13, %vm2731_vm12 }
 0x205   : > { %v2737_v42 = vor.u32 1.1754944e-38, %v2736_v0  ;;  %vm2735_vm15 = vcmp.eq.f32.partialorder %v2734_v29, 8.507059e+37  ;;  %v5553_v0 = vld [vmem:[#allocation31_spill] sm:$0xff]  ;;  %vm2745_vm2 = vweird.f32 %v4978_v37 }
 0x206   : > { %3222 = vst [vmem:[%s4984_s9] sm:$0xff] %v3190_v1  ;;  %v2728_v6 = vmul.f32 %v3760_v16, %v2727_v15  ;;  %v4991_v36 = vadd.f32 %v4934_v9, %v2451_v60 }
 0x207   : > { %v2115_v43 = vpop.f32.mrf.mxu2 }
 0x208   : > { %v3762_v17 = vpop.eup %3761  ;;  %v2729_v5 = vadd.f32 %v3760_v16, %v2728_v6  ;;  %v2247_v58 = vpop.f32.mrf.mxu3  ;;  %v2188_v56 = vadd.f32 %v2115_v43, %v2055_v62  ;;  %v3637_v32 = vmul.f32 -1.442695, %v4991_v36  ;;  %v5554_v62 = vld [vmem:[#allocation28_spill] sm:$0xff] }
 0x209   : > { %v3764_v23 = vpop.eup %3763  ;;  %v4993_v54 = vadd.f32 1.0, %v3762_v17  ;;  %v1985_v1 = vpop.f32.mrf.mxu1 }
 0x20a   : > { %v2733_v15 = vsel %vm2732_vm14, %v3760_v16, %v2729_v5  ;;  %v2741_v11 = vmul.f32 %v3764_v23, %v4978_v37  ;;  %v2382_v30 = vpop.f32.mrf.mxu0  ;;  %v2751_v16 = vand.u32 2147483648, %v4978_v37  ;;  %v2320_v29 = vadd.f32 %v2247_v58, %v2188_v56 }
 0x20b   : > { %v2738_v45 = vsel %vm2735_vm15, %v2737_v42, %v2733_v15  ;;  %3765 = vrcp.f32 %v4993_v54  ;;  %vm2746_vm0 = vweird.f32 %v3764_v23  ;;  %v2056_v43 = vadd.f32 %v1985_v1, %v5554_v62 }
 0x20c   : > { %v3191_v6 = vmul.f32 %v2738_v45, %v4950_v26  ;;  %v2742_v60 = vsub.f32 1.0, %v2741_v11  ;;  %3767 = vpow2.f32 %v3637_v32  ;;  %3573 = vmatmul.msk.bf16.gmra.mxu1 %vm1067_vm1, %v5550_v35  ;;  %3594 = vmatmul.msk.bf16.gmra.mxu2 %vm1067_vm1, %v5553_v0  ;;  %v2749_v26 = vand.u32 2147483647, %v4978_v37  ;;  %vm2747_vm3 = vmor %vm2745_vm2, %vm2746_vm0 }
 0x20d   : > { %3611 = vmatmul.msk.bf16.gmra.mxu3 %vm1067_vm1, %v4678_v61  ;;  %3628 = vmatmul.msk.bf16.gmra.mxu0 %vm1067_vm1, %v4715_v53  ;;  %v2452_v35 = vadd.f32 %v2379_v27, %v2320_v29  ;;  %v2752_v61 = vor.u32 1.1754944e-38, %v2751_v16  ;;  %v2764_v62 = vand.u32 2147483647, %v4993_v54  ;;  %vm2760_vm8 = vweird.f32 %v4993_v54 }
 0x20e   : > { %3223 = vst [vmem:[%s4984_s9 + $0x8] sm:$0xff] %v3191_v6  ;;  %v2743_v51 = vmul.f32 %v3764_v23, %v2742_v60  ;;  %vm2750_vm4 = vcmp.eq.f32.partialorder %v2749_v26, 8.507059e+37 }
 0x20f   : > { %v2118_v17 = vpop.f32.mrf.mxu2  ;;  %v5013_v15 = vadd.f32 %v4934_v9, %v2452_v35  ;;  %v5555_v35 = vld [vmem:[#allocation30_spill] sm:$0xff]  ;;  %vm2765_vm10 = vcmp.eq.f32.partialorder %v2764_v62, 8.507059e+37 }
 0x210   : > { %v2744_v5 = vadd.f32 %v3764_v23, %v2743_v51  ;;  %v2189_v42 = vadd.f32 %v2118_v17, %v2056_v43  ;;  %v2250_v58 = vpop.f32.mrf.mxu3  ;;  %v2766_v43 = vand.u32 2147483648, %v4993_v54  ;;  %v785_v62 = vld [vmem:[%s4077_s19 + $0xc0] sm:$0xe] }
 0x211   : > { %v3766_v56 = vpop.eup %3765  ;;  %v1987_v11 = vpop.f32.mrf.mxu1  ;;  %v3638_v37 = vmul.f32 -1.442695, %v5013_v15 }
 0x212   : > { %v3768_v32 = vpop.eup %3767  ;;  %v2748_v45 = vsel %vm2747_vm3, %v3764_v23, %v2744_v5  ;;  %v2756_v1 = vmul.f32 %v3766_v56, %v4993_v54  ;;  %v2321_v27 = vadd.f32 %v2250_v58, %v2189_v42  ;;  %v2384_v6 = vpop.f32.mrf.mxu0  ;;  %vm2761_vm5 = vweird.f32 %v3766_v56 }
 0x213   : > { %v2753_v60 = vsel %vm2750_vm4, %v2752_v61, %v2748_v45  ;;  %v5016_v0 = vadd.f32 1.0, %v3768_v32  ;;  %v2057_v17 = vadd.f32 %v1987_v11, %v5555_v35  ;;  %vm2762_vm9 = vmor %vm2760_vm8, %vm2761_vm5  ;;  %v2767_v61 = vor.u32 1.1754944e-38, %v2766_v43 }
 0x214   : > { %v3192_v29 = vmul.f32 %v2753_v60, %v4955_v8  ;;  %v2757_v16 = vsub.f32 1.0, %v2756_v1  ;;  %v2453_v51 = vadd.f32 %v2382_v30, %v2321_v27 }
 0x215   : > { %3769 = vrcp.f32 %v5016_v0  ;;  %vm2775_vm12 = vweird.f32 %v5016_v0 }
 0x216   : > { %3224 = vst [vmem:[%s4984_s9 + $0x10] sm:$0xff] %v3192_v29  ;;  %v2758_v23 = vmul.f32 %v3766_v56, %v2757_v16  ;;  %3771 = vpow2.f32 %v3638_v37  ;;  %v5025_v26 = vadd.f32 %v4934_v9, %v2453_v51 }
 0x217   : > { %v2120_v5 = vpop.f32.mrf.mxu2 }
 0x218   : > { %v2759_v42 = vadd.f32 %v3766_v56, %v2758_v23  ;;  %v3639_v8 = vmul.f32 -1.442695, %v5025_v26  ;;  %v2190_v30 = vadd.f32 %v2120_v5, %v2057_v17  ;;  %v2252_v58 = vpop.f32.mrf.mxu3  ;;  %v5556_v23 = vld [vmem:[#allocation33_spill] sm:$0xff] }
 0x219   : > { %v1990_v32 = vpop.f32.mrf.mxu1 }
 0x21a   : > { %v2763_v45 = vsel %vm2762_vm9, %v3766_v56, %v2759_v42  ;;  %3773 = vpow2.f32 %v3639_v8  ;;  %v2322_v1 = vadd.f32 %v2252_v58, %v2190_v30  ;;  %v2387_v27 = vpop.f32.mrf.mxu0  ;;  %v3407_v58 = vrot.slane %v785_v62, 9 }
 0x21b   : > { %v3770_v11 = vpop.eup %3769  ;;  %v2768_v60 = vsel %vm2765_vm10, %v2767_v61, %v2763_v45 }
 0x21c   : > { %v3772_v37 = vpop.eup %3771  ;;  %v3193_v54 = vmul.f32 %v2768_v60, %v4972_v12  ;;  %v2771_v29 = vmul.f32 %v3770_v11, %v5016_v0  ;;  %v2454_v16 = vadd.f32 %v2384_v6, %v2322_v1  ;;  %3574 = vmatmul.msk.bf16.gmra.mxu1 %vm1067_vm1, %v4715_v53  ;;  %3595 = vmatmul.msk.bf16.gmra.mxu2 %vm1067_vm1, %v4729_v38  ;;  %v2779_v53 = vand.u32 2147483647, %v5016_v0 }
 0x21d   : > { %v5037_v56 = vadd.f32 1.0, %v3772_v37  ;;  %3612 = vmatmul.msk.bf16.gmra.mxu3 %vm1067_vm1, %v4718_v3  ;;  %3629 = vmatmul.msk.bf16.gmra.mxu0 %vm1067_vm1, %v4757_v21  ;;  %v2058_v6 = vadd.f32 %v1990_v32, %v4709_v46  ;;  %v2781_v38 = vand.u32 2147483648, %v5016_v0  ;;  %v958_v3 = vrot.slane %v5556_v23, 5 }
 0x21e   : > { %3225 = vst [vmem:[%s4984_s9 + $0x18] sm:$0xff] %v3193_v54  ;;  %v2772_v51 = vsub.f32 1.0, %v2771_v29  ;;  %v5045_v12 = vadd.f32 %v4934_v9, %v2454_v16  ;;  %vm2776_vm11 = vweird.f32 %v3770_v11  ;;  %vm2780_vm14 = vcmp.eq.f32.partialorder %v2779_v53, 8.507059e+37 }
 0x21f   : > { %3775 = vrcp.f32 %v5037_v56  ;;  %v2123_v43 = vpop.f32.mrf.mxu2  ;;  %vm2777_vm13 = vmor %vm2775_vm12, %vm2776_vm11  ;;  %v2782_v1 = vor.u32 1.1754944e-38, %v2781_v38  ;;  %v960_v54 = vrot.slane %v958_v3, 4  ;;  %v961_v29 = vrot.slane %v4755_v48, 5 }
 0x220   : > { %v3774_v35 = vpop.eup %3773  ;;  %v2773_v17 = vmul.f32 %v3770_v11, %v2772_v51  ;;  %v3640_v5 = vmul.f32 -1.442695, %v5045_v12  ;;  %v2191_v42 = vadd.f32 %v2123_v43, %v2058_v6  ;;  %v2255_v8 = vpop.f32.mrf.mxu3  ;;  %v2794_v6 = vand.u32 2147483647, %v5037_v56 }
 0x221   : > { %v5054_v30 = vadd.f32 1.0, %v3774_v35  ;;  %v1992_v46 = vpop.f32.mrf.mxu1  ;;  %v5062_v0 = vsel %vm4180_vm7, %v3407_v58, %v958_v3  ;;  %v2796_v48 = vand.u32 2147483648, %v5037_v56  ;;  %vm2790_vm15 = vweird.f32 %v5037_v56 }
 0x222   : > { %v2774_v61 = vadd.f32 %v3770_v11, %v2773_v17  ;;  %3777 = vpow2.f32 %v3640_v5  ;;  %v2323_v32 = vadd.f32 %v2255_v8, %v2191_v42  ;;  %v2389_v45 = vpop.f32.mrf.mxu0  ;;  %v314_v42 = vld [vmem:[%s4077_s19 + $0xcc] sm:$0xf]  ;;  %vm5079_vm0 = vcmp.eq.f32.partialorder %v2794_v6, 8.507059e+37 }
 0x223   : > { %3779 = vrcp.f32 %v5054_v30  ;;  %v746_v6 = vshrl.u32 %v314_v42, 16  ;;  %vm2805_vm4 = vweird.f32 %v5054_v30 }
 0x224   : > { %v2778_v60 = vsel %vm2777_vm13, %v3770_v11, %v2774_v61  ;;  %v2455_v37 = vadd.f32 %v2387_v27, %v2323_v32  ;;  %v5557_v27 = vld [vmem:[#allocation32_spill] sm:$0xff] }
 0x225   : > { %v3776_v16 = vpop.eup %3775  ;;  %v2783_v51 = vsel %vm2780_vm14, %v2782_v1, %v2778_v60  ;;  %v2059_v11 = vadd.f32 %v1992_v46, %v5557_v27 }
 0x226   : > { %v3194_v62 = vmul.f32 %v2783_v51, %v4991_v36  ;;  %v2786_v53 = vmul.f32 %v3776_v16, %v5037_v56  ;;  %v5067_v38 = vadd.f32 %v4934_v9, %v2455_v37  ;;  %v5075_v36 = vsel %vm4180_vm7, %v960_v54, %v961_v29  ;;  %v5090_v54 = vld [vmem:[%s4077_s19 + $0xd0] sm:$0xf] }
 0x227   : > { %v2125_v43 = vpop.f32.mrf.mxu2  ;;  %vm2791_vm2 = vweird.f32 %v3776_v16  ;;  %v2797_v29 = vor.u32 1.1754944e-38, %v2796_v48  ;;  %v2811_v51 = vand.u32 2147483648, %v5054_v30  ;;  %v2809_v48 = vand.u32 2147483647, %v5054_v30 }
 0x228   : > { %v3778_v23 = vpop.eup %3777  ;;  %3226 = vst [vmem:[%s4984_s9 + $0x20] sm:$0xff] %v3194_v62  ;;  %v2787_v35 = vsub.f32 1.0, %v2786_v53  ;;  %v3641_v17 = vmul.f32 -1.442695, %v5067_v38  ;;  %v2192_v3 = vadd.f32 %v2125_v43, %v2059_v11  ;;  %v2257_v5 = vpop.f32.mrf.mxu3  ;;  %v749_v11 = vshll.u32 %v314_v42, 16  ;;  %vm2792_vm3 = vmor %vm2790_vm15, %vm2791_vm2 }
 0x229   : > { %v3780_v8 = vpop.eup %3779  ;;  %v5083_v58 = vadd.f32 1.0, %v3778_v23  ;;  %v1995_v61 = vpop.f32.mrf.mxu1  ;;  %v759_v43 = vshrl.u32 %v5090_v54, 16  ;;  %vm2810_vm9 = vcmp.eq.f32.partialorder %v2809_v48, 8.507059e+37 }
 0x22a   : > { %v2788_v1 = vmul.f32 %v3776_v16, %v2787_v35  ;;  %v2801_v60 = vmul.f32 %v3780_v8, %v5054_v30  ;;  %3781 = vpow2.f32 %v3641_v17  ;;  %v5087_v37 = vpop.f32.mrf.mxu0  ;;  %v2324_v27 = vadd.f32 %v2257_v5, %v2192_v3 }
 0x22b   : > { %3783 = vrcp.f32 %v5083_v58  ;;  %vm2806_vm5 = vweird.f32 %v3780_v8  ;;  %v2812_v17 = vor.u32 1.1754944e-38, %v2811_v51  ;;  %v2060_v3 = vadd.f32 %v1995_v61, %v4751_v4 }
 0x22c   : > { %v2789_v62 = vadd.f32 %v3776_v16, %v2788_v1  ;;  %v2802_v53 = vsub.f32 1.0, %v2801_v60  ;;  %3575 = vmatmul.msk.bf16.gmra.mxu1 %vm1067_vm1, %v4757_v21  ;;  %3596 = vmatmul.msk.bf16.gmra.mxu2 %vm1067_vm1, %v4771_v13  ;;  %v755_v21 = vshll.u32 %v5090_v54, 16  ;;  %v2456_v35 = vadd.f32 %v2389_v45, %v2324_v27  ;;  %vm2807_vm8 = vmor %vm2805_vm4, %vm2806_vm5 }
 0x22d   : > { %3613 = vmatmul.msk.bf16.gmra.mxu3 %vm1067_vm1, %v4759_v50  ;;  %3630 = vmatmul.msk.bf16.gmra.mxu0 %vm1067_vm1, %v4790_v39  ;;  %v748_v50 = vrot.slane %v746_v6, 4  ;;  %v761_v51 = vrot.slane %v759_v43, 4  ;;  %v2826_v48 = vand.u32 2147483648, %v5083_v58  ;;  %vm2820_vm11 = vweird.f32 %v5083_v58 }
 0x22e   : > { %v2793_v13 = vsel %vm2792_vm3, %v3776_v16, %v2789_v62  ;;  %v2803_v23 = vmul.f32 %v3780_v8, %v2802_v53  ;;  %v5114_v32 = vadd.f32 %v4934_v9, %v2456_v35  ;;  %v751_v62 = vrot.slane %v749_v11, 5  ;;  %v5126_v11 = vld [vmem:[%s4077_s19 + $0xd4] sm:$0x1] }
 0x22f   : > { %v2798_v56 = vsel %vm5079_vm0, %v2797_v29, %v2793_v13  ;;  %v2128_v5 = vpop.f32.mrf.mxu2  ;;  %v5120_v29 = vrot.slane %v755_v21, 5  ;;  %v2824_v13 = vand.u32 2147483647, %v5083_v58  ;;  %v1953_v21 = vunpack.c.l.b16 %v5075_v36 }
 0x230   : > { %v3782_v42 = vpop.eup %3781  ;;  %v3195_v1 = vmul.f32 %v2798_v56, %v5013_v15  ;;  %v2804_v60 = vadd.f32 %v3780_v8, %v2803_v23  ;;  %v2260_v16 = vpop.f32.mrf.mxu3  ;;  %v2193_v4 = vadd.f32 %v2128_v5, %v2060_v3  ;;  %v3642_v53 = vmul.f32 -1.442695, %v5114_v32 }
 0x231   : > { %v3784_v45 = vpop.eup %3783  ;;  %v5118_v46 = vadd.f32 1.0, %v3782_v42  ;;  %v1997_v61 = vpop.f32.mrf.mxu1  ;;  %v752_v35 = vor.u32 %v751_v62, %v748_v50  ;;  %v762_v56 = vor.u32 %v761_v51, %v5120_v29  ;;  %v765_v3 = vshll.u32 %v5126_v11, 16 }
 0x232   : > { %3227 = vst [vmem:[%s4984_s9 + $0x28] sm:$0xff] %v3195_v1  ;;  %v2808_v15 = vsel %vm2807_vm8, %v3780_v8, %v2804_v60  ;;  %v2816_v6 = vmul.f32 %v3784_v45, %v5083_v58  ;;  %v2394_v27 = vpop.f32.mrf.mxu0  ;;  %v2325_v23 = vadd.f32 %v2260_v16, %v2193_v4  ;;  %vm2821_vm10 = vweird.f32 %v3784_v45  ;;  %v786_v60 = vld [vmem:[%s4077_s19 + $0xcc] sm:$0xe] }
 0x233   : > { %v2813_v30 = vsel %vm2810_vm9, %v2812_v17, %v2808_v15  ;;  %3785 = vrcp.f32 %v5118_v46  ;;  %v2061_v5 = vadd.f32 %v1997_v61, %v4768_v25  ;;  %v5560_v42 = vunpack.c.l.b16 %v5062_v0  ;;  %vm2822_vm13 = vmor %vm2820_vm11, %vm2821_vm10 }
 0x234   : > { %v3196_v43 = vmul.f32 %v2813_v30, %v5025_v26  ;;  %v2817_v8 = vsub.f32 1.0, %v2816_v6  ;;  %3787 = vpow2.f32 %v3642_v53  ;;  %v2457_v26 = vadd.f32 %v5087_v37, %v2325_v23 }
 0x235   : > { %v5141_v1 = vpack.c.b16 %v1953_v21, %v5560_v42  ;;  %v965_v50 = vrot.slane %v5090_v54, 5  ;;  %vm5145_vm12 = vcmp.eq.f32.partialorder %v2824_v13, 8.507059e+37  ;;  %v2827_v4 = vor.u32 1.1754944e-38, %v2826_v48 }
 0x236   : > { %3228 = vst [vmem:[%s4984_s9 + $0x30] sm:$0xff] %v3196_v43  ;;  %v2818_v17 = vmul.f32 %v3784_v45, %v2817_v8  ;;  %v5150_v58 = vadd.f32 %v4934_v9, %v2457_v26  ;;  %v753_v0 = vrot.slane %v752_v35, 4  ;;  %v763_v15 = vrot.slane %v762_v56, 4 }
 0x237   : > { %v2130_v36 = vpop.f32.mrf.mxu2  ;;  %v767_v6 = vrot.slane %v765_v3, 5  ;;  %v3408_v43 = vrot.slane %v786_v60, 9  ;;  %v2839_v48 = vand.u32 2147483647, %v5118_v46  ;;  %v968_v26 = vrot.slane %v5126_v11, 5 }
 0x238   : > { %v2819_v16 = vadd.f32 %v3784_v45, %v2818_v17  ;;  %v2194_v51 = vadd.f32 %v2130_v36, %v2061_v5  ;;  %v2262_v25 = vpop.f32.mrf.mxu3  ;;  %v3643_v35 = vmul.f32 -1.442695, %v5150_v58  ;;  %v3893_v5 = vld [vmem:[%s4077_s19 + $0xc0] sm:$0xff]  ;;  %v758_v60 = vsel %vm4172_vm6, %v753_v0, %v5120_v29 }
 0x239   : > { %v3786_v61 = vpop.eup %3785  ;;  %v2000_v37 = vpop.f32.mrf.mxu1  ;;  %vm2835_vm15 = vweird.f32 %v5118_v46  ;;  %vm2840_vm2 = vcmp.eq.f32.partialorder %v2839_v48, 8.507059e+37 }
 0x23a   : > { %v3788_v53 = vpop.eup %3787  ;;  %v2823_v54 = vsel %vm2822_vm13, %v3784_v45, %v2819_v16  ;;  %v2831_v30 = vmul.f32 %v3786_v61, %v5118_v46  ;;  %v2326_v13 = vadd.f32 %v2262_v25, %v2194_v51  ;;  %v2397_v21 = vpop.f32.mrf.mxu0  ;;  %v2841_v45 = vand.u32 2147483648, %v5118_v46 }
 0x23b   : > { %v2828_v8 = vsel %vm5145_vm12, %v2827_v4, %v2823_v54  ;;  %v5156_v23 = vadd.f32 1.0, %v3788_v53  ;;  %vm2836_vm14 = vweird.f32 %v3786_v61  ;;  %v2062_v36 = vadd.f32 %v2000_v37, %v4787_v34 }
 0x23c   : > { %v3197_v56 = vmul.f32 %v2828_v8, %v5045_v12  ;;  %v2832_v3 = vsub.f32 1.0, %v2831_v30  ;;  %v2458_v17 = vadd.f32 %v2394_v27, %v2326_v13  ;;  %3576 = vmatmul.msk.bf16.gmra.mxu1 %vm1067_vm1, %v4790_v39  ;;  %3597 = vmatmul.msk.bf16.gmra.mxu2 %vm1067_vm1, %v3893_v5  ;;  %v967_v12 = vrot.slane %v965_v50, 4  ;;  %vm2837_vm0 = vmor %vm2835_vm15, %vm2836_vm14 }
 0x23d   : > { %3789 = vrcp.f32 %v5156_v23  ;;  %3614 = vmatmul.msk.bf16.gmra.mxu3 %vm1067_vm1, %v4793_v22  ;;  %3631 = vmatmul.msk.bf16.gmra.mxu0 %vm1067_vm1, %v5141_v1  ;;  %v2842_v4 = vor.u32 1.1754944e-38, %v2841_v45  ;;  %v768_v34 = vsel %vm4172_vm6, %v763_v15, %v767_v6  ;;  %v966_v25 = vsel %vm4180_vm7, %v3408_v43, %v965_v50 }
 0x23e   : > { %3229 = vst [vmem:[%s4984_s9 + $0x38] sm:$0xff] %v3197_v56  ;;  %v2833_v27 = vmul.f32 %v3786_v61, %v2832_v3  ;;  %3791 = vpow2.f32 %v3643_v35  ;;  %v5173_v39 = vadd.f32 %v4934_v9, %v2458_v17  ;;  %v969_v0 = vsel %vm4180_vm7, %v967_v12, %v968_v26  ;;  %v3687_v26 = vld [vmem:[%s4077_s19 + $0xcc] sm:$0xff] }
 0x23f   : > { %v2133_v42 = vpop.f32.mrf.mxu2  ;;  %v2217_v15 = vunpack.c.l.b16 %v758_v60  ;;  %v2218_v50 = vunpack.c.l.b16 %v768_v34  ;;  %v2350_v43 = vunpack.c.l.b16 %v969_v0  ;;  %v2854_v56 = vand.u32 2147483647, %v5156_v23 }
 0x240   : > { %v2834_v22 = vadd.f32 %v3786_v61, %v2833_v27  ;;  %v3644_v16 = vmul.f32 -1.442695, %v5173_v39  ;;  %v2195_v62 = vadd.f32 %v2133_v42, %v2062_v36  ;;  %v2265_v11 = vpop.f32.mrf.mxu3  ;;  %vm2850_vm7 = vweird.f32 %v5156_v23 }
 0x241   : > { %v2002_v51 = vpop.f32.mrf.mxu1  ;;  %v2219_v42 = vpack.c.b16 %v2218_v50, %v2217_v15  ;;  %vm2855_vm4 = vcmp.eq.f32.partialorder %v2854_v56, 8.507059e+37 }
 0x242   : > { %v2838_v37 = vsel %vm2837_vm0, %v3786_v61, %v2834_v22  ;;  %3793 = vpow2.f32 %v3644_v16  ;;  %v2327_v29 = vadd.f32 %v2265_v11, %v2195_v62  ;;  %v2399_v46 = vpop.f32.mrf.mxu0  ;;  %v2349_v61 = vunpack.c.l.b16 %v966_v25 }
 0x243   : > { %v3790_v53 = vpop.eup %3789  ;;  %v2843_v54 = vsel %vm2840_vm2, %v2842_v4, %v2838_v37  ;;  %v2063_v35 = vadd.f32 %v2002_v51, %v4799_v18 }
 0x244   : > { %v3792_v30 = vpop.eup %3791  ;;  %v3198_v13 = vmul.f32 %v2843_v54, %v5067_v38  ;;  %v2846_v8 = vmul.f32 %v3790_v53, %v5156_v23  ;;  %v2459_v2 = vadd.f32 %v2397_v21, %v2327_v29  ;;  %v2856_v38 = vand.u32 2147483648, %v5156_v23 }
 0x245   : > { %v5190_v6 = vadd.f32 1.0, %v3792_v30  ;;  %vm2851_vm6 = vweird.f32 %v3790_v53  ;;  %v2351_v18 = vpack.c.b16 %v2350_v43, %v2349_v61 }
 0x246   : > { %3230 = vst [vmem:[%s4984_s9 + $0x40] sm:$0xff] %v3198_v13  ;;  %v2847_v48 = vsub.f32 1.0, %v2846_v8  ;;  %v5194_v7 = vadd.f32 %v4934_v9, %v2459_v2  ;;  %vm2852_vm3 = vmor %vm2850_vm7, %vm2851_vm6  ;;  %v2857_v62 = vor.u32 1.1754944e-38, %v2856_v38 }
 0x247   : > { %3795 = vrcp.f32 %v5190_v6  ;;  %v2135_v21 = vpop.f32.mrf.mxu2  ;;  %v2869_v8 = vand.u32 2147483647, %v5190_v6  ;;  %vm2865_vm5 = vweird.f32 %v5190_v6 }
 0x248   : > { %v3794_v3 = vpop.eup %3793  ;;  %v2848_v45 = vmul.f32 %v3790_v53, %v2847_v48  ;;  %v3645_v17 = vmul.f32 -1.442695, %v5194_v7  ;;  %v2196_v5 = vadd.f32 %v2135_v21, %v2063_v35  ;;  %v2267_v12 = vpop.f32.mrf.mxu3 }
 0x249   : > { %v5202_v27 = vadd.f32 1.0, %v3794_v3  ;;  %v2005_v36 = vpop.f32.mrf.mxu1  ;;  %vm2870_vm9 = vcmp.eq.f32.partialorder %v2869_v8, 8.507059e+37 }
 0x24a   : > { %v2849_v60 = vadd.f32 %v3790_v53, %v2848_v45  ;;  %3797 = vpow2.f32 %v3645_v17  ;;  %v2328_v22 = vadd.f32 %v2267_v12, %v2196_v5  ;;  %v2402_v16 = vpop.f32.mrf.mxu0  ;;  %v2064_v29 = vadd.f32 %v2005_v36, %v4805_v41 }
 0x24b   : > { %3799 = vrcp.f32 %v5202_v27  ;;  %v2884_v38 = vand.u32 2147483647, %v5202_v27  ;;  %v2886_v21 = vand.u32 2147483648, %v5202_v27  ;;  %vm2880_vm11 = vweird.f32 %v5202_v27 }
 0x24c   : > { %v2853_v11 = vsel %vm2852_vm3, %v3790_v53, %v2849_v60  ;;  %v2460_v4 = vadd.f32 %v2399_v46, %v2328_v22  ;;  %3577 = vmatmul.msk.bf16.gmra.mxu1 %vm1067_vm1, %v5141_v1  ;;  %3598 = vmatmul.msk.bf16.gmra.mxu2 %vm1067_vm1, %v3687_v26 }
 0x24d   : > { %v3796_v51 = vpop.eup %3795  ;;  %v2858_v34 = vsel %vm2855_vm4, %v2857_v62, %v2853_v11  ;;  %3615 = vmatmul.msk.bf16.gmra.mxu3 %vm1067_vm1, %v2219_v42  ;;  %3632 = vmatmul.msk.bf16.gmra.mxu0 %vm1067_vm1, %v2351_v18  ;;  %v2887_v62 = vor.u32 1.1754944e-38, %v2886_v21  ;;  %vm2885_vm13 = vcmp.eq.f32.partialorder %v2884_v38, 8.507059e+37 }
 0x24e   : > { %v3199_v23 = vmul.f32 %v2858_v34, %v5114_v32  ;;  %v2861_v25 = vmul.f32 %v3796_v51, %v5190_v6  ;;  %v5214_v37 = vadd.f32 %v4934_v9, %v2460_v4  ;;  %v2871_v32 = vand.u32 2147483648, %v5190_v6 }
 0x24f   : > { %v2138_v46 = vpop.f32.mrf.mxu2  ;;  %vm2866_vm1 = vweird.f32 %v3796_v51 }
 0x250   : > { %v3798_v0 = vpop.eup %3797  ;;  %3231 = vst [vmem:[%s4984_s9 + $0x48] sm:$0xff] %v3199_v23  ;;  %v2862_v1 = vsub.f32 1.0, %v2861_v25  ;;  %v3646_v53 = vmul.f32 -1.442695, %v5214_v37  ;;  %v2197_v54 = vadd.f32 %v2138_v46, %v2064_v29  ;;  %v2270_v30 = vpop.f32.mrf.mxu3  ;;  %vm2867_vm8 = vmor %vm2865_vm5, %vm2866_vm1  ;;  %v2872_v56 = vor.u32 1.1754944e-38, %v2871_v32 }
 0x251   : > { %v3800_v13 = vpop.eup %3799  ;;  %v5221_v2 = vadd.f32 1.0, %v3798_v0  ;;  %v2007_v15 = vpop.f32.mrf.mxu1 }
 0x252   : > { %v2863_v50 = vmul.f32 %v3796_v51, %v2862_v1  ;;  %v2876_v41 = vmul.f32 %v3800_v13, %v5202_v27  ;;  %3801 = vpow2.f32 %v3646_v53  ;;  %v2404_v61 = vpop.f32.mrf.mxu0  ;;  %v2329_v35 = vadd.f32 %v2270_v30, %v2197_v54 }
 0x253   : > { %3803 = vrcp.f32 %v5221_v2  ;;  %vm2881_vm10 = vweird.f32 %v3800_v13  ;;  %v2065_v12 = vadd.f32 %v2007_v15, %v4812_v31  ;;  %v2901_v29 = vand.u32 2147483648, %v5221_v2 }
 0x254   : > { %v2864_v43 = vadd.f32 %v3796_v51, %v2863_v50  ;;  %v2877_v48 = vsub.f32 1.0, %v2876_v41  ;;  %v2461_v17 = vadd.f32 %v2402_v16, %v2329_v35  ;;  %vm2882_vm12 = vmor %vm2880_vm11, %vm2881_vm10  ;;  %v2899_v1 = vand.u32 2147483647, %v5221_v2 }
 0x255   : > { %vm2895_vm15 = vweird.f32 %v5221_v2  ;;  %v2902_v15 = vor.u32 1.1754944e-38, %v2901_v29 }
 0x256   : > { %v2868_v3 = vsel %vm2867_vm8, %v3796_v51, %v2864_v43  ;;  %v2878_v45 = vmul.f32 %v3800_v13, %v2877_v48  ;;  %v5232_v18 = vadd.f32 %v4934_v9, %v2461_v17  ;;  %vm2900_vm2 = vcmp.eq.f32.partialorder %v2899_v1, 8.507059e+37 }
 0x257   : > { %v2873_v5 = vsel %vm2870_vm9, %v2872_v56, %v2868_v3  ;;  %v2140_v26 = vpop.f32.mrf.mxu2 }
 0x258   : > { %v3802_v36 = vpop.eup %3801  ;;  %v3200_v6 = vmul.f32 %v2873_v5, %v5150_v58  ;;  %v2879_v42 = vadd.f32 %v3800_v13, %v2878_v45  ;;  %v2272_v60 = vpop.f32.mrf.mxu3  ;;  %v2198_v16 = vadd.f32 %v2140_v26, %v2065_v12  ;;  %v3647_v51 = vmul.f32 -1.442695, %v5232_v18  ;;  %v5258_v12 = vld [vmem:[%s5478_s2] ss:$0 sm:$0xff] }
 0x259   : > { %v3804_v22 = vpop.eup %3803  ;;  %v5234_v11 = vadd.f32 1.0, %v3802_v36  ;;  %v2010_v4 = vpop.f32.mrf.mxu1 }
 0x25a   : > { %3232 = vst [vmem:[%s4984_s9 + $0x50] sm:$0xff] %v3200_v6  ;;  %v2883_v31 = vsel %vm2882_vm12, %v3800_v13, %v2879_v42  ;;  %v2891_v58 = vmul.f32 %v3804_v22, %v5221_v2  ;;  %v2407_v27 = vpop.f32.mrf.mxu0  ;;  %v2330_v46 = vadd.f32 %v2272_v60, %v2198_v16  ;;  %vm2896_vm14 = vweird.f32 %v3804_v22 }
 0x25b   : > { %v2888_v34 = vsel %vm2885_vm13, %v2887_v62, %v2883_v31  ;;  %3805 = vrcp.f32 %v5234_v11  ;;  %v2066_v53 = vadd.f32 %v2010_v4, %v4819_v55  ;;  %vm2897_vm0 = vmor %vm2895_vm15, %vm2896_vm14  ;;  %v2916_v17 = vand.u32 2147483648, %v5234_v11 }
 0x25c   : > { %v3201_v23 = vmul.f32 %v2888_v34, %v5173_v39  ;;  %v2892_v25 = vsub.f32 1.0, %v2891_v58  ;;  %3807 = vpow2.f32 %v3647_v51  ;;  %v2462_v54 = vadd.f32 %v2404_v61, %v2330_v46 }
 0x25d   : > { %vm2910_vm7 = vweird.f32 %v5234_v11  ;;  %v2917_v62 = vor.u32 1.1754944e-38, %v2916_v17 }
 0x25e   : > { %3233 = vst [vmem:[%s4984_s9 + $0x58] sm:$0xff] %v3201_v23  ;;  %v2893_v0 = vmul.f32 %v3804_v22, %v2892_v25  ;;  %v5247_v50 = vadd.f32 %v4934_v9, %v2462_v54  ;;  %v2914_v9 = vand.u32 2147483647, %v5234_v11 }
 0x25f   : > { %v2143_v30 = vpop.f32.mrf.mxu2 }
 0x260   : > { %v2894_v13 = vadd.f32 %v3804_v22, %v2893_v0  ;;  %v2199_v8 = vadd.f32 %v2143_v30, %v2066_v53  ;;  %v2275_v32 = vpop.f32.mrf.mxu3  ;;  %v3648_v2 = vmul.f32 -1.442695, %v5247_v50  ;;  %vm2915_vm4 = vcmp.eq.f32.partialorder %v2914_v9, 8.507059e+37 }
 0x261   : > { %v3806_v39 = vpop.eup %3805  ;;  %v2012_v41 = vpop.f32.mrf.mxu1 }
 0x262   : > { %v3808_v43 = vpop.eup %3807  ;;  %v2898_v48 = vsel %vm2897_vm0, %v3804_v22, %v2894_v13  ;;  %v2906_v55 = vmul.f32 %v3806_v39, %v5234_v11  ;;  %v2331_v61 = vadd.f32 %v2275_v32, %v2199_v8  ;;  %v2409_v35 = vpop.f32.mrf.mxu0  ;;  %vm2911_vm6 = vweird.f32 %v3806_v39 }
 0x263   : > { %v2903_v56 = vsel %vm2900_vm2, %v2902_v15, %v2898_v48  ;;  %v2692_v38 = vadd.f32 1.0, %v3808_v43  ;;  %vm2912_vm3 = vmor %vm2910_vm7, %vm2911_vm6 }
 0x264   : > { %v3202_v21 = vmul.f32 %v2903_v56, %v5194_v7  ;;  %v2907_v3 = vsub.f32 1.0, %v2906_v55  ;;  %v2463_v45 = vadd.f32 %v2407_v27, %v2331_v61  ;;  %v2067_v7 = vadd.f32 %v2012_v41, %v4826_v20 }
 0x265   : > { %3809 = vrcp.f32 %v2692_v38  ;;  %v2929_v1 = vand.u32 2147483647, %v2692_v38  ;;  %v2931_v53 = vand.u32 2147483648, %v2692_v38  ;;  %vm2925_vm5 = vweird.f32 %v2692_v38 }
 0x266   : > { %3234 = vst [vmem:[%s4984_s9 + $0x60] sm:$0xff] %v3202_v21  ;;  %v2908_v5 = vmul.f32 %v3806_v39, %v2907_v3  ;;  %3811 = vpow2.f32 %v3648_v2  ;;  %v5261_v26 = vadd.f32 %v5258_v12, %v2463_v45 }
 0x267   : > { %v2145_v36 = vpop.f32.mrf.mxu2  ;;  %v2932_v48 = vor.u32 1.1754944e-38, %v2931_v53  ;;  %vm2930_vm9 = vcmp.eq.f32.partialorder %v2929_v1, 8.507059e+37 }
 0x268   : > { %v2909_v6 = vadd.f32 %v3806_v39, %v2908_v5  ;;  %v3649_v42 = vmul.f32 -1.442695, %v5261_v26  ;;  %v2200_v60 = vadd.f32 %v2145_v36, %v2067_v7  ;;  %v2277_v22 = vpop.f32.mrf.mxu3 }
 0x269   : > { %v2015_v16 = vpop.f32.mrf.mxu1 }
 0x26a   : > { %v2913_v4 = vsel %vm2912_vm3, %v3806_v39, %v2909_v6  ;;  %3813 = vpow2.f32 %v3649_v42  ;;  %v2332_v31 = vadd.f32 %v2277_v22, %v2200_v60  ;;  %v2412_v58 = vpop.f32.mrf.mxu0  ;;  %v2068_v0 = vadd.f32 %v2015_v16, %v4833_v14 }
 0x26b   : > { %v3810_v51 = vpop.eup %3809  ;;  %v2918_v20 = vsel %vm2915_vm4, %v2917_v62, %v2913_v4 }
 0x26c   : > { %v3812_v27 = vpop.eup %3811  ;;  %v3203_v34 = vmul.f32 %v2918_v20, %v5214_v37  ;;  %v2921_v11 = vmul.f32 %v3810_v51, %v2692_v38  ;;  %v2464_v23 = vadd.f32 %v2409_v35, %v2332_v31  ;;  %vm2926_vm1 = vweird.f32 %v3810_v51 }
 0x26d   : > { %v2693_v25 = vadd.f32 1.0, %v3812_v27  ;;  %vm2927_vm8 = vmor %vm2925_vm5, %vm2926_vm1 }
 0x26e   : > { %3235 = vst [vmem:[%s4984_s9 + $0x68] sm:$0xff] %v3203_v34  ;;  %v2922_v29 = vsub.f32 1.0, %v2921_v11  ;;  %v5270_v46 = vadd.f32 %v5258_v12, %v2464_v23 }
 0x26f   : > { %3815 = vrcp.f32 %v2693_v25  ;;  %v2148_v54 = vpop.f32.mrf.mxu2  ;;  %v2944_v42 = vand.u32 2147483647, %v2693_v25  ;;  %v2946_v60 = vand.u32 2147483648, %v2693_v25  ;;  %vm2940_vm11 = vweird.f32 %v2693_v25 }
 0x270   : > { %v3814_v30 = vpop.eup %3813  ;;  %v2923_v13 = vmul.f32 %v3810_v51, %v2922_v29  ;;  %v3650_v8 = vmul.f32 -1.442695, %v5270_v46  ;;  %v2201_v37 = vadd.f32 %v2148_v54, %v2068_v0  ;;  %v2280_v32 = vpop.f32.mrf.mxu3 }
 0x271   : > { %v5274_v39 = vadd.f32 1.0, %v3814_v30  ;;  %v2017_v15 = vpop.f32.mrf.mxu1  ;;  %vm2945_vm13 = vcmp.eq.f32.partialorder %v2944_v42, 8.507059e+37 }
 0x272   : > { %v2924_v41 = vadd.f32 %v3810_v51, %v2923_v13  ;;  %3817 = vpow2.f32 %v3650_v8  ;;  %v2333_v43 = vadd.f32 %v2280_v32, %v2201_v37  ;;  %v2414_v14 = vpop.f32.mrf.mxu0  ;;  %v2069_v38 = vadd.f32 %v2017_v15, %v4840_v44 }
 0x273   : > { %3819 = vrcp.f32 %v5274_v39  ;;  %v2959_v20 = vand.u32 2147483647, %v5274_v39  ;;  %v2961_v27 = vand.u32 2147483648, %v5274_v39  ;;  %vm2955_vm15 = vweird.f32 %v5274_v39 }
 0x274   : > { %v2928_v55 = vsel %vm2927_vm8, %v3810_v51, %v2924_v41  ;;  %v2465_v61 = vadd.f32 %v2412_v58, %v2333_v43  ;;  %v2947_v51 = vor.u32 1.1754944e-38, %v2946_v60 }
 0x275   : > { %v3816_v35 = vpop.eup %3815  ;;  %v2933_v56 = vsel %vm2930_vm9, %v2932_v48, %v2928_v55  ;;  %v2962_v37 = vor.u32 1.1754944e-38, %v2961_v27  ;;  %vm2960_vm2 = vcmp.eq.f32.partialorder %v2959_v20, 8.507059e+37 }
 0x276   : > { %v3204_v2 = vmul.f32 %v2933_v56, %v5232_v18  ;;  %v2936_v21 = vmul.f32 %v3816_v35, %v2693_v25  ;;  %v5279_v3 = vadd.f32 %v5258_v12, %v2465_v61  ;;  %vm2941_vm10 = vweird.f32 %v3816_v35 }
 0x277   : > { %v2150_v45 = vpop.f32.mrf.mxu2  ;;  %vm2942_vm12 = vmor %vm2940_vm11, %vm2941_vm10 }
 0x278   : > { %v3818_v9 = vpop.eup %3817  ;;  %3236 = vst [vmem:[%s4984_s9 + $0x70] sm:$0xff] %v3204_v2  ;;  %v2937_v17 = vsub.f32 1.0, %v2936_v21  ;;  %v3651_v5 = vmul.f32 -1.442695, %v5279_v3  ;;  %v2202_v7 = vadd.f32 %v2150_v45, %v2069_v38  ;;  %v2282_v36 = vpop.f32.mrf.mxu3 }
 0x279   : > { %v3820_v6 = vpop.eup %3819  ;;  %v5284_v22 = vadd.f32 1.0, %v3818_v9  ;;  %v2020_v18 = vpop.f32.mrf.mxu1 }
 0x27a   : > { %v2938_v62 = vmul.f32 %v3816_v35, %v2937_v17  ;;  %v2951_v16 = vmul.f32 %v3820_v6, %v5274_v39  ;;  %3821 = vpow2.f32 %v3651_v5  ;;  %v2417_v44 = vpop.f32.mrf.mxu0  ;;  %v2334_v58 = vadd.f32 %v2282_v36, %v2202_v7 }
 0x27b   : > { %3823 = vrcp.f32 %v5284_v22  ;;  %vm2956_vm14 = vweird.f32 %v3820_v6  ;;  %v2070_v0 = vadd.f32 %v2020_v18, %v4847_v49  ;;  %v2976_v61 = vand.u32 2147483648, %v5284_v22 }
 0x27c   : > { %v2939_v4 = vadd.f32 %v3816_v35, %v2938_v62  ;;  %v2952_v31 = vsub.f32 1.0, %v2951_v16  ;;  %v2466_v23 = vadd.f32 %v2414_v14, %v2334_v58  ;;  %vm2957_vm0 = vmor %vm2955_vm15, %vm2956_vm14  ;;  %v2974_v2 = vand.u32 2147483647, %v5284_v22 }
 0x27d   : > { %vm2970_vm7 = vweird.f32 %v5284_v22  ;;  %v2977_v7 = vor.u32 1.1754944e-38, %v2976_v61 }
 0x27e   : > { %v2943_v34 = vsel %vm2942_vm12, %v3816_v35, %v2939_v4  ;;  %v2953_v11 = vmul.f32 %v3820_v6, %v2952_v31  ;;  %v5294_v30 = vadd.f32 %v5258_v12, %v2466_v23  ;;  %vm2975_vm4 = vcmp.eq.f32.partialorder %v2974_v2, 8.507059e+37 }
 0x27f   : > { %v2948_v29 = vsel %vm2945_vm13, %v2947_v51, %v2943_v34  ;;  %v2153_v1 = vpop.f32.mrf.mxu2 }
 0x280   : > { %v3822_v53 = vpop.eup %3821  ;;  %v3205_v25 = vmul.f32 %v2948_v29, %v5247_v50  ;;  %v2954_v54 = vadd.f32 %v3820_v6, %v2953_v11  ;;  %v2285_v13 = vpop.f32.mrf.mxu3  ;;  %v2203_v15 = vadd.f32 %v2153_v1, %v2070_v0  ;;  %v3652_v43 = vmul.f32 -1.442695, %v5294_v30 }
 0x281   : > { %v3824_v8 = vpop.eup %3823  ;;  %v5296_v32 = vadd.f32 1.0, %v3822_v53  ;;  %v2022_v41 = vpop.f32.mrf.mxu1 }
 0x282   : > { %3237 = vst [vmem:[%s4984_s9 + $0x78] sm:$0xff] %v3205_v25  ;;  %v2958_v49 = vsel %vm2957_vm0, %v3820_v6, %v2954_v54  ;;  %v2966_v50 = vmul.f32 %v3824_v8, %v5284_v22  ;;  %v2419_v39 = vpop.f32.mrf.mxu0  ;;  %v2335_v35 = vadd.f32 %v2285_v13, %v2203_v15  ;;  %vm2971_vm6 = vweird.f32 %v3824_v8 }
 0x283   : > { %v2963_v14 = vsel %vm2960_vm2, %v2962_v37, %v2958_v49  ;;  %3825 = vrcp.f32 %v5296_v32  ;;  %v2071_v21 = vadd.f32 %v2022_v41, %v4854_v28  ;;  %vm2972_vm3 = vmor %vm2970_vm7, %vm2971_vm6  ;;  %v2989_v51 = vand.u32 2147483647, %v5296_v32 }
 0x284   : > { %v3206_v48 = vmul.f32 %v2963_v14, %v5261_v26  ;;  %v2967_v55 = vsub.f32 1.0, %v2966_v50  ;;  %3827 = vpow2.f32 %v3652_v43  ;;  %v2467_v38 = vadd.f32 %v2417_v44, %v2335_v35 }
 0x285   : > { %v2991_v20 = vand.u32 2147483648, %v5296_v32  ;;  %vm2985_vm5 = vweird.f32 %v5296_v32  ;;  %vm2990_vm9 = vcmp.eq.f32.partialorder %v2989_v51, 8.507059e+37 }
 0x286   : > { %3238 = vst [vmem:[%s4984_s9 + $0x80] sm:$0xff] %v3206_v48  ;;  %v2968_v56 = vmul.f32 %v3824_v8, %v2967_v55  ;;  %v5309_v36 = vadd.f32 %v5258_v12, %v2467_v38 }
 0x287   : > { %v2155_v45 = vpop.f32.mrf.mxu2  ;;  %v2992_v53 = vor.u32 1.1754944e-38, %v2991_v20 }
 0x288   : > { %v2969_v9 = vadd.f32 %v3824_v8, %v2968_v56  ;;  %v2204_v17 = vadd.f32 %v2155_v45, %v2071_v21  ;;  %v2287_v5 = vpop.f32.mrf.mxu3  ;;  %v3653_v22 = vmul.f32 -1.442695, %v5309_v36 }
 0x289   : > { %v3826_v26 = vpop.eup %3825  ;;  %v2025_v6 = vpop.f32.mrf.mxu1 }
 0x28a   : > { %v3828_v42 = vpop.eup %3827  ;;  %v2973_v60 = vsel %vm2972_vm3, %v3824_v8, %v2969_v9  ;;  %v2981_v28 = vmul.f32 %v3826_v26, %v5296_v32  ;;  %v2336_v18 = vadd.f32 %v2287_v5, %v2204_v17  ;;  %v2422_v62 = vpop.f32.mrf.mxu0  ;;  %vm2986_vm1 = vweird.f32 %v3826_v26 }
 0x28b   : > { %v2978_v16 = vsel %vm2975_vm4, %v2977_v7, %v2973_v60  ;;  %v2697_v44 = vadd.f32 1.0, %v3828_v42  ;;  %v2072_v11 = vadd.f32 %v2025_v6, %v4861_v57  ;;  %vm2987_vm8 = vmor %vm2985_vm5, %vm2986_vm1 }
 0x28c   : > { %v3207_v4 = vmul.f32 %v2978_v16, %v5270_v46  ;;  %v2982_v31 = vsub.f32 1.0, %v2981_v28  ;;  %v2468_v58 = vadd.f32 %v2419_v39, %v2336_v18 }
 0x28d   : > { %3829 = vrcp.f32 %v2697_v44  ;;  %v3004_v48 = vand.u32 2147483647, %v2697_v44  ;;  %v3006_v55 = vand.u32 2147483648, %v2697_v44  ;;  %vm3000_vm11 = vweird.f32 %v2697_v44 }
 0x28e   : > { %3239 = vst [vmem:[%s4984_s9 + $0x88] sm:$0xff] %v3207_v4  ;;  %v2983_v27 = vmul.f32 %v3826_v26, %v2982_v31  ;;  %3831 = vpow2.f32 %v3653_v22  ;;  %v5318_v34 = vadd.f32 %v5258_v12, %v2468_v58 }
 0x28f   : > { %v2158_v23 = vpop.f32.mrf.mxu2  ;;  %v3007_v5 = vor.u32 1.1754944e-38, %v3006_v55  ;;  %vm3005_vm13 = vcmp.eq.f32.partialorder %v3004_v48, 8.507059e+37 }
 0x290   : > { %v2984_v29 = vadd.f32 %v3826_v26, %v2983_v27  ;;  %v3654_v46 = vmul.f32 -1.442695, %v5318_v34  ;;  %v2205_v0 = vadd.f32 %v2158_v23, %v2072_v11  ;;  %v2290_v1 = vpop.f32.mrf.mxu3 }
 0x291   : > { %v2027_v25 = vpop.f32.mrf.mxu1 }
 0x292   : > { %v2988_v54 = vsel %vm2987_vm8, %v3826_v26, %v2984_v29  ;;  %3833 = vpow2.f32 %v3654_v46  ;;  %v2337_v13 = vadd.f32 %v2290_v1, %v2205_v0  ;;  %v2424_v8 = vpop.f32.mrf.mxu0  ;;  %v2073_v14 = vadd.f32 %v2027_v25, %v4868_v47 }
 0x293   : > { %v3830_v37 = vpop.eup %3829  ;;  %v2993_v57 = vsel %vm2990_vm9, %v2992_v53, %v2988_v54 }
 0x294   : > { %v3832_v15 = vpop.eup %3831  ;;  %v3208_v41 = vmul.f32 %v2993_v57, %v5279_v3  ;;  %v2996_v32 = vmul.f32 %v3830_v37, %v2697_v44  ;;  %v2469_v49 = vadd.f32 %v2422_v62, %v2337_v13  ;;  %vm3001_vm10 = vweird.f32 %v3830_v37 }
 0x295   : > { %v2698_v50 = vadd.f32 1.0, %v3832_v15  ;;  %vm3002_vm12 = vmor %vm3000_vm11, %vm3001_vm10 }
 0x296   : > { %3240 = vst [vmem:[%s4984_s9 + $0x90] sm:$0xff] %v3208_v41  ;;  %v2997_v43 = vsub.f32 1.0, %v2996_v32  ;;  %v5327_v39 = vadd.f32 %v5258_v12, %v2469_v49 }
 0x297   : > { %3835 = vrcp.f32 %v2698_v50  ;;  %v2160_v61 = vpop.f32.mrf.mxu2  ;;  %v3019_v20 = vand.u32 2147483647, %v2698_v50  ;;  %v3021_v27 = vand.u32 2147483648, %v2698_v50  ;;  %vm3015_vm15 = vweird.f32 %v2698_v50 }
 0x298   : > { %v3834_v35 = vpop.eup %3833  ;;  %v2998_v56 = vmul.f32 %v3830_v37, %v2997_v43  ;;  %v3655_v2 = vmul.f32 -1.442695, %v5327_v39  ;;  %v2206_v3 = vadd.f32 %v2160_v61, %v2073_v14  ;;  %v2292_v21 = vpop.f32.mrf.mxu3 }
 0x299   : > { %v5331_v38 = vadd.f32 1.0, %v3834_v35  ;;  %v2030_v45 = vpop.f32.mrf.mxu1  ;;  %vm3020_vm2 = vcmp.eq.f32.partialorder %v3019_v20, 8.507059e+37  ;;  %v3022_v53 = vor.u32 1.1754944e-38, %v3021_v27 }
 0x29a   : > { %v2999_v9 = vadd.f32 %v3830_v37, %v2998_v56  ;;  %3837 = vpow2.f32 %v3655_v2  ;;  %v2338_v17 = vadd.f32 %v2292_v21, %v2206_v3  ;;  %v2427_v47 = vpop.f32.mrf.mxu0  ;;  %v2074_v62 = vadd.f32 %v2030_v45, %v4875_v33 }
 0x29b   : > { %3839 = vrcp.f32 %v5331_v38  ;;  %v3034_v25 = vand.u32 2147483647, %v5331_v38  ;;  %v3036_v54 = vand.u32 2147483648, %v5331_v38  ;;  %vm3030_vm7 = vweird.f32 %v5331_v38 }
 0x29c   : > { %v3003_v26 = vsel %vm3002_vm12, %v3830_v37, %v2999_v9  ;;  %v2470_v7 = vadd.f32 %v2424_v8, %v2338_v17 }
 0x29d   : > { %v3836_v6 = vpop.eup %3835  ;;  %v3008_v42 = vsel %vm3005_vm13, %v3007_v5, %v3003_v26  ;;  %v3037_v55 = vor.u32 1.1754944e-38, %v3036_v54  ;;  %vm3035_vm4 = vcmp.eq.f32.partialorder %v3034_v25, 8.507059e+37 }
 0x29e   : > { %v3209_v60 = vmul.f32 %v3008_v42, %v5294_v30  ;;  %v3011_v28 = vmul.f32 %v3836_v6, %v2698_v50  ;;  %v5336_v18 = vadd.f32 %v5258_v12, %v2470_v7  ;;  %vm3016_vm14 = vweird.f32 %v3836_v6 }
 0x29f   : > { %v2163_v16 = vpop.f32.mrf.mxu2  ;;  %vm3017_vm0 = vmor %vm3015_vm15, %vm3016_vm14 }
 0x2a0   : > { %v3838_v44 = vpop.eup %3837  ;;  %3241 = vst [vmem:[%s4984_s9 + $0x98] sm:$0xff] %v3209_v60  ;;  %v3012_v22 = vsub.f32 1.0, %v3011_v28  ;;  %v3656_v4 = vmul.f32 -1.442695, %v5336_v18  ;;  %v2207_v31 = vadd.f32 %v2163_v16, %v2074_v62  ;;  %v2295_v58 = vpop.f32.mrf.mxu3 }
 0x2a1   : > { %v3840_v51 = vpop.eup %3839  ;;  %v5341_v11 = vadd.f32 1.0, %v3838_v44  ;;  %v2032_v30 = vpop.f32.mrf.mxu1 }
 0x2a2   : > { %v3013_v23 = vmul.f32 %v3836_v6, %v3012_v22  ;;  %v3026_v29 = vmul.f32 %v3840_v51, %v5331_v38  ;;  %3841 = vpow2.f32 %v3656_v4  ;;  %v2429_v33 = vpop.f32.mrf.mxu0  ;;  %v2339_v1 = vadd.f32 %v2295_v58, %v2207_v31 }
 0x2a3   : > { %3843 = vrcp.f32 %v5341_v11  ;;  %vm3031_vm6 = vweird.f32 %v3840_v51  ;;  %v2075_v15 = vadd.f32 %v2032_v30, %v4882_v63  ;;  %v3051_v9 = vand.u32 2147483648, %v5341_v11 }
 0x2a4   : > { %v3014_v46 = vadd.f32 %v3836_v6, %v3013_v23  ;;  %v3027_v0 = vsub.f32 1.0, %v3026_v29  ;;  %v2471_v37 = vadd.f32 %v2427_v47, %v2339_v1  ;;  %vm3032_vm3 = vmor %vm3030_vm7, %vm3031_vm6  ;;  %v3049_v5 = vand.u32 2147483647, %v5341_v11 }
 0x2a5   : > { %vm3045_vm5 = vweird.f32 %v5341_v11  ;;  %v3052_v62 = vor.u32 1.1754944e-38, %v3051_v9 }
 0x2a6   : > { %v3018_v13 = vsel %vm3017_vm0, %v3836_v6, %v3014_v46  ;;  %v3028_v8 = vmul.f32 %v3840_v51, %v3027_v0  ;;  %v5351_v43 = vadd.f32 %v5258_v12, %v2471_v37  ;;  %vm3050_vm9 = vcmp.eq.f32.partialorder %v3049_v5, 8.507059e+37 }
 0x2a7   : > { %v3023_v57 = vsel %vm3020_vm2, %v3022_v53, %v3018_v13  ;;  %v2165_v41 = vpop.f32.mrf.mxu2 }
 0x2a8   : > { %v3842_v32 = vpop.eup %3841  ;;  %v3210_v49 = vmul.f32 %v3023_v57, %v5309_v36  ;;  %v3029_v50 = vadd.f32 %v3840_v51, %v3028_v8  ;;  %v2297_v14 = vpop.f32.mrf.mxu3  ;;  %v2208_v35 = vadd.f32 %v2165_v41, %v2075_v15  ;;  %v3657_v2 = vmul.f32 -1.442695, %v5351_v43 }
 0x2a9   : > { %v3844_v48 = vpop.eup %3843  ;;  %v5353_v61 = vadd.f32 1.0, %v3842_v32  ;;  %v2035_v56 = vpop.f32.mrf.mxu1 }
 0x2aa   : > { %3242 = vst [vmem:[%s4984_s9 + $0xa0] sm:$0xff] %v3210_v49  ;;  %v3033_v63 = vsel %vm3032_vm3, %v3840_v51, %v3029_v50  ;;  %v3041_v36 = vmul.f32 %v3844_v48, %v5341_v11  ;;  %v2432_v3 = vpop.f32.mrf.mxu0  ;;  %v2340_v17 = vadd.f32 %v2297_v14, %v2208_v35  ;;  %vm3046_vm1 = vweird.f32 %v3844_v48 }
 0x2ab   : > { %v3038_v21 = vsel %vm3035_vm4, %v3037_v55, %v3033_v63  ;;  %3845 = vrcp.f32 %v5353_v61  ;;  %v2076_v26 = vadd.f32 %v2035_v56, %v4889_v52  ;;  %vm3047_vm8 = vmor %vm3045_vm5, %vm3046_vm1  ;;  %v3064_v29 = vand.u32 2147483647, %v5353_v61 }
 0x2ac   : > { %v3211_v38 = vmul.f32 %v3038_v21, %v5318_v34  ;;  %v3042_v45 = vsub.f32 1.0, %v3041_v36  ;;  %3847 = vpow2.f32 %v3657_v2  ;;  %v2472_v7 = vadd.f32 %v2429_v33, %v2340_v17 }
 0x2ad   : > { %v3066_v33 = vand.u32 2147483648, %v5353_v61  ;;  %vm3060_vm11 = vweird.f32 %v5353_v61  ;;  %vm3065_vm13 = vcmp.eq.f32.partialorder %v3064_v29, 8.507059e+37 }
 0x2ae   : > { %3243 = vst [vmem:[%s4984_s9 + $0xa8] sm:$0xff] %v3211_v38  ;;  %v3043_v47 = vmul.f32 %v3844_v48, %v3042_v45  ;;  %v5366_v16 = vadd.f32 %v5258_v12, %v2472_v7 }
 0x2af   : > { %v2168_v6 = vpop.f32.mrf.mxu2  ;;  %v3067_v8 = vor.u32 1.1754944e-38, %v3066_v33 }
 0x2b0   : > { %v3044_v42 = vadd.f32 %v3844_v48, %v3043_v47  ;;  %v2209_v60 = vadd.f32 %v2168_v6, %v2076_v26  ;;  %v2300_v28 = vpop.f32.mrf.mxu3  ;;  %v3658_v20 = vmul.f32 -1.442695, %v5366_v16 }
 0x2b1   : > { %v3846_v34 = vpop.eup %3845  ;;  %v2037_v44 = vpop.f32.mrf.mxu1 }
 0x2b2   : > { %v3848_v22 = vpop.eup %3847  ;;  %v3048_v4 = vsel %vm3047_vm8, %v3844_v48, %v3044_v42  ;;  %v3056_v52 = vmul.f32 %v3846_v34, %v5353_v61  ;;  %v2341_v31 = vadd.f32 %v2300_v28, %v2209_v60  ;;  %v2434_v27 = vpop.f32.mrf.mxu0  ;;  %vm3061_vm10 = vweird.f32 %v3846_v34 }
 0x2b3   : > { %v3053_v58 = vsel %vm3050_vm9, %v3052_v62, %v3048_v4  ;;  %v2702_v51 = vadd.f32 1.0, %v3848_v22  ;;  %v2077_v1 = vadd.f32 %v2037_v44, %v4896_v59  ;;  %vm3062_vm12 = vmor %vm3060_vm11, %vm3061_vm10 }
 0x2b4   : > { %v3212_v11 = vmul.f32 %v3053_v58, %v5327_v39  ;;  %v3057_v30 = vsub.f32 1.0, %v3056_v52  ;;  %v2473_v23 = vadd.f32 %v2432_v3, %v2341_v31 }
 0x2b5   : > { %3849 = vrcp.f32 %v2702_v51  ;;  %v3079_v63 = vand.u32 2147483647, %v2702_v51  ;;  %v3081_v36 = vand.u32 2147483648, %v2702_v51  ;;  %vm3075_vm15 = vweird.f32 %v2702_v51 }
 0x2b6   : > { %3244 = vst [vmem:[%s4984_s9 + $0xb0] sm:$0xff] %v3212_v11  ;;  %v3058_v46 = vmul.f32 %v3846_v34, %v3057_v30  ;;  %3851 = vpow2.f32 %v3658_v20  ;;  %v5375_v0 = vadd.f32 %v5258_v12, %v2473_v23 }
 0x2b7   : > { %v2170_v53 = vpop.f32.mrf.mxu2  ;;  %vm3080_vm2 = vcmp.eq.f32.partialorder %v3079_v63, 8.507059e+37 }
 0x2b8   : > { %v3059_v25 = vadd.f32 %v3846_v34, %v3058_v46  ;;  %v3659_v39 = vmul.f32 -1.442695, %v5375_v0  ;;  %v2210_v54 = vadd.f32 %v2170_v53, %v2077_v1  ;;  %v2302_v13 = vpop.f32.mrf.mxu3 }
 0x2b9   : > { %v2040_v37 = vpop.f32.mrf.mxu1 }
 0x2ba   : > { %v3063_v57 = vsel %vm3062_vm12, %v3846_v34, %v3059_v25  ;;  %3853 = vpow2.f32 %v3659_v39  ;;  %v2342_v15 = vadd.f32 %v2302_v13, %v2210_v54  ;;  %v2437_v55 = vpop.f32.mrf.mxu0  ;;  %v2078_v56 = vadd.f32 %v2040_v37, %v4903_v24 }
 0x2bb   : > { %v3850_v41 = vpop.eup %3849  ;;  %v3068_v32 = vsel %vm3065_vm13, %v3067_v8, %v3063_v57  ;;  %v3082_v24 = vor.u32 1.1754944e-38, %v3081_v36 }
 0x2bc   : > { %v3852_v59 = vpop.eup %3851  ;;  %v3213_v49 = vmul.f32 %v3068_v32, %v5336_v18  ;;  %v3071_v50 = vmul.f32 %v3850_v41, %v2702_v51  ;;  %v2474_v14 = vadd.f32 %v2434_v27, %v2342_v15  ;;  %vm3076_vm14 = vweird.f32 %v3850_v41 }
 0x2bd   : > { %v2703_v48 = vadd.f32 1.0, %v3852_v59  ;;  %vm3077_vm0 = vmor %vm3075_vm15, %vm3076_vm14 }
 0x2be   : > { %3245 = vst [vmem:[%s4984_s9 + $0xb8] sm:$0xff] %v3213_v49  ;;  %v3072_v61 = vsub.f32 1.0, %v3071_v50  ;;  %v5384_v35 = vadd.f32 %v5258_v12, %v2474_v14 }
 0x2bf   : > { %3855 = vrcp.f32 %v2703_v48  ;;  %v2173_v2 = vpop.f32.mrf.mxu2  ;;  %v3094_v27 = vand.u32 2147483647, %v2703_v48  ;;  %v3096_v11 = vand.u32 2147483648, %v2703_v48  ;;  %vm3090_vm7 = vweird.f32 %v2703_v48 }
 0x2c0   : > { %v3854_v3 = vpop.eup %3853  ;;  %v3073_v21 = vmul.f32 %v3850_v41, %v3072_v61  ;;  %v3660_v18 = vmul.f32 -1.442695, %v5384_v35  ;;  %v2211_v38 = vadd.f32 %v2173_v2, %v2078_v56  ;;  %v2305_v45 = vpop.f32.mrf.mxu3 }
 0x2c1   : > { %v5388_v9 = vadd.f32 1.0, %v3854_v3  ;;  %v2042_v17 = vpop.f32.mrf.mxu1  ;;  %vm3095_vm4 = vcmp.eq.f32.partialorder %v3094_v27, 8.507059e+37  ;;  %v3097_v1 = vor.u32 1.1754944e-38, %v3096_v11 }
 0x2c2   : > { %v3074_v47 = vadd.f32 %v3850_v41, %v3073_v21  ;;  %3857 = vpow2.f32 %v3660_v18  ;;  %v2343_v5 = vadd.f32 %v2305_v45, %v2211_v38  ;;  %v2079_v62 = vadd.f32 %v2042_v17, %v4910_v40  ;;  %v2439_v44 = vpop.f32.mrf.mxu0 }
 0x2c3   : > { %3859 = vrcp.f32 %v5388_v9  ;;  %v3109_v53 = vand.u32 2147483647, %v5388_v9  ;;  %v3111_v25 = vand.u32 2147483648, %v5388_v9  ;;  %vm3105_vm5 = vweird.f32 %v5388_v9 }
 0x2c4   : > { %v3078_v26 = vsel %vm3077_vm0, %v3850_v41, %v3074_v47  ;;  %v2475_v7 = vadd.f32 %v2437_v55, %v2343_v5 }
 0x2c5   : > { %v3856_v6 = vpop.eup %3855  ;;  %v3083_v42 = vsel %vm3080_vm2, %v3082_v24, %v3078_v26  ;;  %v3112_v14 = vor.u32 1.1754944e-38, %v3111_v25  ;;  %vm3110_vm9 = vcmp.eq.f32.partialorder %v3109_v53, 8.507059e+37 }
 0x2c6   : > { %v3214_v60 = vmul.f32 %v3083_v42, %v5351_v43  ;;  %v3086_v28 = vmul.f32 %v3856_v6, %v2703_v48  ;;  %v5393_v34 = vadd.f32 %v5258_v12, %v2475_v7  ;;  %vm3091_vm6 = vweird.f32 %v3856_v6 }
 0x2c7   : > { %v2175_v22 = vpop.f32.mrf.mxu2  ;;  %vm3092_vm3 = vmor %vm3090_vm7, %vm3091_vm6 }
 0x2c8   : > { %v3858_v4 = vpop.eup %3857  ;;  %3246 = vst [vmem:[%s4984_s9 + $0xc0] sm:$0xff] %v3214_v60  ;;  %v3087_v52 = vsub.f32 1.0, %v3086_v28  ;;  %v3661_v31 = vmul.f32 -1.442695, %v5393_v34  ;;  %v2212_v58 = vadd.f32 %v2175_v22, %v2079_v62  ;;  %v2307_v51 = vpop.f32.mrf.mxu3 }
 0x2c9   : > { %v3860_v20 = vpop.eup %3859  ;;  %v5398_v30 = vadd.f32 1.0, %v3858_v4  ;;  %v2045_v43 = vpop.f32.mrf.mxu1 }
 0x2ca   : > { %v3088_v23 = vmul.f32 %v3856_v6, %v3087_v52  ;;  %v3101_v29 = vmul.f32 %v3860_v20, %v5388_v9  ;;  %3861 = vpow2.f32 %v3661_v31  ;;  %v2344_v46 = vadd.f32 %v2307_v51, %v2212_v58  ;;  %v2442_v55 = vpop.f32.mrf.mxu0 }
 0x2cb   : > { %3863 = vrcp.f32 %v5398_v30  ;;  %vm3106_vm1 = vweird.f32 %v3860_v20  ;;  %v2080_v37 = vadd.f32 %v2045_v43, %v4917_v19  ;;  %v3126_v21 = vand.u32 2147483648, %v5398_v30 }
 0x2cc   : > { %v3089_v40 = vadd.f32 %v3856_v6, %v3088_v23  ;;  %v3102_v33 = vsub.f32 1.0, %v3101_v29  ;;  %v2476_v13 = vadd.f32 %v2439_v44, %v2344_v46  ;;  %vm3107_vm8 = vmor %vm3105_vm5, %vm3106_vm1  ;;  %v3124_v45 = vand.u32 2147483647, %v5398_v30 }
 0x2cd   : > { %vm3120_vm11 = vweird.f32 %v5398_v30 }
 0x2ce   : > { %v3093_v39 = vsel %vm3092_vm3, %v3856_v6, %v3089_v40  ;;  %v3103_v54 = vmul.f32 %v3860_v20, %v3102_v33  ;;  %v5408_v59 = vadd.f32 %v5258_v12, %v2476_v13  ;;  %vm3125_vm13 = vcmp.eq.f32.partialorder %v3124_v45, 8.507059e+37 }
 0x2cf   : > { %v3098_v8 = vsel %vm3095_vm4, %v3097_v1, %v3093_v39  ;;  %v2178_v57 = vpop.f32.mrf.mxu2 }
 0x2d0   : > { %v3862_v15 = vpop.eup %3861  ;;  %v3215_v41 = vmul.f32 %v3098_v8, %v5366_v16  ;;  %v3104_v32 = vadd.f32 %v3860_v20, %v3103_v54  ;;  %v2310_v49 = vpop.f32.mrf.mxu3  ;;  %v2213_v61 = vadd.f32 %v2178_v57, %v2080_v37  ;;  %v3662_v16 = vmul.f32 -1.442695, %v5408_v59 }
 0x2d1   : > { %v3864_v50 = vpop.eup %3863  ;;  %v2706_v48 = vadd.f32 1.0, %v3862_v15  ;;  %v2047_v36 = vpop.f32.mrf.mxu1 }
 0x2d2   : > { %3247 = vst [vmem:[%s4984_s9 + $0xc8] sm:$0xff] %v3215_v41  ;;  %v3108_v19 = vsel %vm3107_vm8, %v3860_v20, %v3104_v32  ;;  %v3116_v56 = vmul.f32 %v3864_v50, %v5398_v30  ;;  %v2345_v18 = vadd.f32 %v2310_v49, %v2213_v61  ;;  %vm3121_vm10 = vweird.f32 %v3864_v50  ;;  %v2444_v4 = vpop.f32.mrf.mxu0 }
 0x2d3   : > { %v3113_v63 = vsel %vm3110_vm9, %v3112_v14, %v3108_v19  ;;  %3865 = vrcp.f32 %v2706_v48  ;;  %v2081_v9 = vadd.f32 %v2047_v36, %v4924_v10  ;;  %vm3122_vm12 = vmor %vm3120_vm11, %vm3121_vm10  ;;  %v3139_v51 = vand.u32 2147483647, %v2706_v48 }
 0x2d4   : > { %v3216_v2 = vmul.f32 %v3113_v63, %v5375_v0  ;;  %v3117_v3 = vsub.f32 1.0, %v3116_v56  ;;  %3867 = vpow2.f32 %v3662_v16  ;;  %v2477_v17 = vadd.f32 %v2442_v55, %v2345_v18 }
 0x2d5   : > { %v3127_v0 = vor.u32 1.1754944e-38, %v3126_v21  ;;  %v3141_v20 = vand.u32 2147483648, %v2706_v48  ;;  %vm3135_vm15 = vweird.f32 %v2706_v48  ;;  %vm3140_vm2 = vcmp.eq.f32.partialorder %v3139_v51, 8.507059e+37 }
 0x2d6   : > { %3248 = vst [vmem:[%s4984_s9 + $0xd0] sm:$0xff] %v3216_v2  ;;  %v3118_v38 = vmul.f32 %v3864_v50, %v3117_v3  ;;  %v5420_v7 = vadd.f32 %v5258_v12, %v2477_v17 }
 0x2d7   : > { %v2180_v47 = vpop.f32.mrf.mxu2  ;;  %v3142_v23 = vor.u32 1.1754944e-38, %v3141_v20 }
 0x2d8   : > { %v3119_v5 = vadd.f32 %v3864_v50, %v3118_v38  ;;  %v2214_v24 = vadd.f32 %v2180_v47, %v2081_v9  ;;  %v2312_v6 = vpop.f32.mrf.mxu3  ;;  %v3663_v22 = vmul.f32 -1.442695, %v5420_v7 }
 0x2d9   : > { %v3866_v26 = vpop.eup %3865 }
 0x2da   : > { %v3868_v42 = vpop.eup %3867  ;;  %v3123_v60 = vsel %vm3122_vm12, %v3864_v50, %v3119_v5  ;;  %v3131_v28 = vmul.f32 %v3866_v26, %v2706_v48  ;;  %v2346_v62 = vadd.f32 %v2312_v6, %v2214_v24  ;;  %vm3136_vm14 = vweird.f32 %v3866_v26 }
 0x2db   : > { %v3128_v10 = vsel %vm3125_vm13, %v3127_v0, %v3123_v60  ;;  %v2707_v44 = vadd.f32 1.0, %v3868_v42  ;;  %vm3137_vm0 = vmor %vm3135_vm15, %vm3136_vm14 }
 0x2dc   : > { %v3217_v52 = vmul.f32 %v3128_v10, %v5384_v35  ;;  %v3132_v31 = vsub.f32 1.0, %v3131_v28  ;;  %v2478_v58 = vadd.f32 %v2444_v4, %v2346_v62 }
 0x2dd   : > { %3869 = vrcp.f32 %v2707_v44  ;;  %v3154_v13 = vand.u32 2147483647, %v2707_v44  ;;  %vm3150_vm7 = vweird.f32 %v2707_v44 }
 0x2de   : > { %3249 = vst [vmem:[%s4984_s9 + $0xd8] sm:$0xff] %v3217_v52  ;;  %v3133_v27 = vmul.f32 %v3866_v26, %v3132_v31  ;;  %3871 = vpow2.f32 %v3663_v22  ;;  %v5426_v11 = vadd.f32 %v5258_v12, %v2478_v58  ;;  %v3156_v12 = vand.u32 2147483648, %v2707_v44 }
 0x2df   : > { %vm3155_vm4 = vcmp.eq.f32.partialorder %v3154_v13, 8.507059e+37 }
 0x2e0   : > { %v3134_v30 = vadd.f32 %v3866_v26, %v3133_v27  ;;  %v3664_v43 = vmul.f32 -1.442695, %v5426_v11  ;;  %v3157_v57 = vor.u32 1.1754944e-38, %v3156_v12 }
 0x2e2   : > { %v3138_v35 = vsel %vm3137_vm0, %v3866_v26, %v3134_v30  ;;  %3873 = vpow2.f32 %v3664_v43 }
 0x2e3   : > { %v3870_v29 = vpop.eup %3869  ;;  %v3143_v40 = vsel %vm3140_vm2, %v3142_v23, %v3138_v35 }
 0x2e4   : > { %v3872_v33 = vpop.eup %3871  ;;  %v3218_v46 = vmul.f32 %v3143_v40, %v5393_v34  ;;  %v3146_v1 = vmul.f32 %v3870_v29, %v2707_v44  ;;  %vm3151_vm6 = vweird.f32 %v3870_v29 }
 0x2e5   : > { %v2708_v53 = vadd.f32 1.0, %v3872_v33  ;;  %vm3152_vm3 = vmor %vm3150_vm7, %vm3151_vm6 }
 0x2e6   : > { %3250 = vst [vmem:[%s4984_s9 + $0xe0] sm:$0xff] %v3218_v46  ;;  %v3147_v25 = vsub.f32 1.0, %v3146_v1 }
 0x2e7   : > { %3875 = vrcp.f32 %v2708_v53  ;;  %v3169_v48 = vand.u32 2147483647, %v2708_v53  ;;  %v3171_v55 = vand.u32 2147483648, %v2708_v53  ;;  %vm3165_vm5 = vweird.f32 %v2708_v53 }
 0x2e8   : > { %v3874_v39 = vpop.eup %3873  ;;  %v3148_v54 = vmul.f32 %v3870_v29, %v3147_v25 }
 0x2e9   : > { %v2709_v8 = vadd.f32 1.0, %v3874_v39  ;;  %vm3170_vm9 = vcmp.eq.f32.partialorder %v3169_v48, 8.507059e+37  ;;  %v3172_v63 = vor.u32 1.1754944e-38, %v3171_v55 }
 0x2ea   : > { %v3149_v37 = vadd.f32 %v3870_v29, %v3148_v54 }
 0x2eb   : > { %3877 = vrcp.f32 %v2709_v8  ;;  %v3186_v36 = vand.u32 2147483648, %v2709_v8  ;;  %v3184_v3 = vand.u32 2147483647, %v2709_v8  ;;  %vm3180_vm11 = vweird.f32 %v2709_v8 }
 0x2ec   : > { %v3153_v15 = vsel %vm3152_vm3, %v3870_v29, %v3149_v37 }
 0x2ed   : > { %v3876_v34 = vpop.eup %3875  ;;  %v3158_v41 = vsel %vm3155_vm4, %v3157_v57, %v3153_v15  ;;  %v3187_v45 = vor.u32 1.1754944e-38, %v3186_v36  ;;  %vm3185_vm13 = vcmp.eq.f32.partialorder %v3184_v3, 8.507059e+37 }
 0x2ee   : > { %v3219_v32 = vmul.f32 %v3158_v41, %v5408_v59  ;;  %v3161_v49 = vmul.f32 %v3876_v34, %v2708_v53  ;;  %vm3166_vm1 = vweird.f32 %v3876_v34 }
 0x2ef   : > { %vm3167_vm8 = vmor %vm3165_vm5, %vm3166_vm1 }
 0x2f0   : > { %3251 = vst [vmem:[%s4984_s9 + $0xe8] sm:$0xff] %v3219_v32  ;;  %v3162_v50 = vsub.f32 1.0, %v3161_v49 }
 0x2f1   : > { %v3878_v14 = vpop.eup %3877 }
 0x2f2   : > { %v3163_v61 = vmul.f32 %v3876_v34, %v3162_v50  ;;  %v3176_v19 = vmul.f32 %v3878_v14, %v2709_v8  ;;  %vm3181_vm10 = vweird.f32 %v3878_v14 }
 0x2f3   : > { %vm3182_vm12 = vmor %vm3180_vm11, %vm3181_vm10 }
 0x2f4   : > { %v3164_v56 = vadd.f32 %v3876_v34, %v3163_v61  ;;  %v3177_v16 = vsub.f32 1.0, %v3176_v19 }
 0x2f6   : > { %v3168_v59 = vsel %vm3167_vm8, %v3876_v34, %v3164_v56  ;;  %v3178_v2 = vmul.f32 %v3878_v14, %v3177_v16 }
 0x2f7   : > { %v3173_v21 = vsel %vm3170_vm9, %v3172_v63, %v3168_v59 }
 0x2f8   : > { %v3220_v18 = vmul.f32 %v3173_v21, %v5420_v7  ;;  %v3179_v38 = vadd.f32 %v3878_v14, %v3178_v2 }
 0x2fa   : > { %3252 = vst [vmem:[%s4984_s9 + $0xf0] sm:$0xff] %v3220_v18  ;;  %v3183_v9 = vsel %vm3182_vm12, %v3878_v14, %v3179_v38 }
 0x2fb   : > { %v3188_v17 = vsel %vm3185_vm13, %v3187_v45, %v3183_v9 }
 0x2fc   : > { %v3221_v47 = vmul.f32 %v3188_v17, %v5426_v11 }
 0x2fe   : > { %3253 = vst [vmem:[%s4984_s9 + $0xf8] sm:$0xff] %v3221_v47 }
 0x2ff   : > { %3922 = shalt.err (!%p3919_p5)
}
 0x300   : > { %s3975_s7 = smov 128   ;;  %s3976_s9 = smov 8  }
 0x301   : > { %3693 = dma.vmem_to_hbm [thread:$0]  (%p4037_p4), %s3269_s15, 4096, %s3271_s26, %s3255_s27, %s3975_s7, %s3975_s7, %s3976_s9  }
 0x302 PF: > { %p3699_p6 = scmp.ge.s32.totalorder %s3973_s17, 2  ;;  %s3285_s10 = sand.u32 1, %s3953_s12  }
 0x303   : > { %s3286_s11 = scalar_lea.sflag [#allocation4], %s3285_s10 }
 0x304   : > { %p3696_p7 = pnand %p3699_p6, %p4044_p8 }
 0x306   : > { %p3697_p9 = pneg %p3696_p7 }
 0x308   : > { %3948 = dma.done.wait (%p3697_p9), %s3286_s11, 4096  }
 0x309   : > { %3950 = vsyncadd (%p3697_p9), %s3286_s11, 4294963200  ;;  %s16_s17 = sadd.s32 1, %s3973_s17   ;;  %s5563_s12 = smov %s3957_s13 }
 0x30a   : > { %p13_p10 = scmp.ge.s32.totalorder %s16_s17, 4   ;;  %s5564_s13 = smov %s3961_s14 }
 0x30b   : > { %s5565_s14 = smov %s4050_s25  ;;  %s5566_s15 = smov %s3969_s16 }
 0x30c   : > { %s5567_s16 = smov %s5569_s20  ;;  %15 = sbr.rel (!%p13_p10) target bundleno = 4 (0x4), region = 89 }
 0x311   :  { %3292 = vsyncpa [#allocation4], 1 }
 0x312   :  { %3294 = vsyncpa [#allocation4 + $0x1], 1 }

</bundles_post_ra>
